<compile_context>
chip_gen: v7x
topology: tpu7x:2x2x1
jax: 0.10.0
libtpu: 0.0.40
codegen_flags: <defaults>
</compile_context>

<pallas_src>
import functools

import jax
import jax.numpy as jnp
from jax import lax
from jax.experimental import pallas as pl
from jax.experimental.pallas import tpu as pltpu

EPS = 1e-5                     # nn.BatchNorm2d default eps
LANE = 128                     # lane width -> channel padding target
# bf16 MXU operands (bf16-native MXU on v5e/v6e/v7x, halves operand bytes);
# accumulation / statistics / elementwise math stay float32.
MATMUL_DTYPE = jnp.bfloat16


def _round_up(x, m):
    return (x + m - 1) // m * m


# ---------------------------------------------------------------------------
# Kernel 1: per-image 3x3 conv (3 deep-K MXU matmuls over kx-stacked slabs)
# with optional fused input pre-activation relu(x*scale+shift) and per-image
# partial BN statistics.
#   inputs : x   (1, H, W, Cin_p)        unpadded image tile
#            w   (3, 3*Cin_p, Cout_p)    per-ky, kx-stacked weight matrices
#            [pre_scale, pre_shift (1, Cin_p)]  fused BN+ReLU of prev stage
#   outputs: y    (1, H, W, Cout_p)      raw conv output (pre-BN), f32
#            psum (1, 1, Cout_p)         per-image sum over H*W
#            psq  (1, 1, Cout_p)         per-image sum of squares over H*W
#   scratch: xk_sc (H+2, W, 3*Cin_p)     bf16 kx-shifted tap slabs (VMEM pad)
# Grid axis = batch, "parallel" (stats are finalized outside the kernel).
# ---------------------------------------------------------------------------
def _conv3x3_kernel(has_pre, *refs):
    if has_pre:
        x_ref, w_ref, sc_ref, sh_ref, y_ref, psum_ref, psq_ref, xk_sc = refs
    else:
        x_ref, w_ref, y_ref, psum_ref, psq_ref, xk_sc = refs

    _, h, w, cin = x_ref.shape
    cout = y_ref.shape[-1]
    k3 = 3 * cin

    # Load the image; optionally fuse the previous stage's BN + ReLU here
    # (saves a standalone elementwise pass and its HBM round trip).
    x = x_ref[0].astype(jnp.float32)                       # (h, w, cin)
    if has_pre:
        x2 = x.reshape(h * w, cin)
        x2 = jnp.maximum(x2 * sc_ref[...] + sh_ref[...], 0.0)
        x = x2.reshape(h, w, cin)
    xm = x.astype(xk_sc.dtype)                             # bf16 MXU operands

    # Build the 3 kx-shifted slabs in VMEM.  The zero border of the scratch
    # realizes conv padding=1; channel block [kx*cin:(kx+1)*cin] holds tap kx,
    # so each ky step is a single K = 3*cin matmul.
    xk_sc[...] = jnp.zeros_like(xk_sc)
    xk_sc[1:h + 1, :, cin:2 * cin] = xm                    # kx=1 (aligned copy)
    xk_sc[1:h + 1, 1:w, 0:cin] = xm[:, 0:w - 1, :]         # kx=0
    xk_sc[1:h + 1, 0:w - 1, 2 * cin:k3] = xm[:, 1:w, :]    # kx=2

    acc = jnp.zeros((h * w, cout), jnp.float32)
    for ky in range(3):
        lhs = xk_sc[ky:ky + h].reshape(h * w, k3)          # layout-free (w%8==0)
        acc = acc + jnp.dot(lhs, w_ref[ky],
                            preferred_element_type=jnp.float32)

    y_ref[0] = acc.reshape(h, w, cout).astype(y_ref.dtype)
    # Per-image partial BN statistics; the tiny (N, Cout) reduction and the
    # folded (scale, shift) are computed in plain JAX outside the kernel so
    # this grid axis can stay "parallel".
    # NOTE: single-pass E[x^2]-E[x]^2 in f32 (clamped >= 0 at the fold).
    psum_ref[0] = jnp.sum(acc, axis=0, keepdims=True)
    psq_ref[0] = jnp.sum(acc * acc, axis=0, keepdims=True)


def _conv3x3_stage(x, w3, pre_scale=None, pre_shift=None):
    """3x3 conv (padding=1, stride=1) over lane-padded NHWC input.

    Returns (y, psum, psq).  If pre_scale/pre_shift are given,
    relu(x*pre_scale + pre_shift) is applied to the input inside the kernel.
    """
    n, h, w, cin = x.shape
    cout = w3.shape[-1]
    has_pre = pre_scale is not None
    kernel = functools.partial(_conv3x3_kernel, has_pre)

    in_specs = [
        pl.BlockSpec((1, h, w, cin), lambda i: (i, 0, 0, 0)),
        # Grid-invariant weights (bf16 halves their DMA bytes).
        pl.BlockSpec((3, 3 * cin, cout), lambda i: (0, 0, 0)),
    ]
    args = [x, w3]
    if has_pre:
        in_specs += [pl.BlockSpec((1, cin), lambda i: (0, 0)),
                     pl.BlockSpec((1, cin), lambda i: (0, 0))]
        args += [pre_scale, pre_shift]

    grid_spec = pltpu.PrefetchScalarGridSpec(
        num_scalar_prefetch=0,
        grid=(n,),
        in_specs=in_specs,
        out_specs=(
            pl.BlockSpec((1, h, w, cout), lambda i: (i, 0, 0, 0)),
            pl.BlockSpec((1, 1, cout), lambda i: (i, 0, 0)),
            pl.BlockSpec((1, 1, cout), lambda i: (i, 0, 0)),
        ),
        scratch_shapes=[pltpu.VMEM((h + 2, w, 3 * cin), MATMUL_DTYPE)],
    )
    return pl.pallas_call(
        kernel,
        out_shape=(jax.ShapeDtypeStruct((n, h, w, cout), jnp.float32),
                   jax.ShapeDtypeStruct((n, 1, cout), jnp.float32),
                   jax.ShapeDtypeStruct((n, 1, cout), jnp.float32)),
        grid_spec=grid_spec,
        compiler_params=pltpu.CompilerParams(
            dimension_semantics=("parallel",),   # per-image independent work
            vmem_limit_bytes=32 * 1024 * 1024),
    )(*args)


def _fold_bn(psum, psq, gamma, beta, count):
    """Tiny (N, 1, C) reduction + folded BN affine, in plain JAX."""
    mean = jnp.sum(psum, axis=0) / count                       # (1, C)
    var = jnp.maximum(jnp.sum(psq, axis=0) / count - mean * mean, 0.0)
    scale = gamma * lax.rsqrt(var + EPS)
    shift = beta - mean * scale
    return scale, shift


# ---------------------------------------------------------------------------
# Kernel 2: final lane-dense elementwise  out = relu(y*scale + shift + res).
# ---------------------------------------------------------------------------
def _bn_res_relu_kernel(y_ref, scale_ref, shift_ref, r_ref, o_ref):
    y = y_ref[...].astype(jnp.float32) * scale_ref[...] + shift_ref[...]
    o_ref[...] = jnp.maximum(y + r_ref[...], 0.0)


def _pick_row_tile(m, cp, max_bytes=2 << 20):
    for cand in (4096, 2048, 1024, 512, 256, 128, 64, 32, 16, 8):
        if m % cand == 0 and cand * cp * 4 <= max_bytes:
            return cand
    return m


def _bn_res_relu(y2d, scale, shift, residual):
    m, cp = y2d.shape
    tm = _pick_row_tile(m, cp)
    return pl.pallas_call(
        _bn_res_relu_kernel,
        out_shape=jax.ShapeDtypeStruct((m, cp), jnp.float32),
        grid=(m // tm,),
        in_specs=[pl.BlockSpec((tm, cp), lambda i: (i, 0)),
                  pl.BlockSpec((1, cp), lambda i: (0, 0)),
                  pl.BlockSpec((1, cp), lambda i: (0, 0)),
                  pl.BlockSpec((tm, cp), lambda i: (i, 0))],
        out_specs=pl.BlockSpec((tm, cp), lambda i: (i, 0)),
        compiler_params=pltpu.CompilerParams(
            dimension_semantics=("parallel",),
            vmem_limit_bytes=32 * 1024 * 1024),
    )(y2d, scale, shift, residual)


# ---------------------------------------------------------------------------
# Parameter prep (plain JAX): weights -> per-ky kx-stacked matrices (bf16),
# channel padding to the lane width.
# ---------------------------------------------------------------------------
def _prep_conv_weight(w_oihw, cin_p, cout_p):
    """PyTorch (Cout,Cin,3,3) -> (3, 3*Cin_p, Cout_p), K index = kx*Cin_p + ci."""
    cout, cin, kh, kw = w_oihw.shape
    w = jnp.transpose(w_oihw.astype(jnp.float32), (2, 3, 1, 0))   # (ky,kx,ci,co)
    w = jnp.pad(w, ((0, 0), (0, 0), (0, cin_p - cin), (0, cout_p - cout)))
    w = w.reshape(kh, kw * cin_p, cout_p)
    return w.astype(MATMUL_DTYPE)


def _prep_bn_param(p, c_p):
    p = p.astype(jnp.float32).reshape(1, -1)
    return jnp.pad(p, ((0, 0), (0, c_p - p.shape[1])))


def basic_block_forward(x_nchw, params):
    """BasicBlock forward (stride=1, downsample=None).  x is NCHW like PyTorch."""
    n, c, h, w = x_nchw.shape
    cp = _round_up(c, LANE)
    m = n * h * w
    count = float(m)

    # NHWC, channels padded to the lane width (lane-dense loads/stores).
    x_lane = jnp.pad(jnp.transpose(x_nchw, (0, 2, 3, 1)).astype(jnp.float32),
                     ((0, 0), (0, 0), (0, 0), (0, cp - c)))        # (N,H,W,Cp)

    w1 = _prep_conv_weight(params["conv1_w"], cp, cp)
    w2 = _prep_conv_weight(params["conv2_w"], cp, cp)
    g1 = _prep_bn_param(params["bn1_gamma"], cp)
    b1 = _prep_bn_param(params["bn1_beta"], cp)
    g2 = _prep_bn_param(params["bn2_gamma"], cp)
    b2 = _prep_bn_param(params["bn2_beta"], cp)

    # Stage 1: conv1 + per-image BN1 partial stats.
    y1, s1, q1 = _conv3x3_stage(x_lane, w1)
    sc1, sh1 = _fold_bn(s1, q1, g1, b1, count)

    # Stage 2: conv2 with BN1-apply + ReLU fused into its input path.
    y2, s2, q2 = _conv3x3_stage(y1, w2, pre_scale=sc1, pre_shift=sh1)
    sc2, sh2 = _fold_bn(s2, q2, g2, b2, count)

    # Final elementwise: BN2 + residual + ReLU.
    out = _bn_res_relu(y2.reshape(m, cp), sc2, sh2, x_lane.reshape(m, cp))

    out = out.reshape(n, h, w, cp)[:, :, :, :c]
    return jnp.transpose(out, (0, 3, 1, 2))                        # back to NCHW


# ---------------------------------------------------------------------------
# Pure-JAX reference (for a correctness sanity check).
# ---------------------------------------------------------------------------
def _bn_train_ref(y_nhwc, gamma, beta):
    mean = jnp.mean(y_nhwc, axis=(0, 1, 2), keepdims=True)
    var = jnp.mean(jnp.square(y_nhwc - mean), axis=(0, 1, 2), keepdims=True)
    return (y_nhwc - mean) * lax.rsqrt(var + EPS) * gamma + beta


def _conv3x3_ref(x_nhwc, w_oihw):
    w_hwio = jnp.transpose(w_oihw, (2, 3, 1, 0))
    return lax.conv_general_dilated(
        x_nhwc, w_hwio, window_strides=(1, 1), padding=((1, 1), (1, 1)),
        dimension_numbers=("NHWC", "HWIO", "NHWC"))


def basic_block_reference(x_nchw, params):
    x = jnp.transpose(x_nchw, (0, 2, 3, 1)).astype(jnp.float32)
    out = _conv3x3_ref(x, params["conv1_w"])
    out = _bn_train_ref(out, params["bn1_gamma"], params["bn1_beta"])
    out = jnp.maximum(out, 0.0)
    out = _conv3x3_ref(out, params["conv2_w"])
    out = _bn_train_ref(out, params["bn2_gamma"], params["bn2_beta"])
    out = jnp.maximum(out + x, 0.0)
    return jnp.transpose(out, (0, 3, 1, 2))


if __name__ == "__main__":
    # Small shapes: batch=2, channels=4 (inplanes == planes), spatial=16.
    N, C, H, W = 2, 4, 16, 16

    key = jax.random.PRNGKey(0)
    k_x, k_w1, k_w2, k_g1, k_b1, k_g2, k_b2 = jax.random.split(key, 7)

    x = jax.random.normal(k_x, (N, C, H, W), jnp.float32)
    params = {
        "conv1_w": 0.1 * jax.random.normal(k_w1, (C, C, 3, 3), jnp.float32),
        "conv2_w": 0.1 * jax.random.normal(k_w2, (C, C, 3, 3), jnp.float32),
        "bn1_gamma": 1.0 + 0.1 * jax.random.normal(k_g1, (C,), jnp.float32),
        "bn1_beta": 0.1 * jax.random.normal(k_b1, (C,), jnp.float32),
        "bn2_gamma": 1.0 + 0.1 * jax.random.normal(k_g2, (C,), jnp.float32),
        "bn2_beta": 0.1 * jax.random.normal(k_b2, (C,), jnp.float32),
    }

    out = jax.jit(basic_block_forward)(x, params)
    out = jax.block_until_ready(out)

    ref = jax.block_until_ready(basic_block_reference(x, params))
    assert out.shape == (N, C, H, W)
    err = float(jnp.max(jnp.abs(out - ref)))
    # bf16 MXU operands (f32 accumulation) vs the pure-f32 reference: BN's
    # variance division amplifies the conv rounding, so the match is loose
    # (~1e-2); a structural bug (tap/BN/residual) would give O(1) errors.
    assert err < 1e-1, f"mismatch vs reference: {err}"

    print("KERNEL_OK")
</pallas_src>

<mosaic_0001>
module attributes {stable_mosaic.version = 11 : i64} {
  func.func @_conv3x3_kernel(%arg0: i32, %arg1: memref<1x16x16x128xf32, #tpu.memory_space<vmem>>, %arg2: memref<3x384x128xbf16, #tpu.memory_space<vmem>>, %arg3: memref<1x16x16x128xf32, #tpu.memory_space<vmem>>, %arg4: memref<1x1x128xf32, #tpu.memory_space<vmem>>, %arg5: memref<1x1x128xf32, #tpu.memory_space<vmem>>, %arg6: memref<18x16x384xbf16, #tpu.memory_space<vmem>>) attributes {dimension_semantics = [#tpu.dimension_semantics<parallel>], iteration_bounds = array<i64: 2>, scalar_prefetch = 0 : i64, scratch_operands = 1 : i64, tpu.core_type = #tpu.core_type<tc>, window_params = [{transform_indices = @transform_0, window_bounds = array<i64: 1, 16, 16, 128>}, {pipeline_mode = #tpu.pipeline_mode<synchronous>, transform_indices = @transform_1, window_bounds = array<i64: 3, 384, 128>}, {transform_indices = @transform_2, window_bounds = array<i64: 1, 16, 16, 128>}, {transform_indices = @transform_3, window_bounds = array<i64: 1, 1, 128>}, {transform_indices = @transform_4, window_bounds = array<i64: 1, 1, 128>}]} {
    %c0 = arith.constant 0 : index
    %c0_0 = arith.constant 0 : index
    %c0_1 = arith.constant 0 : index
    %c0_2 = arith.constant 0 : index
    %0 = vector.load %arg1[%c0, %c0_0, %c0_1, %c0_2] : memref<1x16x16x128xf32, #tpu.memory_space<vmem>>, vector<1x16x16x128xf32>
    %1 = vector.shape_cast %0 : vector<1x16x16x128xf32> to vector<16x16x128xf32>
    %2 = arith.truncf %1 : vector<16x16x128xf32> to vector<16x16x128xbf16>
    %cst = arith.constant 0.000000e+00 : bf16
    %3 = vector.broadcast %cst : bf16 to vector<18x16x384xbf16>
    %c0_3 = arith.constant 0 : index
    %c0_4 = arith.constant 0 : index
    %c0_5 = arith.constant 0 : index
    %4 = vector.load %arg6[%c0_3, %c0_4, %c0_5] : memref<18x16x384xbf16, #tpu.memory_space<vmem>>, vector<18x16x384xbf16>
    tpu.vector_store %arg6[%c0_3, %c0_4, %c0_5], %3 {strides = array<i32>} : memref<18x16x384xbf16, #tpu.memory_space<vmem>>, vector<18x16x384xbf16>,
    %c1 = arith.constant 1 : index
    %c0_6 = arith.constant 0 : index
    %c128 = arith.constant 128 : index
    %5 = vector.load %arg6[%c1, %c0_6, %c128] : memref<18x16x384xbf16, #tpu.memory_space<vmem>>, vector<16x16x128xbf16>
    tpu.vector_store %arg6[%c1, %c0_6, %c128], %2 {strides = array<i32>} : memref<18x16x384xbf16, #tpu.memory_space<vmem>>, vector<16x16x128xbf16>,
    %6 = vector.extract_strided_slice %2 {offsets = [0, 0, 0], sizes = [16, 15, 128], strides = [1, 1, 1]} : vector<16x16x128xbf16> to vector<16x15x128xbf16>
    %c1_7 = arith.constant 1 : index
    %c1_8 = arith.constant 1 : index
    %c0_9 = arith.constant 0 : index
    %7 = vector.load %arg6[%c1_7, %c1_8, %c0_9] : memref<18x16x384xbf16, #tpu.memory_space<vmem>>, vector<16x15x128xbf16>
    tpu.vector_store %arg6[%c1_7, %c1_8, %c0_9], %6 {strides = array<i32>} : memref<18x16x384xbf16, #tpu.memory_space<vmem>>, vector<16x15x128xbf16>,
    %8 = vector.extract_strided_slice %2 {offsets = [0, 1, 0], sizes = [16, 15, 128], strides = [1, 1, 1]} : vector<16x16x128xbf16> to vector<16x15x128xbf16>
    %c1_10 = arith.constant 1 : index
    %c0_11 = arith.constant 0 : index
    %c256 = arith.constant 256 : index
    %9 = vector.load %arg6[%c1_10, %c0_11, %c256] : memref<18x16x384xbf16, #tpu.memory_space<vmem>>, vector<16x15x128xbf16>
    tpu.vector_store %arg6[%c1_10, %c0_11, %c256], %8 {strides = array<i32>} : memref<18x16x384xbf16, #tpu.memory_space<vmem>>, vector<16x15x128xbf16>,
    %cst_12 = arith.constant 0.000000e+00 : f32
    %10 = vector.broadcast %cst_12 : f32 to vector<256x128xf32>
    %c0_13 = arith.constant 0 : index
    %c0_14 = arith.constant 0 : index
    %c0_15 = arith.constant 0 : index
    %11 = vector.load %arg6[%c0_13, %c0_14, %c0_15] : memref<18x16x384xbf16, #tpu.memory_space<vmem>>, vector<16x16x384xbf16>
    %12 = vector.shape_cast %11 : vector<16x16x384xbf16> to vector<256x384xbf16>
    %c0_16 = arith.constant 0 : index
    %c0_17 = arith.constant 0 : index
    %c0_18 = arith.constant 0 : index
    %13 = vector.load %arg2[%c0_16, %c0_17, %c0_18] : memref<3x384x128xbf16, #tpu.memory_space<vmem>>, vector<1x384x128xbf16>
    %14 = vector.shape_cast %13 : vector<1x384x128xbf16> to vector<384x128xbf16>
    %cst_19 = arith.constant dense<0.000000e+00> : vector<256x128xf32>
    %15 = tpu.matmul %12, %14, %cst_19 {dimension_numbers = #tpu.dot_dimension_numbers<[1], [0], [0], [1], [0, 0, 1, 1], [], []>} : vector<256x384xbf16>, vector<384x128xbf16>, vector<256x128xf32> -> vector<256x128xf32>
    %16 = arith.addf %10, %15 : vector<256x128xf32>
    %c1_20 = arith.constant 1 : index
    %c0_21 = arith.constant 0 : index
    %c0_22 = arith.constant 0 : index
    %17 = vector.load %arg6[%c1_20, %c0_21, %c0_22] : memref<18x16x384xbf16, #tpu.memory_space<vmem>>, vector<16x16x384xbf16>
    %18 = vector.shape_cast %17 : vector<16x16x384xbf16> to vector<256x384xbf16>
    %c1_23 = arith.constant 1 : index
    %c0_24 = arith.constant 0 : index
    %c0_25 = arith.constant 0 : index
    %19 = vector.load %arg2[%c1_23, %c0_24, %c0_25] : memref<3x384x128xbf16, #tpu.memory_space<vmem>>, vector<1x384x128xbf16>
    %20 = vector.shape_cast %19 : vector<1x384x128xbf16> to vector<384x128xbf16>
    %cst_26 = arith.constant dense<0.000000e+00> : vector<256x128xf32>
    %21 = tpu.matmul %18, %20, %cst_26 {dimension_numbers = #tpu.dot_dimension_numbers<[1], [0], [0], [1], [0, 0, 1, 1], [], []>} : vector<256x384xbf16>, vector<384x128xbf16>, vector<256x128xf32> -> vector<256x128xf32>
    %22 = arith.addf %16, %21 : vector<256x128xf32>
    %c2 = arith.constant 2 : index
    %c0_27 = arith.constant 0 : index
    %c0_28 = arith.constant 0 : index
    %23 = vector.load %arg6[%c2, %c0_27, %c0_28] : memref<18x16x384xbf16, #tpu.memory_space<vmem>>, vector<16x16x384xbf16>
    %24 = vector.shape_cast %23 : vector<16x16x384xbf16> to vector<256x384xbf16>
    %c2_29 = arith.constant 2 : index
    %c0_30 = arith.constant 0 : index
    %c0_31 = arith.constant 0 : index
    %25 = vector.load %arg2[%c2_29, %c0_30, %c0_31] : memref<3x384x128xbf16, #tpu.memory_space<vmem>>, vector<1x384x128xbf16>
    %26 = vector.shape_cast %25 : vector<1x384x128xbf16> to vector<384x128xbf16>
    %cst_32 = arith.constant dense<0.000000e+00> : vector<256x128xf32>
    %27 = tpu.matmul %24, %26, %cst_32 {dimension_numbers = #tpu.dot_dimension_numbers<[1], [0], [0], [1], [0, 0, 1, 1], [], []>} : vector<256x384xbf16>, vector<384x128xbf16>, vector<256x128xf32> -> vector<256x128xf32>
    %28 = arith.addf %22, %27 : vector<256x128xf32>
    %29 = vector.shape_cast %28 : vector<256x128xf32> to vector<16x16x128xf32>
    %c0_33 = arith.constant 0 : index
    %c0_34 = arith.constant 0 : index
    %c0_35 = arith.constant 0 : index
    %c0_36 = arith.constant 0 : index
    %30 = vector.load %arg3[%c0_33, %c0_34, %c0_35, %c0_36] : memref<1x16x16x128xf32, #tpu.memory_space<vmem>>, vector<1x16x16x128xf32>
    %31 = vector.shape_cast %30 : vector<1x16x16x128xf32> to vector<16x16x128xf32>
    %32 = vector.shape_cast %29 : vector<16x16x128xf32> to vector<1x16x16x128xf32>
    tpu.vector_store %arg3[%c0_33, %c0_34, %c0_35, %c0_36], %32 {strides = array<i32>} : memref<1x16x16x128xf32, #tpu.memory_space<vmem>>, vector<1x16x16x128xf32>,
    %cst_37 = arith.constant dense<0.000000e+00> : vector<128xf32>
    %33 = vector.multi_reduction <add>, %28, %cst_37 [0] : vector<256x128xf32> to vector<128xf32>
    %34 = vector.shape_cast %33 : vector<128xf32> to vector<1x128xf32>
    %c0_38 = arith.constant 0 : index
    %c0_39 = arith.constant 0 : index
    %c0_40 = arith.constant 0 : index
    %35 = vector.load %arg4[%c0_38, %c0_39, %c0_40] : memref<1x1x128xf32, #tpu.memory_space<vmem>>, vector<1x1x128xf32>
    %36 = vector.shape_cast %35 : vector<1x1x128xf32> to vector<1x128xf32>
    %37 = vector.shape_cast %34 : vector<1x128xf32> to vector<1x1x128xf32>
    tpu.vector_store %arg4[%c0_38, %c0_39, %c0_40], %37 {strides = array<i32>} : memref<1x1x128xf32, #tpu.memory_space<vmem>>, vector<1x1x128xf32>,
    %38 = arith.mulf %28, %28 : vector<256x128xf32>
    %cst_41 = arith.constant dense<0.000000e+00> : vector<128xf32>
    %39 = vector.multi_reduction <add>, %38, %cst_41 [0] : vector<256x128xf32> to vector<128xf32>
    %40 = vector.shape_cast %39 : vector<128xf32> to vector<1x128xf32>
    %c0_42 = arith.constant 0 : index
    %c0_43 = arith.constant 0 : index
    %c0_44 = arith.constant 0 : index
    %41 = vector.load %arg5[%c0_42, %c0_43, %c0_44] : memref<1x1x128xf32, #tpu.memory_space<vmem>>, vector<1x1x128xf32>
    %42 = vector.shape_cast %41 : vector<1x1x128xf32> to vector<1x128xf32>
    %43 = vector.shape_cast %40 : vector<1x128xf32> to vector<1x1x128xf32>
    tpu.vector_store %arg5[%c0_42, %c0_43, %c0_44], %43 {strides = array<i32>} : memref<1x1x128xf32, #tpu.memory_space<vmem>>, vector<1x1x128xf32>,
    return
  }
  func.func @transform_0(%arg0: i32) -> (i32, i32, i32, i32) {
    %c0_i32 = arith.constant 0 : i32
    %c0_i32_0 = arith.constant 0 : i32
    %c0_i32_1 = arith.constant 0 : i32
    %c0_i32_2 = arith.constant 0 : i32
    return %arg0, %c0_i32, %c0_i32_0, %c0_i32_1 : i32, i32, i32, i32
  }
  func.func @transform_1(%arg0: i32) -> (i32, i32, i32) {
    %c0_i32 = arith.constant 0 : i32
    %c0_i32_0 = arith.constant 0 : i32
    %c0_i32_1 = arith.constant 0 : i32
    %c0_i32_2 = arith.constant 0 : i32
    return %c0_i32, %c0_i32_0, %c0_i32_1 : i32, i32, i32
  }
  func.func @transform_2(%arg0: i32) -> (i32, i32, i32, i32) {
    %c0_i32 = arith.constant 0 : i32
    %c0_i32_0 = arith.constant 0 : i32
    %c0_i32_1 = arith.constant 0 : i32
    %c0_i32_2 = arith.constant 0 : i32
    return %arg0, %c0_i32, %c0_i32_0, %c0_i32_1 : i32, i32, i32, i32
  }
  func.func @transform_3(%arg0: i32) -> (i32, i32, i32) {
    %c0_i32 = arith.constant 0 : i32
    %c0_i32_0 = arith.constant 0 : i32
    %c0_i32_1 = arith.constant 0 : i32
    return %arg0, %c0_i32, %c0_i32_0 : i32, i32, i32
  }
  func.func @transform_4(%arg0: i32) -> (i32, i32, i32) {
    %c0_i32 = arith.constant 0 : i32
    %c0_i32_0 = arith.constant 0 : i32
    %c0_i32_1 = arith.constant 0 : i32
    return %arg0, %c0_i32, %c0_i32_0 : i32, i32, i32
  }
}

module attributes {stable_mosaic.version = 11 : i64} {
  func.func @_bn_res_relu_kernel(%arg0: i32, %arg1: memref<512x128xf32, #tpu.memory_space<vmem>>, %arg2: memref<1x128xf32, #tpu.memory_space<vmem>>, %arg3: memref<1x128xf32, #tpu.memory_space<vmem>>, %arg4: memref<512x128xf32, #tpu.memory_space<vmem>>, %arg5: memref<512x128xf32, #tpu.memory_space<vmem>>) attributes {dimension_semantics = [#tpu.dimension_semantics<parallel>], iteration_bounds = array<i64: 1>, scalar_prefetch = 0 : i64, scratch_operands = 0 : i64, tpu.core_type = #tpu.core_type<tc>, window_params = [{transform_indices = @transform_0, window_bounds = array<i64: 512, 128>}, {pipeline_mode = #tpu.pipeline_mode<synchronous>, transform_indices = @transform_1, window_bounds = array<i64: 1, 128>}, {pipeline_mode = #tpu.pipeline_mode<synchronous>, transform_indices = @transform_2, window_bounds = array<i64: 1, 128>}, {transform_indices = @transform_3, window_bounds = array<i64: 512, 128>}, {transform_indices = @transform_4, window_bounds = array<i64: 512, 128>}]} {
    %c0 = arith.constant 0 : index
    %c0_0 = arith.constant 0 : index
    %0 = vector.load %arg1[%c0, %c0_0] : memref<512x128xf32, #tpu.memory_space<vmem>>, vector<512x128xf32>
    %c0_1 = arith.constant 0 : index
    %c0_2 = arith.constant 0 : index
    %1 = vector.load %arg2[%c0_1, %c0_2] : memref<1x128xf32, #tpu.memory_space<vmem>>, vector<1x128xf32>
    %2 = vector.broadcast %1 : vector<1x128xf32> to vector<512x128xf32>
    %3 = arith.mulf %0, %2 : vector<512x128xf32>
    %c0_3 = arith.constant 0 : index
    %c0_4 = arith.constant 0 : index
    %4 = vector.load %arg3[%c0_3, %c0_4] : memref<1x128xf32, #tpu.memory_space<vmem>>, vector<1x128xf32>
    %5 = vector.broadcast %4 : vector<1x128xf32> to vector<512x128xf32>
    %6 = arith.addf %3, %5 : vector<512x128xf32>
    %c0_5 = arith.constant 0 : index
    %c0_6 = arith.constant 0 : index
    %7 = vector.load %arg4[%c0_5, %c0_6] : memref<512x128xf32, #tpu.memory_space<vmem>>, vector<512x128xf32>
    %8 = arith.addf %6, %7 : vector<512x128xf32>
    %cst = arith.constant 0.000000e+00 : f32
    %9 = vector.broadcast %cst : f32 to vector<512x128xf32>
    %10 = arith.maximumf %8, %9 : vector<512x128xf32>
    %c0_7 = arith.constant 0 : index
    %c0_8 = arith.constant 0 : index
    %11 = vector.load %arg5[%c0_7, %c0_8] : memref<512x128xf32, #tpu.memory_space<vmem>>, vector<512x128xf32>
    tpu.vector_store %arg5[%c0_7, %c0_8], %10 {strides = array<i32>} : memref<512x128xf32, #tpu.memory_space<vmem>>, vector<512x128xf32>,
    return
  }
  func.func @transform_0(%arg0: i32) -> (i32, i32) {
    %c0_i32 = arith.constant 0 : i32
    %c0_i32_0 = arith.constant 0 : i32
    return %arg0, %c0_i32 : i32, i32
  }
  func.func @transform_1(%arg0: i32) -> (i32, i32) {
    %c0_i32 = arith.constant 0 : i32
    %c0_i32_0 = arith.constant 0 : i32
    %c0_i32_1 = arith.constant 0 : i32
    return %c0_i32, %c0_i32_0 : i32, i32
  }
  func.func @transform_2(%arg0: i32) -> (i32, i32) {
    %c0_i32 = arith.constant 0 : i32
    %c0_i32_0 = arith.constant 0 : i32
    %c0_i32_1 = arith.constant 0 : i32
    return %c0_i32, %c0_i32_0 : i32, i32
  }
  func.func @transform_3(%arg0: i32) -> (i32, i32) {
    %c0_i32 = arith.constant 0 : i32
    %c0_i32_0 = arith.constant 0 : i32
    return %arg0, %c0_i32 : i32, i32
  }
  func.func @transform_4(%arg0: i32) -> (i32, i32) {
    %c0_i32 = arith.constant 0 : i32
    %c0_i32_0 = arith.constant 0 : i32
    return %arg0, %c0_i32 : i32, i32
  }
}

module attributes {stable_mosaic.version = 11 : i64} {
  func.func @_conv3x3_kernel(%arg0: i32, %arg1: memref<1x16x16x128xf32, #tpu.memory_space<vmem>>, %arg2: memref<3x384x128xbf16, #tpu.memory_space<vmem>>, %arg3: memref<1x128xf32, #tpu.memory_space<vmem>>, %arg4: memref<1x128xf32, #tpu.memory_space<vmem>>, %arg5: memref<1x16x16x128xf32, #tpu.memory_space<vmem>>, %arg6: memref<1x1x128xf32, #tpu.memory_space<vmem>>, %arg7: memref<1x1x128xf32, #tpu.memory_space<vmem>>, %arg8: memref<18x16x384xbf16, #tpu.memory_space<vmem>>) attributes {dimension_semantics = [#tpu.dimension_semantics<parallel>], iteration_bounds = array<i64: 2>, scalar_prefetch = 0 : i64, scratch_operands = 1 : i64, tpu.core_type = #tpu.core_type<tc>, window_params = [{transform_indices = @transform_0, window_bounds = array<i64: 1, 16, 16, 128>}, {pipeline_mode = #tpu.pipeline_mode<synchronous>, transform_indices = @transform_1, window_bounds = array<i64: 3, 384, 128>}, {pipeline_mode = #tpu.pipeline_mode<synchronous>, transform_indices = @transform_2, window_bounds = array<i64: 1, 128>}, {pipeline_mode = #tpu.pipeline_mode<synchronous>, transform_indices = @transform_3, window_bounds = array<i64: 1, 128>}, {transform_indices = @transform_4, window_bounds = array<i64: 1, 16, 16, 128>}, {transform_indices = @transform_5, window_bounds = array<i64: 1, 1, 128>}, {transform_indices = @transform_6, window_bounds = array<i64: 1, 1, 128>}]} {
    %c0 = arith.constant 0 : index
    %c0_0 = arith.constant 0 : index
    %c0_1 = arith.constant 0 : index
    %c0_2 = arith.constant 0 : index
    %0 = vector.load %arg1[%c0, %c0_0, %c0_1, %c0_2] : memref<1x16x16x128xf32, #tpu.memory_space<vmem>>, vector<1x16x16x128xf32>
    %1 = vector.shape_cast %0 : vector<1x16x16x128xf32> to vector<16x16x128xf32>
    %2 = vector.shape_cast %1 : vector<16x16x128xf32> to vector<256x128xf32>
    %c0_3 = arith.constant 0 : index
    %c0_4 = arith.constant 0 : index
    %3 = vector.load %arg3[%c0_3, %c0_4] : memref<1x128xf32, #tpu.memory_space<vmem>>, vector<1x128xf32>
    %4 = vector.broadcast %3 : vector<1x128xf32> to vector<256x128xf32>
    %5 = arith.mulf %2, %4 : vector<256x128xf32>
    %c0_5 = arith.constant 0 : index
    %c0_6 = arith.constant 0 : index
    %6 = vector.load %arg4[%c0_5, %c0_6] : memref<1x128xf32, #tpu.memory_space<vmem>>, vector<1x128xf32>
    %7 = vector.broadcast %6 : vector<1x128xf32> to vector<256x128xf32>
    %8 = arith.addf %5, %7 : vector<256x128xf32>
    %cst = arith.constant 0.000000e+00 : f32
    %9 = vector.broadcast %cst : f32 to vector<256x128xf32>
    %10 = arith.maximumf %8, %9 : vector<256x128xf32>
    %11 = vector.shape_cast %10 : vector<256x128xf32> to vector<16x16x128xf32>
    %12 = arith.truncf %11 : vector<16x16x128xf32> to vector<16x16x128xbf16>
    %cst_7 = arith.constant 0.000000e+00 : bf16
    %13 = vector.broadcast %cst_7 : bf16 to vector<18x16x384xbf16>
    %c0_8 = arith.constant 0 : index
    %c0_9 = arith.constant 0 : index
    %c0_10 = arith.constant 0 : index
    %14 = vector.load %arg8[%c0_8, %c0_9, %c0_10] : memref<18x16x384xbf16, #tpu.memory_space<vmem>>, vector<18x16x384xbf16>
    tpu.vector_store %arg8[%c0_8, %c0_9, %c0_10], %13 {strides = array<i32>} : memref<18x16x384xbf16, #tpu.memory_space<vmem>>, vector<18x16x384xbf16>,
    %c1 = arith.constant 1 : index
    %c0_11 = arith.constant 0 : index
    %c128 = arith.constant 128 : index
    %15 = vector.load %arg8[%c1, %c0_11, %c128] : memref<18x16x384xbf16, #tpu.memory_space<vmem>>, vector<16x16x128xbf16>
    tpu.vector_store %arg8[%c1, %c0_11, %c128], %12 {strides = array<i32>} : memref<18x16x384xbf16, #tpu.memory_space<vmem>>, vector<16x16x128xbf16>,
    %16 = vector.extract_strided_slice %12 {offsets = [0, 0, 0], sizes = [16, 15, 128], strides = [1, 1, 1]} : vector<16x16x128xbf16> to vector<16x15x128xbf16>
    %c1_12 = arith.constant 1 : index
    %c1_13 = arith.constant 1 : index
    %c0_14 = arith.constant 0 : index
    %17 = vector.load %arg8[%c1_12, %c1_13, %c0_14] : memref<18x16x384xbf16, #tpu.memory_space<vmem>>, vector<16x15x128xbf16>
    tpu.vector_store %arg8[%c1_12, %c1_13, %c0_14], %16 {strides = array<i32>} : memref<18x16x384xbf16, #tpu.memory_space<vmem>>, vector<16x15x128xbf16>,
    %18 = vector.extract_strided_slice %12 {offsets = [0, 1, 0], sizes = [16, 15, 128], strides = [1, 1, 1]} : vector<16x16x128xbf16> to vector<16x15x128xbf16>
    %c1_15 = arith.constant 1 : index
    %c0_16 = arith.constant 0 : index
    %c256 = arith.constant 256 : index
    %19 = vector.load %arg8[%c1_15, %c0_16, %c256] : memref<18x16x384xbf16, #tpu.memory_space<vmem>>, vector<16x15x128xbf16>
    tpu.vector_store %arg8[%c1_15, %c0_16, %c256], %18 {strides = array<i32>} : memref<18x16x384xbf16, #tpu.memory_space<vmem>>, vector<16x15x128xbf16>,
    %cst_17 = arith.constant 0.000000e+00 : f32
    %20 = vector.broadcast %cst_17 : f32 to vector<256x128xf32>
    %c0_18 = arith.constant 0 : index
    %c0_19 = arith.constant 0 : index
    %c0_20 = arith.constant 0 : index
    %21 = vector.load %arg8[%c0_18, %c0_19, %c0_20] : memref<18x16x384xbf16, #tpu.memory_space<vmem>>, vector<16x16x384xbf16>
    %22 = vector.shape_cast %21 : vector<16x16x384xbf16> to vector<256x384xbf16>
    %c0_21 = arith.constant 0 : index
    %c0_22 = arith.constant 0 : index
    %c0_23 = arith.constant 0 : index
    %23 = vector.load %arg2[%c0_21, %c0_22, %c0_23] : memref<3x384x128xbf16, #tpu.memory_space<vmem>>, vector<1x384x128xbf16>
    %24 = vector.shape_cast %23 : vector<1x384x128xbf16> to vector<384x128xbf16>
    %cst_24 = arith.constant dense<0.000000e+00> : vector<256x128xf32>
    %25 = tpu.matmul %22, %24, %cst_24 {dimension_numbers = #tpu.dot_dimension_numbers<[1], [0], [0], [1], [0, 0, 1, 1], [], []>} : vector<256x384xbf16>, vector<384x128xbf16>, vector<256x128xf32> -> vector<256x128xf32>
    %26 = arith.addf %20, %25 : vector<256x128xf32>
    %c1_25 = arith.constant 1 : index
    %c0_26 = arith.constant 0 : index
    %c0_27 = arith.constant 0 : index
    %27 = vector.load %arg8[%c1_25, %c0_26, %c0_27] : memref<18x16x384xbf16, #tpu.memory_space<vmem>>, vector<16x16x384xbf16>
    %28 = vector.shape_cast %27 : vector<16x16x384xbf16> to vector<256x384xbf16>
    %c1_28 = arith.constant 1 : index
    %c0_29 = arith.constant 0 : index
    %c0_30 = arith.constant 0 : index
    %29 = vector.load %arg2[%c1_28, %c0_29, %c0_30] : memref<3x384x128xbf16, #tpu.memory_space<vmem>>, vector<1x384x128xbf16>
    %30 = vector.shape_cast %29 : vector<1x384x128xbf16> to vector<384x128xbf16>
    %cst_31 = arith.constant dense<0.000000e+00> : vector<256x128xf32>
    %31 = tpu.matmul %28, %30, %cst_31 {dimension_numbers = #tpu.dot_dimension_numbers<[1], [0], [0], [1], [0, 0, 1, 1], [], []>} : vector<256x384xbf16>, vector<384x128xbf16>, vector<256x128xf32> -> vector<256x128xf32>
    %32 = arith.addf %26, %31 : vector<256x128xf32>
    %c2 = arith.constant 2 : index
    %c0_32 = arith.constant 0 : index
    %c0_33 = arith.constant 0 : index
    %33 = vector.load %arg8[%c2, %c0_32, %c0_33] : memref<18x16x384xbf16, #tpu.memory_space<vmem>>, vector<16x16x384xbf16>
    %34 = vector.shape_cast %33 : vector<16x16x384xbf16> to vector<256x384xbf16>
    %c2_34 = arith.constant 2 : index
    %c0_35 = arith.constant 0 : index
    %c0_36 = arith.constant 0 : index
    %35 = vector.load %arg2[%c2_34, %c0_35, %c0_36] : memref<3x384x128xbf16, #tpu.memory_space<vmem>>, vector<1x384x128xbf16>
    %36 = vector.shape_cast %35 : vector<1x384x128xbf16> to vector<384x128xbf16>
    %cst_37 = arith.constant dense<0.000000e+00> : vector<256x128xf32>
    %37 = tpu.matmul %34, %36, %cst_37 {dimension_numbers = #tpu.dot_dimension_numbers<[1], [0], [0], [1], [0, 0, 1, 1], [], []>} : vector<256x384xbf16>, vector<384x128xbf16>, vector<256x128xf32> -> vector<256x128xf32>
    %38 = arith.addf %32, %37 : vector<256x128xf32>
    %39 = vector.shape_cast %38 : vector<256x128xf32> to vector<16x16x128xf32>
    %c0_38 = arith.constant 0 : index
    %c0_39 = arith.constant 0 : index
    %c0_40 = arith.constant 0 : index
    %c0_41 = arith.constant 0 : index
    %40 = vector.load %arg5[%c0_38, %c0_39, %c0_40, %c0_41] : memref<1x16x16x128xf32, #tpu.memory_space<vmem>>, vector<1x16x16x128xf32>
    %41 = vector.shape_cast %40 : vector<1x16x16x128xf32> to vector<16x16x128xf32>
    %42 = vector.shape_cast %39 : vector<16x16x128xf32> to vector<1x16x16x128xf32>
    tpu.vector_store %arg5[%c0_38, %c0_39, %c0_40, %c0_41], %42 {strides = array<i32>} : memref<1x16x16x128xf32, #tpu.memory_space<vmem>>, vector<1x16x16x128xf32>,
    %cst_42 = arith.constant dense<0.000000e+00> : vector<128xf32>
    %43 = vector.multi_reduction <add>, %38, %cst_42 [0] : vector<256x128xf32> to vector<128xf32>
    %44 = vector.shape_cast %43 : vector<128xf32> to vector<1x128xf32>
    %c0_43 = arith.constant 0 : index
    %c0_44 = arith.constant 0 : index
    %c0_45 = arith.constant 0 : index
    %45 = vector.load %arg6[%c0_43, %c0_44, %c0_45] : memref<1x1x128xf32, #tpu.memory_space<vmem>>, vector<1x1x128xf32>
    %46 = vector.shape_cast %45 : vector<1x1x128xf32> to vector<1x128xf32>
    %47 = vector.shape_cast %44 : vector<1x128xf32> to vector<1x1x128xf32>
    tpu.vector_store %arg6[%c0_43, %c0_44, %c0_45], %47 {strides = array<i32>} : memref<1x1x128xf32, #tpu.memory_space<vmem>>, vector<1x1x128xf32>,
    %48 = arith.mulf %38, %38 : vector<256x128xf32>
    %cst_46 = arith.constant dense<0.000000e+00> : vector<128xf32>
    %49 = vector.multi_reduction <add>, %48, %cst_46 [0] : vector<256x128xf32> to vector<128xf32>
    %50 = vector.shape_cast %49 : vector<128xf32> to vector<1x128xf32>
    %c0_47 = arith.constant 0 : index
    %c0_48 = arith.constant 0 : index
    %c0_49 = arith.constant 0 : index
    %51 = vector.load %arg7[%c0_47, %c0_48, %c0_49] : memref<1x1x128xf32, #tpu.memory_space<vmem>>, vector<1x1x128xf32>
    %52 = vector.shape_cast %51 : vector<1x1x128xf32> to vector<1x128xf32>
    %53 = vector.shape_cast %50 : vector<1x128xf32> to vector<1x1x128xf32>
    tpu.vector_store %arg7[%c0_47, %c0_48, %c0_49], %53 {strides = array<i32>} : memref<1x1x128xf32, #tpu.memory_space<vmem>>, vector<1x1x128xf32>,
    return
  }
  func.func @transform_0(%arg0: i32) -> (i32, i32, i32, i32) {
    %c0_i32 = arith.constant 0 : i32
    %c0_i32_0 = arith.constant 0 : i32
    %c0_i32_1 = arith.constant 0 : i32
    %c0_i32_2 = arith.constant 0 : i32
    return %arg0, %c0_i32, %c0_i32_0, %c0_i32_1 : i32, i32, i32, i32
  }
  func.func @transform_1(%arg0: i32) -> (i32, i32, i32) {
    %c0_i32 = arith.constant 0 : i32
    %c0_i32_0 = arith.constant 0 : i32
    %c0_i32_1 = arith.constant 0 : i32
    %c0_i32_2 = arith.constant 0 : i32
    return %c0_i32, %c0_i32_0, %c0_i32_1 : i32, i32, i32
  }
  func.func @transform_2(%arg0: i32) -> (i32, i32) {
    %c0_i32 = arith.constant 0 : i32
    %c0_i32_0 = arith.constant 0 : i32
    %c0_i32_1 = arith.constant 0 : i32
    return %c0_i32, %c0_i32_0 : i32, i32
  }
  func.func @transform_3(%arg0: i32) -> (i32, i32) {
    %c0_i32 = arith.constant 0 : i32
    %c0_i32_0 = arith.constant 0 : i32
    %c0_i32_1 = arith.constant 0 : i32
    return %c0_i32, %c0_i32_0 : i32, i32
  }
  func.func @transform_4(%arg0: i32) -> (i32, i32, i32, i32) {
    %c0_i32 = arith.constant 0 : i32
    %c0_i32_0 = arith.constant 0 : i32
    %c0_i32_1 = arith.constant 0 : i32
    %c0_i32_2 = arith.constant 0 : i32
    return %arg0, %c0_i32, %c0_i32_0, %c0_i32_1 : i32, i32, i32, i32
  }
  func.func @transform_5(%arg0: i32) -> (i32, i32, i32) {
    %c0_i32 = arith.constant 0 : i32
    %c0_i32_0 = arith.constant 0 : i32
    %c0_i32_1 = arith.constant 0 : i32
    return %arg0, %c0_i32, %c0_i32_0 : i32, i32, i32
  }
  func.func @transform_6(%arg0: i32) -> (i32, i32, i32) {
    %c0_i32 = arith.constant 0 : i32
    %c0_i32_0 = arith.constant 0 : i32
    %c0_i32_1 = arith.constant 0 : i32
    return %arg0, %c0_i32, %c0_i32_0 : i32, i32, i32
  }
}

</mosaic_0001>

<bundles_post_ra>
// kernel: basic_block_forward.5
= control target key start
LH: loop header
LB: loop body
LE: loop exit
PB: predicated region body
PF: predicated region fallthrough
CT: control target
= control target key end

     0   :  { %s1224_s0 = inlined_call_operand.vmem [shape: f32[512,128], index: 0, kind: input, shape index: {}]   ;;  %s1225_s1 = inlined_call_operand.vmem [shape: f32[1,128], index: 1, kind: input, shape index: {}]   ;;  %s1226_s2 = inlined_call_operand.vmem [shape: f32[1,128], index: 2, kind: input, shape index: {}]   ;;  %s1227_s3 = inlined_call_operand.vmem [shape: f32[512,128], index: 3, kind: input, shape index: {}]   ;;  %s1228_s4 = inlined_call_operand.vmem [shape: f32[512,128], index: 4, kind: output, shape index: {}]  }
   0x1   :  { %v17_v0 = vld [vmem:[%s1224_s0] sm:$0xff]  ;;  %v18_v4 = vld [vmem:[%s1224_s0 + $0x8] sm:$0xff]  ;;  %v19_v7 = vld [vmem:[%s1224_s0 + $0x10] sm:$0xff] }
   0x2   :  { %v516_v1 = vld [vmem:[%s1225_s1] ss:$0 sm:$0xff]  ;;  %v20_v8 = vld [vmem:[%s1224_s0 + $0x18] sm:$0xff]  ;;  %v224_v10 = vld [vmem:[%s1227_s3 + $0x8] sm:$0xff] }
   0x3   :  { %v521_v2 = vld [vmem:[%s1226_s2] ss:$0 sm:$0xff]  ;;  %v88_v3 = vmul.f32 %v516_v1, %v17_v0  ;;  %v89_v6 = vmul.f32 %v516_v1, %v18_v4  ;;  %v90_v11 = vmul.f32 %v516_v1, %v19_v7  ;;  %v225_v12 = vld [vmem:[%s1227_s3 + $0x10] sm:$0xff]  ;;  %v91_v13 = vmul.f32 %v516_v1, %v20_v8  ;;  %v226_v16 = vld [vmem:[%s1227_s3 + $0x18] sm:$0xff] }
   0x4   :  { %v223_v5 = vld [vmem:[%s1227_s3] sm:$0xff]  ;;  %v22_v18 = vld [vmem:[%s1224_s0 + $0x28] sm:$0xff]  ;;  %v23_v19 = vld [vmem:[%s1224_s0 + $0x30] sm:$0xff] }
   0x5   :  { %v159_v9 = vadd.f32 %v521_v2, %v88_v3  ;;  %v21_v14 = vld [vmem:[%s1224_s0 + $0x20] sm:$0xff]  ;;  %v160_v15 = vadd.f32 %v521_v2, %v89_v6  ;;  %v161_v21 = vadd.f32 %v521_v2, %v90_v11  ;;  %v162_v22 = vadd.f32 %v521_v2, %v91_v13  ;;  %v24_v25 = vld [vmem:[%s1224_s0 + $0x38] sm:$0xff]  ;;  %v228_v28 = vld [vmem:[%s1227_s3 + $0x28] sm:$0xff] }
   0x6   :  { %v92_v17 = vmul.f32 %v516_v1, %v21_v14  ;;  %v227_v23 = vld [vmem:[%s1227_s3 + $0x20] sm:$0xff]  ;;  %v93_v24 = vmul.f32 %v516_v1, %v22_v18  ;;  %v94_v29 = vmul.f32 %v516_v1, %v23_v19  ;;  %v95_v30 = vmul.f32 %v516_v1, %v24_v25  ;;  %v229_v36 = vld [vmem:[%s1227_s3 + $0x30] sm:$0xff]  ;;  %v230_v37 = vld [vmem:[%s1227_s3 + $0x38] sm:$0xff] }
   0x7   :  { %v287_v20 = vadd.f32 %v223_v5, %v159_v9  ;;  %v288_v26 = vadd.f32 %v224_v10, %v160_v15  ;;  %v25_v31 = vld [vmem:[%s1224_s0 + $0x40] sm:$0xff]  ;;  %v289_v33 = vadd.f32 %v225_v12, %v161_v21  ;;  %v290_v34 = vadd.f32 %v226_v16, %v162_v22  ;;  %v26_v38 = vld [vmem:[%s1224_s0 + $0x48] sm:$0xff]  ;;  %v27_v43 = vld [vmem:[%s1224_s0 + $0x50] sm:$0xff] }
   0x8   :  { %v163_v27 = vadd.f32 %v521_v2, %v92_v17  ;;  %v164_v35 = vadd.f32 %v521_v2, %v93_v24  ;;  %v165_v41 = vadd.f32 %v521_v2, %v94_v29  ;;  %v166_v42 = vadd.f32 %v521_v2, %v95_v30  ;;  %v28_v44 = vld [vmem:[%s1224_s0 + $0x58] sm:$0xff]  ;;  %v29_v49 = vld [vmem:[%s1224_s0 + $0x60] sm:$0xff]  ;;  %v30_v55 = vld [vmem:[%s1224_s0 + $0x68] sm:$0xff] }
   0x9   :  { %v351_v32 = vmax.f32 %v287_v20, 0.0  ;;  %v352_v39 = vmax.f32 %v288_v26, 0.0  ;;  %v353_v45 = vmax.f32 %v289_v33, 0.0  ;;  %v354_v46 = vmax.f32 %v290_v34, 0.0  ;;  %v231_v53 = vld [vmem:[%s1227_s3 + $0x40] sm:$0xff]  ;;  %v232_v58 = vld [vmem:[%s1227_s3 + $0x48] sm:$0xff] }
   0xa   :  { %v291_v40 = vadd.f32 %v227_v23, %v163_v27  ;;  %v292_v47 = vadd.f32 %v228_v28, %v164_v35  ;;  %v96_v48 = vmul.f32 %v516_v1, %v25_v31  ;;  %v293_v51 = vadd.f32 %v229_v36, %v165_v41  ;;  %v31_v61 = vld [vmem:[%s1224_s0 + $0x70] sm:$0xff]  ;;  %v32_v62 = vld [vmem:[%s1224_s0 + $0x78] sm:$0xff]  ;;  %v235_v10 = vld [vmem:[%s1227_s3 + $0x60] sm:$0xff] }
   0xb   :  { %415 = vst [vmem:[%s1228_s4] sm:$0xff] %v351_v32  ;;  %416 = vst [vmem:[%s1228_s4 + $0x8] sm:$0xff] %v352_v39  ;;  %v294_v52 = vadd.f32 %v230_v37, %v166_v42  ;;  %v97_v54 = vmul.f32 %v516_v1, %v26_v38  ;;  %v98_v59 = vmul.f32 %v516_v1, %v27_v43  ;;  %v233_v4 = vld [vmem:[%s1227_s3 + $0x50] sm:$0xff]  ;;  %v234_v5 = vld [vmem:[%s1227_s3 + $0x58] sm:$0xff] }
   0xc   :  { %v355_v50 = vmax.f32 %v291_v40, 0.0  ;;  %417 = vst [vmem:[%s1228_s4 + $0x10] sm:$0xff] %v353_v45  ;;  %418 = vst [vmem:[%s1228_s4 + $0x18] sm:$0xff] %v354_v46  ;;  %v356_v56 = vmax.f32 %v292_v47, 0.0  ;;  %v167_v57 = vadd.f32 %v521_v2, %v96_v48  ;;  %v99_v60 = vmul.f32 %v516_v1, %v28_v44  ;;  %v236_v14 = vld [vmem:[%s1227_s3 + $0x68] sm:$0xff]  ;;  %v33_v17 = vld [vmem:[%s1224_s0 + $0x80] sm:$0xff] }
   0xd   :  { %v357_v63 = vmax.f32 %v293_v51, 0.0  ;;  %v358_v0 = vmax.f32 %v294_v52, 0.0  ;;  %v168_v3 = vadd.f32 %v521_v2, %v97_v54  ;;  %v100_v6 = vmul.f32 %v516_v1, %v29_v49  ;;  %v237_v22 = vld [vmem:[%s1227_s3 + $0x70] sm:$0xff]  ;;  %v238_v23 = vld [vmem:[%s1227_s3 + $0x78] sm:$0xff]  ;;  %v34_v24 = vld [vmem:[%s1224_s0 + $0x88] sm:$0xff] }
   0xe   :  { %419 = vst [vmem:[%s1228_s4 + $0x20] sm:$0xff] %v355_v50  ;;  %420 = vst [vmem:[%s1228_s4 + $0x28] sm:$0xff] %v356_v56  ;;  %v295_v7 = vadd.f32 %v231_v53, %v167_v57  ;;  %v169_v8 = vadd.f32 %v521_v2, %v98_v59  ;;  %v170_v9 = vadd.f32 %v521_v2, %v99_v60  ;;  %v35_v29 = vld [vmem:[%s1224_s0 + $0x90] sm:$0xff]  ;;  %v36_v30 = vld [vmem:[%s1224_s0 + $0x98] sm:$0xff] }
   0xf   :  { %v101_v11 = vmul.f32 %v516_v1, %v30_v55  ;;  %421 = vst [vmem:[%s1228_s4 + $0x30] sm:$0xff] %v357_v63  ;;  %422 = vst [vmem:[%s1228_s4 + $0x38] sm:$0xff] %v358_v0  ;;  %v296_v12 = vadd.f32 %v232_v58, %v168_v3  ;;  %v171_v13 = vadd.f32 %v521_v2, %v100_v6  ;;  %v37_v35 = vld [vmem:[%s1224_s0 + $0xa0] sm:$0xff]  ;;  %v38_v41 = vld [vmem:[%s1224_s0 + $0xa8] sm:$0xff] }
  0x10   :  { %v102_v15 = vmul.f32 %v516_v1, %v31_v61  ;;  %v103_v16 = vmul.f32 %v516_v1, %v32_v62  ;;  %v359_v18 = vmax.f32 %v295_v7, 0.0  ;;  %v297_v19 = vadd.f32 %v233_v4, %v169_v8  ;;  %v239_v39 = vld [vmem:[%s1227_s3 + $0x80] sm:$0xff]  ;;  %v240_v44 = vld [vmem:[%s1227_s3 + $0x88] sm:$0xff]  ;;  %v39_v47 = vld [vmem:[%s1224_s0 + $0xb0] sm:$0xff] }
  0x11   :  { %v298_v20 = vadd.f32 %v234_v5, %v170_v9  ;;  %v172_v21 = vadd.f32 %v521_v2, %v101_v11  ;;  %v360_v25 = vmax.f32 %v296_v12, 0.0  ;;  %v299_v26 = vadd.f32 %v235_v10, %v171_v13  ;;  %v40_v48 = vld [vmem:[%s1224_s0 + $0xb8] sm:$0xff]  ;;  %v241_v52 = vld [vmem:[%s1227_s3 + $0x90] sm:$0xff]  ;;  %v243_v58 = vld [vmem:[%s1227_s3 + $0xa0] sm:$0xff] }
  0x12   :  { %v173_v27 = vadd.f32 %v521_v2, %v102_v15  ;;  %v174_v28 = vadd.f32 %v521_v2, %v103_v16  ;;  %423 = vst [vmem:[%s1228_s4 + $0x40] sm:$0xff] %v359_v18  ;;  %v361_v31 = vmax.f32 %v297_v19, 0.0  ;;  %v104_v34 = vmul.f32 %v516_v1, %v33_v17  ;;  %v242_v53 = vld [vmem:[%s1227_s3 + $0x98] sm:$0xff]  ;;  %v244_v62 = vld [vmem:[%s1227_s3 + $0xa8] sm:$0xff]  ;;  %v41_v3 = vld [vmem:[%s1224_s0 + $0xc0] sm:$0xff] }
  0x13   :  { %v362_v32 = vmax.f32 %v298_v20, 0.0  ;;  %v300_v33 = vadd.f32 %v236_v14, %v172_v21  ;;  %424 = vst [vmem:[%s1228_s4 + $0x48] sm:$0xff] %v360_v25  ;;  %v363_v36 = vmax.f32 %v299_v26, 0.0  ;;  %v105_v40 = vmul.f32 %v516_v1, %v34_v24  ;;  %v245_v8 = vld [vmem:[%s1227_s3 + $0xb0] sm:$0xff]  ;;  %v246_v9 = vld [vmem:[%s1227_s3 + $0xb8] sm:$0xff]  ;;  %v42_v10 = vld [vmem:[%s1224_s0 + $0xc8] sm:$0xff] }
  0x14   :  { %v301_v37 = vadd.f32 %v237_v22, %v173_v27  ;;  %v302_v38 = vadd.f32 %v238_v23, %v174_v28  ;;  %425 = vst [vmem:[%s1228_s4 + $0x50] sm:$0xff] %v361_v31  ;;  %v175_v43 = vadd.f32 %v521_v2, %v104_v34  ;;  %v106_v45 = vmul.f32 %v516_v1, %v35_v29  ;;  %v43_v15 = vld [vmem:[%s1224_s0 + $0xd0] sm:$0xff]  ;;  %v44_v16 = vld [vmem:[%s1224_s0 + $0xd8] sm:$0xff]  ;;  %v45_v21 = vld [vmem:[%s1224_s0 + $0xe0] sm:$0xff] }
  0x15   :  { %426 = vst [vmem:[%s1228_s4 + $0x58] sm:$0xff] %v362_v32  ;;  %v364_v42 = vmax.f32 %v300_v33, 0.0  ;;  %v107_v46 = vmul.f32 %v516_v1, %v36_v30  ;;  %427 = vst [vmem:[%s1228_s4 + $0x60] sm:$0xff] %v363_v36  ;;  %v176_v51 = vadd.f32 %v521_v2, %v105_v40  ;;  %v108_v54 = vmul.f32 %v516_v1, %v37_v35  ;;  %v247_v25 = vld [vmem:[%s1227_s3 + $0xc0] sm:$0xff]  ;;  %v46_v27 = vld [vmem:[%s1224_s0 + $0xe8] sm:$0xff] }
  0x16   :  { %v365_v49 = vmax.f32 %v301_v37, 0.0  ;;  %v366_v50 = vmax.f32 %v302_v38, 0.0  ;;  %v303_v55 = vadd.f32 %v239_v39, %v175_v43  ;;  %v177_v56 = vadd.f32 %v521_v2, %v106_v45  ;;  %v248_v30 = vld [vmem:[%s1227_s3 + $0xc8] sm:$0xff]  ;;  %v47_v33 = vld [vmem:[%s1224_s0 + $0xf0] sm:$0xff]  ;;  %v48_v34 = vld [vmem:[%s1224_s0 + $0xf8] sm:$0xff] }
  0x17   :  { %428 = vst [vmem:[%s1228_s4 + $0x68] sm:$0xff] %v364_v42  ;;  %v178_v57 = vadd.f32 %v521_v2, %v107_v46  ;;  %v109_v59 = vmul.f32 %v516_v1, %v38_v41  ;;  %v304_v60 = vadd.f32 %v240_v44, %v176_v51  ;;  %v179_v61 = vadd.f32 %v521_v2, %v108_v54  ;;  %v249_v38 = vld [vmem:[%s1227_s3 + $0xd0] sm:$0xff]  ;;  %v250_v39 = vld [vmem:[%s1227_s3 + $0xd8] sm:$0xff]  ;;  %v251_v44 = vld [vmem:[%s1227_s3 + $0xe0] sm:$0xff] }
  0x18   :  { %429 = vst [vmem:[%s1228_s4 + $0x70] sm:$0xff] %v365_v49  ;;  %430 = vst [vmem:[%s1228_s4 + $0x78] sm:$0xff] %v366_v50  ;;  %v110_v63 = vmul.f32 %v516_v1, %v39_v47  ;;  %v111_v0 = vmul.f32 %v516_v1, %v40_v48  ;;  %v367_v4 = vmax.f32 %v303_v55, 0.0  ;;  %v305_v5 = vadd.f32 %v241_v52, %v177_v56  ;;  %v252_v48 = vld [vmem:[%s1227_s3 + $0xe8] sm:$0xff]  ;;  %v49_v51 = vld [vmem:[%s1224_s0 + $0x100] sm:$0xff] }
  0x19   :  { %v306_v6 = vadd.f32 %v242_v53, %v178_v57  ;;  %v180_v7 = vadd.f32 %v521_v2, %v109_v59  ;;  %v368_v11 = vmax.f32 %v304_v60, 0.0  ;;  %v307_v12 = vadd.f32 %v243_v58, %v179_v61  ;;  %v253_v56 = vld [vmem:[%s1227_s3 + $0xf0] sm:$0xff]  ;;  %v254_v57 = vld [vmem:[%s1227_s3 + $0xf8] sm:$0xff]  ;;  %v50_v58 = vld [vmem:[%s1224_s0 + $0x108] sm:$0xff] }
  0x1a   :  { %v181_v13 = vadd.f32 %v521_v2, %v110_v63  ;;  %v182_v14 = vadd.f32 %v521_v2, %v111_v0  ;;  %431 = vst [vmem:[%s1228_s4 + $0x80] sm:$0xff] %v367_v4  ;;  %v369_v17 = vmax.f32 %v305_v5, 0.0  ;;  %v112_v20 = vmul.f32 %v516_v1, %v41_v3  ;;  %v51_v63 = vld [vmem:[%s1224_s0 + $0x110] sm:$0xff]  ;;  %v52_v0 = vld [vmem:[%s1224_s0 + $0x118] sm:$0xff] }
  0x1b   :  { %v370_v18 = vmax.f32 %v306_v6, 0.0  ;;  %v308_v19 = vadd.f32 %v244_v62, %v180_v7  ;;  %432 = vst [vmem:[%s1228_s4 + $0x88] sm:$0xff] %v368_v11  ;;  %v371_v22 = vmax.f32 %v307_v12, 0.0  ;;  %v113_v26 = vmul.f32 %v516_v1, %v42_v10  ;;  %v53_v7 = vld [vmem:[%s1224_s0 + $0x120] sm:$0xff] }
  0x1c   :  { %v309_v23 = vadd.f32 %v245_v8, %v181_v13  ;;  %v310_v24 = vadd.f32 %v246_v9, %v182_v14  ;;  %433 = vst [vmem:[%s1228_s4 + $0x90] sm:$0xff] %v369_v17  ;;  %v183_v29 = vadd.f32 %v521_v2, %v112_v20  ;;  %v114_v31 = vmul.f32 %v516_v1, %v43_v15  ;;  %v255_v11 = vld [vmem:[%s1227_s3 + $0x100] sm:$0xff]  ;;  %v54_v13 = vld [vmem:[%s1224_s0 + $0x128] sm:$0xff]  ;;  %v56_v20 = vld [vmem:[%s1224_s0 + $0x138] sm:$0xff] }
  0x1d   :  { %434 = vst [vmem:[%s1228_s4 + $0x98] sm:$0xff] %v370_v18  ;;  %v372_v28 = vmax.f32 %v308_v19, 0.0  ;;  %v115_v32 = vmul.f32 %v516_v1, %v44_v16  ;;  %435 = vst [vmem:[%s1228_s4 + $0xa0] sm:$0xff] %v371_v22  ;;  %v184_v37 = vadd.f32 %v521_v2, %v113_v26  ;;  %v116_v40 = vmul.f32 %v516_v1, %v45_v21  ;;  %v256_v16 = vld [vmem:[%s1227_s3 + $0x108] sm:$0xff]  ;;  %v55_v19 = vld [vmem:[%s1224_s0 + $0x130] sm:$0xff] }
  0x1e   :  { %v373_v35 = vmax.f32 %v309_v23, 0.0  ;;  %v374_v36 = vmax.f32 %v310_v24, 0.0  ;;  %v311_v41 = vadd.f32 %v247_v25, %v183_v29  ;;  %v185_v42 = vadd.f32 %v521_v2, %v114_v31  ;;  %v257_v24 = vld [vmem:[%s1227_s3 + $0x110] sm:$0xff]  ;;  %v258_v25 = vld [vmem:[%s1227_s3 + $0x118] sm:$0xff] }
  0x1f   :  { %436 = vst [vmem:[%s1228_s4 + $0xa8] sm:$0xff] %v372_v28  ;;  %v186_v43 = vadd.f32 %v521_v2, %v115_v32  ;;  %v117_v45 = vmul.f32 %v516_v1, %v46_v27  ;;  %v312_v46 = vadd.f32 %v248_v30, %v184_v37  ;;  %v187_v47 = vadd.f32 %v521_v2, %v116_v40  ;;  %v259_v30 = vld [vmem:[%s1227_s3 + $0x120] sm:$0xff] }
  0x20   :  { %437 = vst [vmem:[%s1228_s4 + $0xb0] sm:$0xff] %v373_v35  ;;  %438 = vst [vmem:[%s1228_s4 + $0xb8] sm:$0xff] %v374_v36  ;;  %v118_v49 = vmul.f32 %v516_v1, %v47_v33  ;;  %v119_v50 = vmul.f32 %v516_v1, %v48_v34  ;;  %v375_v52 = vmax.f32 %v311_v41, 0.0  ;;  %v313_v53 = vadd.f32 %v249_v38, %v185_v42  ;;  %v260_v34 = vld [vmem:[%s1227_s3 + $0x128] sm:$0xff]  ;;  %v57_v37 = vld [vmem:[%s1224_s0 + $0x140] sm:$0xff] }
  0x21   :  { %v314_v54 = vadd.f32 %v250_v39, %v186_v43  ;;  %v188_v55 = vadd.f32 %v521_v2, %v117_v45  ;;  %v376_v59 = vmax.f32 %v312_v46, 0.0  ;;  %v315_v60 = vadd.f32 %v251_v44, %v187_v47  ;;  %v261_v42 = vld [vmem:[%s1227_s3 + $0x130] sm:$0xff]  ;;  %v262_v43 = vld [vmem:[%s1227_s3 + $0x138] sm:$0xff]  ;;  %v58_v44 = vld [vmem:[%s1224_s0 + $0x148] sm:$0xff] }
  0x22   :  { %v189_v61 = vadd.f32 %v521_v2, %v118_v49  ;;  %v190_v62 = vadd.f32 %v521_v2, %v119_v50  ;;  %439 = vst [vmem:[%s1228_s4 + $0xc0] sm:$0xff] %v375_v52  ;;  %v377_v3 = vmax.f32 %v313_v53, 0.0  ;;  %v120_v6 = vmul.f32 %v516_v1, %v49_v51  ;;  %v59_v49 = vld [vmem:[%s1224_s0 + $0x150] sm:$0xff]  ;;  %v60_v50 = vld [vmem:[%s1224_s0 + $0x158] sm:$0xff] }
  0x23   :  { %v378_v4 = vmax.f32 %v314_v54, 0.0  ;;  %v316_v5 = vadd.f32 %v252_v48, %v188_v55  ;;  %440 = vst [vmem:[%s1228_s4 + $0xc8] sm:$0xff] %v376_v59  ;;  %v379_v8 = vmax.f32 %v315_v60, 0.0  ;;  %v121_v12 = vmul.f32 %v516_v1, %v50_v58  ;;  %v61_v55 = vld [vmem:[%s1224_s0 + $0x160] sm:$0xff] }
  0x24   :  { %v317_v9 = vadd.f32 %v253_v56, %v189_v61  ;;  %v318_v10 = vadd.f32 %v254_v57, %v190_v62  ;;  %441 = vst [vmem:[%s1228_s4 + $0xd0] sm:$0xff] %v377_v3  ;;  %v191_v15 = vadd.f32 %v521_v2, %v120_v6  ;;  %v122_v17 = vmul.f32 %v516_v1, %v51_v63  ;;  %v263_v59 = vld [vmem:[%s1227_s3 + $0x140] sm:$0xff]  ;;  %v62_v61 = vld [vmem:[%s1224_s0 + $0x168] sm:$0xff]  ;;  %v64_v6 = vld [vmem:[%s1224_s0 + $0x178] sm:$0xff] }
  0x25   :  { %442 = vst [vmem:[%s1228_s4 + $0xd8] sm:$0xff] %v378_v4  ;;  %v380_v14 = vmax.f32 %v316_v5, 0.0  ;;  %v123_v18 = vmul.f32 %v516_v1, %v52_v0  ;;  %443 = vst [vmem:[%s1228_s4 + $0xe0] sm:$0xff] %v379_v8  ;;  %v192_v23 = vadd.f32 %v521_v2, %v121_v12  ;;  %v124_v26 = vmul.f32 %v516_v1, %v53_v7  ;;  %v264_v0 = vld [vmem:[%s1227_s3 + $0x148] sm:$0xff]  ;;  %v63_v5 = vld [vmem:[%s1224_s0 + $0x170] sm:$0xff] }
  0x26   :  { %v381_v21 = vmax.f32 %v317_v9, 0.0  ;;  %v382_v22 = vmax.f32 %v318_v10, 0.0  ;;  %v319_v27 = vadd.f32 %v255_v11, %v191_v15  ;;  %v193_v28 = vadd.f32 %v521_v2, %v122_v17  ;;  %v265_v10 = vld [vmem:[%s1227_s3 + $0x150] sm:$0xff]  ;;  %v266_v11 = vld [vmem:[%s1227_s3 + $0x158] sm:$0xff] }
  0x27   :  { %444 = vst [vmem:[%s1228_s4 + $0xe8] sm:$0xff] %v380_v14  ;;  %v194_v29 = vadd.f32 %v521_v2, %v123_v18  ;;  %v125_v31 = vmul.f32 %v516_v1, %v54_v13  ;;  %v320_v32 = vadd.f32 %v256_v16, %v192_v23  ;;  %v195_v33 = vadd.f32 %v521_v2, %v124_v26  ;;  %v267_v16 = vld [vmem:[%s1227_s3 + $0x160] sm:$0xff] }
  0x28   :  { %445 = vst [vmem:[%s1228_s4 + $0xf0] sm:$0xff] %v381_v21  ;;  %446 = vst [vmem:[%s1228_s4 + $0xf8] sm:$0xff] %v382_v22  ;;  %v126_v35 = vmul.f32 %v516_v1, %v55_v19  ;;  %v127_v36 = vmul.f32 %v516_v1, %v56_v20  ;;  %v383_v38 = vmax.f32 %v319_v27, 0.0  ;;  %v321_v39 = vadd.f32 %v257_v24, %v193_v28  ;;  %v268_v20 = vld [vmem:[%s1227_s3 + $0x168] sm:$0xff]  ;;  %v65_v23 = vld [vmem:[%s1224_s0 + $0x180] sm:$0xff] }
  0x29   :  { %v322_v40 = vadd.f32 %v258_v25, %v194_v29  ;;  %v196_v41 = vadd.f32 %v521_v2, %v125_v31  ;;  %v384_v45 = vmax.f32 %v320_v32, 0.0  ;;  %v323_v46 = vadd.f32 %v259_v30, %v195_v33  ;;  %v269_v28 = vld [vmem:[%s1227_s3 + $0x170] sm:$0xff]  ;;  %v270_v29 = vld [vmem:[%s1227_s3 + $0x178] sm:$0xff]  ;;  %v66_v30 = vld [vmem:[%s1224_s0 + $0x188] sm:$0xff] }
  0x2a   :  { %v197_v47 = vadd.f32 %v521_v2, %v126_v35  ;;  %v198_v48 = vadd.f32 %v521_v2, %v127_v36  ;;  %447 = vst [vmem:[%s1228_s4 + $0x100] sm:$0xff] %v383_v38  ;;  %v385_v51 = vmax.f32 %v321_v39, 0.0  ;;  %v128_v54 = vmul.f32 %v516_v1, %v57_v37  ;;  %v67_v35 = vld [vmem:[%s1224_s0 + $0x190] sm:$0xff]  ;;  %v68_v36 = vld [vmem:[%s1224_s0 + $0x198] sm:$0xff] }
  0x2b   :  { %v386_v52 = vmax.f32 %v322_v40, 0.0  ;;  %v324_v53 = vadd.f32 %v260_v34, %v196_v41  ;;  %448 = vst [vmem:[%s1228_s4 + $0x108] sm:$0xff] %v384_v45  ;;  %v387_v56 = vmax.f32 %v323_v46, 0.0  ;;  %v129_v60 = vmul.f32 %v516_v1, %v58_v44  ;;  %v69_v41 = vld [vmem:[%s1224_s0 + $0x1a0] sm:$0xff] }
  0x2c   :  { %v325_v57 = vadd.f32 %v261_v42, %v197_v47  ;;  %v326_v58 = vadd.f32 %v262_v43, %v198_v48  ;;  %449 = vst [vmem:[%s1228_s4 + $0x110] sm:$0xff] %v385_v51  ;;  %v199_v63 = vadd.f32 %v521_v2, %v128_v54  ;;  %v130_v3 = vmul.f32 %v516_v1, %v59_v49  ;;  %v271_v45 = vld [vmem:[%s1227_s3 + $0x180] sm:$0xff]  ;;  %v70_v47 = vld [vmem:[%s1224_s0 + $0x1a8] sm:$0xff]  ;;  %v72_v54 = vld [vmem:[%s1224_s0 + $0x1b8] sm:$0xff] }
  0x2d   :  { %450 = vst [vmem:[%s1228_s4 + $0x118] sm:$0xff] %v386_v52  ;;  %v388_v62 = vmax.f32 %v324_v53, 0.0  ;;  %v131_v4 = vmul.f32 %v516_v1, %v60_v50  ;;  %451 = vst [vmem:[%s1228_s4 + $0x120] sm:$0xff] %v387_v56  ;;  %v200_v9 = vadd.f32 %v521_v2, %v129_v60  ;;  %v132_v12 = vmul.f32 %v516_v1, %v61_v55  ;;  %v272_v50 = vld [vmem:[%s1227_s3 + $0x188] sm:$0xff]  ;;  %v71_v53 = vld [vmem:[%s1224_s0 + $0x1b0] sm:$0xff] }
  0x2e   :  { %v389_v7 = vmax.f32 %v325_v57, 0.0  ;;  %v390_v8 = vmax.f32 %v326_v58, 0.0  ;;  %v327_v13 = vadd.f32 %v263_v59, %v199_v63  ;;  %v201_v14 = vadd.f32 %v521_v2, %v130_v3  ;;  %v273_v58 = vld [vmem:[%s1227_s3 + $0x190] sm:$0xff]  ;;  %v274_v59 = vld [vmem:[%s1227_s3 + $0x198] sm:$0xff] }
  0x2f   :  { %452 = vst [vmem:[%s1228_s4 + $0x128] sm:$0xff] %v388_v62  ;;  %v202_v15 = vadd.f32 %v521_v2, %v131_v4  ;;  %v133_v17 = vmul.f32 %v516_v1, %v62_v61  ;;  %v328_v18 = vadd.f32 %v264_v0, %v200_v9  ;;  %v203_v19 = vadd.f32 %v521_v2, %v132_v12  ;;  %v275_v0 = vld [vmem:[%s1227_s3 + $0x1a0] sm:$0xff] }
  0x30   :  { %453 = vst [vmem:[%s1228_s4 + $0x130] sm:$0xff] %v389_v7  ;;  %454 = vst [vmem:[%s1228_s4 + $0x138] sm:$0xff] %v390_v8  ;;  %v134_v21 = vmul.f32 %v516_v1, %v63_v5  ;;  %v135_v22 = vmul.f32 %v516_v1, %v64_v6  ;;  %v391_v24 = vmax.f32 %v327_v13, 0.0  ;;  %v329_v25 = vadd.f32 %v265_v10, %v201_v14  ;;  %v276_v6 = vld [vmem:[%s1227_s3 + $0x1a8] sm:$0xff]  ;;  %v73_v9 = vld [vmem:[%s1224_s0 + $0x1c0] sm:$0xff] }
  0x31   :  { %v330_v26 = vadd.f32 %v266_v11, %v202_v15  ;;  %v204_v27 = vadd.f32 %v521_v2, %v133_v17  ;;  %v392_v31 = vmax.f32 %v328_v18, 0.0  ;;  %v331_v32 = vadd.f32 %v267_v16, %v203_v19  ;;  %v277_v14 = vld [vmem:[%s1227_s3 + $0x1b0] sm:$0xff]  ;;  %v278_v15 = vld [vmem:[%s1227_s3 + $0x1b8] sm:$0xff]  ;;  %v74_v16 = vld [vmem:[%s1224_s0 + $0x1c8] sm:$0xff] }
  0x32   :  { %v205_v33 = vadd.f32 %v521_v2, %v134_v21  ;;  %v206_v34 = vadd.f32 %v521_v2, %v135_v22  ;;  %455 = vst [vmem:[%s1228_s4 + $0x140] sm:$0xff] %v391_v24  ;;  %v393_v37 = vmax.f32 %v329_v25, 0.0  ;;  %v136_v40 = vmul.f32 %v516_v1, %v65_v23  ;;  %v75_v21 = vld [vmem:[%s1224_s0 + $0x1d0] sm:$0xff]  ;;  %v76_v22 = vld [vmem:[%s1224_s0 + $0x1d8] sm:$0xff] }
  0x33   :  { %v394_v38 = vmax.f32 %v330_v26, 0.0  ;;  %v332_v39 = vadd.f32 %v268_v20, %v204_v27  ;;  %456 = vst [vmem:[%s1228_s4 + $0x148] sm:$0xff] %v392_v31  ;;  %v395_v42 = vmax.f32 %v331_v32, 0.0  ;;  %v137_v46 = vmul.f32 %v516_v1, %v66_v30  ;;  %v77_v27 = vld [vmem:[%s1224_s0 + $0x1e0] sm:$0xff] }
  0x34   :  { %v333_v43 = vadd.f32 %v269_v28, %v205_v33  ;;  %v334_v44 = vadd.f32 %v270_v29, %v206_v34  ;;  %457 = vst [vmem:[%s1228_s4 + $0x150] sm:$0xff] %v393_v37  ;;  %v207_v49 = vadd.f32 %v521_v2, %v136_v40  ;;  %v138_v51 = vmul.f32 %v516_v1, %v67_v35  ;;  %v279_v31 = vld [vmem:[%s1227_s3 + $0x1c0] sm:$0xff]  ;;  %v78_v33 = vld [vmem:[%s1224_s0 + $0x1e8] sm:$0xff]  ;;  %v80_v40 = vld [vmem:[%s1224_s0 + $0x1f8] sm:$0xff] }
  0x35   :  { %458 = vst [vmem:[%s1228_s4 + $0x158] sm:$0xff] %v394_v38  ;;  %v396_v48 = vmax.f32 %v332_v39, 0.0  ;;  %v139_v52 = vmul.f32 %v516_v1, %v68_v36  ;;  %459 = vst [vmem:[%s1228_s4 + $0x160] sm:$0xff] %v395_v42  ;;  %v208_v57 = vadd.f32 %v521_v2, %v137_v46  ;;  %v140_v60 = vmul.f32 %v516_v1, %v69_v41  ;;  %v280_v36 = vld [vmem:[%s1227_s3 + $0x1c8] sm:$0xff]  ;;  %v79_v39 = vld [vmem:[%s1224_s0 + $0x1f0] sm:$0xff] }
  0x36   :  { %v397_v55 = vmax.f32 %v333_v43, 0.0  ;;  %v398_v56 = vmax.f32 %v334_v44, 0.0  ;;  %v335_v61 = vadd.f32 %v271_v45, %v207_v49  ;;  %v209_v62 = vadd.f32 %v521_v2, %v138_v51  ;;  %v281_v44 = vld [vmem:[%s1227_s3 + $0x1d0] sm:$0xff]  ;;  %v282_v45 = vld [vmem:[%s1227_s3 + $0x1d8] sm:$0xff] }
  0x37   :  { %460 = vst [vmem:[%s1228_s4 + $0x168] sm:$0xff] %v396_v48  ;;  %v210_v63 = vadd.f32 %v521_v2, %v139_v52  ;;  %v141_v3 = vmul.f32 %v516_v1, %v70_v47  ;;  %v336_v4 = vadd.f32 %v272_v50, %v208_v57  ;;  %v211_v5 = vadd.f32 %v521_v2, %v140_v60  ;;  %v283_v50 = vld [vmem:[%s1227_s3 + $0x1e0] sm:$0xff] }
  0x38   :  { %461 = vst [vmem:[%s1228_s4 + $0x170] sm:$0xff] %v397_v55  ;;  %462 = vst [vmem:[%s1228_s4 + $0x178] sm:$0xff] %v398_v56  ;;  %v142_v7 = vmul.f32 %v516_v1, %v71_v53  ;;  %v143_v8 = vmul.f32 %v516_v1, %v72_v54  ;;  %v399_v10 = vmax.f32 %v335_v61, 0.0  ;;  %v337_v11 = vadd.f32 %v273_v58, %v209_v62  ;;  %v284_v54 = vld [vmem:[%s1227_s3 + $0x1e8] sm:$0xff]  ;;  %v285_v61 = vld [vmem:[%s1227_s3 + $0x1f0] sm:$0xff] }
  0x39   :  { %v338_v12 = vadd.f32 %v274_v59, %v210_v63  ;;  %v212_v13 = vadd.f32 %v521_v2, %v141_v3  ;;  %v400_v17 = vmax.f32 %v336_v4, 0.0  ;;  %v339_v18 = vadd.f32 %v275_v0, %v211_v5  ;;  %v286_v62 = vld [vmem:[%s1227_s3 + $0x1f8] sm:$0xff] }
  0x3a   :  { %v213_v19 = vadd.f32 %v521_v2, %v142_v7  ;;  %v214_v20 = vadd.f32 %v521_v2, %v143_v8  ;;  %463 = vst [vmem:[%s1228_s4 + $0x180] sm:$0xff] %v399_v10  ;;  %v401_v23 = vmax.f32 %v337_v11, 0.0  ;;  %v144_v26 = vmul.f32 %v516_v1, %v73_v9 }
  0x3b   :  { %v402_v24 = vmax.f32 %v338_v12, 0.0  ;;  %v340_v25 = vadd.f32 %v276_v6, %v212_v13  ;;  %464 = vst [vmem:[%s1228_s4 + $0x188] sm:$0xff] %v400_v17  ;;  %v403_v28 = vmax.f32 %v339_v18, 0.0  ;;  %v145_v32 = vmul.f32 %v516_v1, %v74_v16 }
  0x3c   :  { %v341_v29 = vadd.f32 %v277_v14, %v213_v19  ;;  %v342_v30 = vadd.f32 %v278_v15, %v214_v20  ;;  %465 = vst [vmem:[%s1228_s4 + $0x190] sm:$0xff] %v401_v23  ;;  %v215_v35 = vadd.f32 %v521_v2, %v144_v26  ;;  %v146_v37 = vmul.f32 %v516_v1, %v75_v21 }
  0x3d   :  { %466 = vst [vmem:[%s1228_s4 + $0x198] sm:$0xff] %v402_v24  ;;  %v404_v34 = vmax.f32 %v340_v25, 0.0  ;;  %v147_v38 = vmul.f32 %v516_v1, %v76_v22  ;;  %467 = vst [vmem:[%s1228_s4 + $0x1a0] sm:$0xff] %v403_v28  ;;  %v216_v43 = vadd.f32 %v521_v2, %v145_v32  ;;  %v148_v46 = vmul.f32 %v516_v1, %v77_v27 }
  0x3e   :  { %v405_v41 = vmax.f32 %v341_v29, 0.0  ;;  %v406_v42 = vmax.f32 %v342_v30, 0.0  ;;  %v343_v47 = vadd.f32 %v279_v31, %v215_v35  ;;  %v217_v48 = vadd.f32 %v521_v2, %v146_v37 }
  0x3f   :  { %468 = vst [vmem:[%s1228_s4 + $0x1a8] sm:$0xff] %v404_v34  ;;  %v218_v49 = vadd.f32 %v521_v2, %v147_v38  ;;  %v149_v51 = vmul.f32 %v516_v1, %v78_v33  ;;  %v344_v52 = vadd.f32 %v280_v36, %v216_v43  ;;  %v219_v53 = vadd.f32 %v521_v2, %v148_v46 }
  0x40   :  { %469 = vst [vmem:[%s1228_s4 + $0x1b0] sm:$0xff] %v405_v41  ;;  %470 = vst [vmem:[%s1228_s4 + $0x1b8] sm:$0xff] %v406_v42  ;;  %v150_v55 = vmul.f32 %v516_v1, %v79_v39  ;;  %v151_v56 = vmul.f32 %v516_v1, %v80_v40  ;;  %v407_v57 = vmax.f32 %v343_v47, 0.0  ;;  %v345_v58 = vadd.f32 %v281_v44, %v217_v48 }
  0x41   :  { %v346_v59 = vadd.f32 %v282_v45, %v218_v49  ;;  %v220_v60 = vadd.f32 %v521_v2, %v149_v51  ;;  %v408_v63 = vmax.f32 %v344_v52, 0.0  ;;  %v347_v0 = vadd.f32 %v283_v50, %v219_v53 }
  0x42   :  { %v221_v3 = vadd.f32 %v521_v2, %v150_v55  ;;  %v222_v4 = vadd.f32 %v521_v2, %v151_v56  ;;  %471 = vst [vmem:[%s1228_s4 + $0x1c0] sm:$0xff] %v407_v57  ;;  %v409_v1 = vmax.f32 %v345_v58, 0.0 }
  0x43   :  { %v410_v5 = vmax.f32 %v346_v59, 0.0  ;;  %v348_v6 = vadd.f32 %v284_v54, %v220_v60  ;;  %472 = vst [vmem:[%s1228_s4 + $0x1c8] sm:$0xff] %v408_v63  ;;  %v411_v7 = vmax.f32 %v347_v0, 0.0 }
  0x44   :  { %v349_v8 = vadd.f32 %v285_v61, %v221_v3  ;;  %v350_v9 = vadd.f32 %v286_v62, %v222_v4  ;;  %473 = vst [vmem:[%s1228_s4 + $0x1d0] sm:$0xff] %v409_v1 }
  0x45   :  { %474 = vst [vmem:[%s1228_s4 + $0x1d8] sm:$0xff] %v410_v5  ;;  %v412_v2 = vmax.f32 %v348_v6, 0.0  ;;  %475 = vst [vmem:[%s1228_s4 + $0x1e0] sm:$0xff] %v411_v7 }
  0x46   :  { %v413_v10 = vmax.f32 %v349_v8, 0.0  ;;  %v414_v11 = vmax.f32 %v350_v9, 0.0 }
  0x47   :  { %476 = vst [vmem:[%s1228_s4 + $0x1e8] sm:$0xff] %v412_v2 }
  0x48   :  { %477 = vst [vmem:[%s1228_s4 + $0x1f0] sm:$0xff] %v413_v10  ;;  %478 = vst [vmem:[%s1228_s4 + $0x1f8] sm:$0xff] %v414_v11 }

// kernel: basic_block_forward.3
= control target key start
LH: loop header
LB: loop body
LE: loop exit
PB: predicated region body
PF: predicated region fallthrough
CT: control target
= control target key end

     0   :  { %s3602_s15 = smov 0   ;;  %s4617_s0 = inlined_call_operand.vmem [shape: f32[2,16,16,128], index: 0, kind: input, shape index: {}]   ;;  %s4618_s1 = inlined_call_operand.vmem [shape: bf16[3,384,128], index: 1, kind: input, shape index: {}]   ;;  %s4619_s2 = inlined_call_operand.vmem [shape: f32[2,16,16,128], index: 2, kind: output, shape index: {0}]   ;;  %s4620_s3 = inlined_call_operand.vmem [shape: f32[2,1,128], index: 3, kind: output, shape index: {1}]   ;;  %s4621_s4 = inlined_call_operand.vmem [shape: f32[2,1,128], index: 4, kind: output, shape index: {2}]  }
   0x1 LB: > { %s2578_s16 = sadd.s32 4294967295, %s3574_s15   ;;  %p2582_p0 = scmp.ge.s32.totalorder %s3574_s15, 1  ;;  %s3574_s15 = sphi %s3602_s15, %s15_s15  }
   0x2   : > { %p167_p1 = scmp.lt.s32.totalorder %s3574_s15, 3 }
   0x4   : > { %p168_p2 = pnand %p2582_p0, %p167_p1 }
   0x6   : > { %171 = sbr.rel (%p168_p2) target bundleno = 566 (0x236), region = 28 }
   0xd   : > { %v3496_v0 = vld [vmem:[%s4618_s1 + $0x100] sm:$0xff]   ;;  %v3499_v3 = vld [vmem:[%s4618_s1 + $0x108] sm:$0xff]   ;;  %v3502_v6 = vld [vmem:[%s4618_s1 + $0x110] sm:$0xff]   ;;  %p199_p3 = scmp.lt.s32.totalorder %s2578_s16, 1  ;;  %vm463_vm0 = vcmask 1047552  }
   0xe   : > { %v3616_v1 = vld [vmem:[%s4618_s1 + $0x140] sm:$0xff]   ;;  %2759 = vmatprep.subr.bf16.mxu0 %v3496_v0  ;;  %v3629_v4 = vld [vmem:[%s4618_s1 + $0x148] sm:$0xff]   ;;  %v3641_v7 = vld [vmem:[%s4618_s1 + $0x150] sm:$0xff]   ;;  %vm562_vm1 = vsmask.f32 7424 }
   0xf   : > { %v3498_v2 = vld [vmem:[%s4618_s1 + $0xc0] sm:$0xff]   ;;  %3311 = vmatprep.subr.bf16.mxu1 %v3616_v1  ;;  %v3501_v5 = vld [vmem:[%s4618_s1 + $0xc8] sm:$0xff]   ;;  %v3504_v8 = vld [vmem:[%s4618_s1 + $0xd0] sm:$0xff]   ;;  %s4629_s16 = smov (!%p199_p3, %s2578_s16), 1  ;;  %vm464_vm2 = vsmask.f32 7938 }
  0x10   : > { %2760 = vmatpush3.bf16.msra.mxu0 %v3498_v2  ;;  %3319 = vmatpush3.bf16.msra.mxu1 %v3616_v1  ;;  %v3505_v9 = vld [vmem:[%s4618_s1 + $0x118] sm:$0xff]   ;;  %v3508_v12 = vld [vmem:[%s4618_s1 + $0x120] sm:$0xff]   ;;  %v3511_v15 = vld [vmem:[%s4618_s1 + $0x128] sm:$0xff]   ;;  %s2757_s27 = sshll.u32 %s4629_s16, 8  ;;  %s211_s5 = scalar_lea.vmem %s4620_s3, %s4629_s16 }
  0x11   : > { %2761 = vmatprep.subr.bf16.mxu0 %v3499_v3  ;;  %3312 = vmatprep.subr.bf16.mxu1 %v3629_v4  ;;  %v3654_v10 = vld [vmem:[%s4618_s1 + $0x158] sm:$0xff]   ;;  %v3669_v13 = vld [vmem:[%s4618_s1 + $0x160] sm:$0xff]   ;;  %v3686_v16 = vld [vmem:[%s4618_s1 + $0x168] sm:$0xff]   ;;  %s3707_s10 = scalar_lea.vmem %s4617_s0, %s2757_s27  ;;  %s4524_s29 = scalar_lea.vmem %s4619_s2, %s2757_s27 }
  0x12   : > { %v3507_v11 = vld [vmem:[%s4618_s1 + $0xd8] sm:$0xff]   ;;  %v3510_v14 = vld [vmem:[%s4618_s1 + $0xe0] sm:$0xff]   ;;  %v3513_v17 = vld [vmem:[%s4618_s1 + $0xe8] sm:$0xff]   ;;  %s214_s8 = scalar_lea.vmem %s4621_s4, %s4629_s16 }
  0x13   : > { %v3514_v18 = vld [vmem:[%s4618_s1 + $0x130] sm:$0xff]   ;;  %v3517_v21 = vld [vmem:[%s4618_s1 + $0x138] sm:$0xff]   ;;  %v216_v22 = vld [vmem:[%s3707_s10] sm:$0xff] }
  0x14   : > { %2762 = vmatpush3.bf16.msra.mxu0 %v3501_v5  ;;  %3320 = vmatpush3.bf16.msra.mxu1 %v3629_v4  ;;  %v3700_v19 = vld [vmem:[%s4618_s1 + $0x170] sm:$0xff]   ;;  %v217_v23 = vld [vmem:[%s3707_s10 + $0x8] sm:$0xff]  ;;  %v232_v24 = vld [vmem:[%s3707_s10 + $0x80] sm:$0xff] }
  0x15   : > { %2763 = vmatprep.subr.bf16.mxu0 %v3502_v6  ;;  %3313 = vmatprep.subr.bf16.mxu1 %v3641_v7  ;;  %v3516_v20 = vld [vmem:[%s4618_s1 + $0xf0] sm:$0xff]   ;;  %v3723_v25 = vld [vmem:[%s4618_s1 + $0x178] sm:$0xff]   ;;  %v3725_v26 = vpack.c.bf16 %v217_v23, %v216_v22  ;;  %v233_v27 = vld [vmem:[%s3707_s10 + $0x88] sm:$0xff] }
  0x16   : > { %v234_v28 = vld [vmem:[%s3707_s10 + $0x90] sm:$0xff]  ;;  %v3519_v29 = vld [vmem:[%s4618_s1 + $0xf8] sm:$0xff]   ;;  %v3732_v30 = vpack.c.bf16 %v233_v27, %v232_v24  ;;  %vm3745_vm3 = vmand %vm463_vm0, %vm562_vm1 }
  0x17   : > { %v235_v31 = vld [vmem:[%s3707_s10 + $0x98] sm:$0xff]  ;;  %981 = vmatprep.mubr.bf16.mxu0 %v3725_v26  ;;  %v336_v32 = vshrl.u32 %v3725_v26, 16  ;;  %v339_v33 = vshll.u32 %v3725_v26, 16  ;;  %v3520_v41 = vld [vmem:[%s4618_s1 + $0x40] sm:$0xff]   ;;  %vm3755_vm4 = vmand %vm463_vm0, %vm464_vm2 }
  0x18   : > { %2764 = vmatpush3.bf16.msra.mxu0 %v3504_v8  ;;  %3321 = vmatpush3.bf16.msra.mxu1 %v3641_v7  ;;  %v3738_v34 = vpack.c.bf16 %v235_v31, %v234_v28  ;;  %v392_v35 = vshrl.u32 %v3732_v30, 16  ;;  %v395_v36 = vshll.u32 %v3732_v30, 16  ;;  %v3521_v46 = vld [vmem:[%s4618_s1] sm:$0xff]   ;;  %v218_v47 = vld [vmem:[%s3707_s10 + $0x10] sm:$0xff]  ;;  %v219_v48 = vld [vmem:[%s3707_s10 + $0x18] sm:$0xff] }
  0x19   : > { %2765 = vmatprep.subr.bf16.mxu0 %v3505_v9  ;;  %3314 = vmatprep.subr.bf16.mxu1 %v3654_v10  ;;  %v338_v38 = vrot.slane %v336_v32, 7  ;;  %v3765_v51 = vpack.c.bf16 %v219_v48, %v218_v47  ;;  %v236_v52 = vld [vmem:[%s3707_s10 + $0xa0] sm:$0xff]  ;;  %v237_v53 = vld [vmem:[%s3707_s10 + $0xa8] sm:$0xff]  ;;  %v238_v54 = vld [vmem:[%s3707_s10 + $0xb0] sm:$0xff]  ;;  %v514_v56 = vrot.slane %v339_v33, 1 }
  0x1a   : > { %v399_v39 = vshrl.u32 %v3738_v34, 16  ;;  %v402_v40 = vshll.u32 %v3738_v34, 16  ;;  %v530_v42 = vrot.slane %v395_v36, 1  ;;  %v394_v49 = vrot.slane %v392_v35, 7  ;;  %v239_v60 = vld [vmem:[%s3707_s10 + $0xb8] sm:$0xff]  ;;  %v3522_v63 = vld [vmem:[%s4618_s1 + $0x48] sm:$0xff]  }
  0x1b   : > { %v341_v44 = vor.u32 %v339_v33, %v338_v38  ;;  %v3775_v59 = vpack.c.bf16 %v237_v53, %v236_v52  ;;  %v343_v0 = vshrl.u32 %v3765_v51, 16  ;;  %v346_v2 = vshll.u32 %v3765_v51, 16  ;;  %v3524_v22 = vld [vmem:[%s4618_s1 + $0x50] sm:$0xff]   ;;  %v220_v23 = vld [vmem:[%s3707_s10 + $0x20] sm:$0xff]  ;;  %v221_v31 = vld [vmem:[%s3707_s10 + $0x28] sm:$0xff] }
  0x1c   : > { %2766 = vmatpush3.bf16.msra.mxu0 %v3507_v11  ;;  %3322 = vmatpush3.bf16.msra.mxu1 %v3654_v10  ;;  %v532_v45 = vrot.slane %v402_v40, 1  ;;  %v531_v50 = vor.u32 %v530_v42, %v392_v35  ;;  %v401_v55 = vrot.slane %v399_v39, 7  ;;  %v397_v61 = vor.u32 %v395_v36, %v394_v49  ;;  %v241_v33 = vld [vmem:[%s3707_s10 + $0xc8] sm:$0xff]  ;;  %v3526_v47 = vld [vmem:[%s4618_s1 + $0x58] sm:$0xff]   ;;  %v4120_v43 = vld [vmem:[%s4618_s1 + $0x200] sm:$0xff]  }
  0x1d   : > { %2767 = vmatprep.subr.bf16.mxu0 %v3508_v12  ;;  %3315 = vmatprep.subr.bf16.mxu1 %v3669_v13  ;;  %v3772_v57 = vsel %vm3755_vm4, %v341_v44, 0  ;;  %v3787_v3 = vpack.c.bf16 %v239_v60, %v238_v54  ;;  %v406_v6 = vshrl.u32 %v3775_v59, 16  ;;  %v409_v8 = vshll.u32 %v3775_v59, 16  ;;  %v242_v44 = vld [vmem:[%s3707_s10 + $0xd0] sm:$0xff]  ;;  %v3527_v60 = vld [vmem:[%s4618_s1 + $0x18] sm:$0xff]  }
  0x1e   : > { %v533_v58 = vor.u32 %v532_v45, %v399_v39  ;;  %v3780_v62 = vsel %vm3745_vm3, %v531_v50, 0  ;;  %v404_v9 = vor.u32 %v402_v40, %v401_v55  ;;  %v345_v11 = vrot.slane %v343_v0, 7  ;;  %v243_v45 = vld [vmem:[%s3707_s10 + $0xd8] sm:$0xff] }
  0x1f   : > { %3199 = vmatprep.mubr.bf16.mxu1 %v3780_v62  ;;  %v516_v12 = vrot.slane %v346_v2, 1  ;;  %v3814_v24 = vsel %vm3755_vm4, %v397_v61, 0  ;;  %v408_v36 = vrot.slane %v406_v6, 7  ;;  %v3846_v48 = vpack.c.bf16 %v243_v45, %v242_v44  ;;  %v3530_v44 = vld [vmem:[%s4618_s1 + $0x68] sm:$0xff]  }
  0x20   : > { %2768 = vmatpush3.bf16.msra.mxu0 %v3510_v14  ;;  %3323 = vmatpush3.bf16.msra.mxu1 %v3669_v13  ;;  %v3793_v5 = vsel %vm3745_vm3, %v533_v58, 0  ;;  %v413_v14 = vshrl.u32 %v3787_v3, 16  ;;  %v3826_v35 = vsel %vm3755_vm4, %v404_v9, 0 }
  0x21   : > { %2769 = vmatprep.subr.bf16.mxu0 %v3511_v15  ;;  %3316 = vmatprep.subr.bf16.mxu1 %v3686_v16  ;;  %v416_v15 = vshll.u32 %v3787_v3, 16  ;;  %v3816_v27 = vor.u32 %v516_v12, %v343_v0  ;;  %v411_v49 = vor.u32 %v409_v8, %v408_v36  ;;  %v430_v58 = vshll.u32 %v3846_v48, 16  ;;  %v3528_v0 = vld [vmem:[%s4618_s1 + $0x60] sm:$0xff]  }
  0x22   : > { %v415_v38 = vrot.slane %v413_v14, 7  ;;  %v244_v12 = vld [vmem:[%s3707_s10 + $0xe0] sm:$0xff] }
  0x24   : > { %2770 = vmatpush3.bf16.msra.mxu0 %v3513_v17  ;;  %3324 = vmatpush3.bf16.msra.mxu1 %v3686_v16  ;;  %v3523_v17 = vld [vmem:[%s4618_s1 + $0x8] sm:$0xff]   ;;  %v418_v50 = vor.u32 %v416_v15, %v415_v38 }
  0x25   : > { %2771 = vmatprep.subr.bf16.mxu0 %v3514_v18  ;;  %3317 = vmatprep.subr.bf16.mxu1 %v3700_v19  ;;  %v534_v18 = vrot.slane %v409_v8, 1 }
  0x27   : > { %v535_v28 = vor.u32 %v534_v18, %v406_v6  ;;  %v222_v6 = vld [vmem:[%s3707_s10 + $0x30] sm:$0xff] }
  0x28   : > { %2772 = vmatpush3.bf16.msra.mxu0 %v3516_v20  ;;  %3325 = vmatpush3.bf16.msra.mxu1 %v3700_v19  ;;  %v3805_v20 = vor.u32 %v514_v56, %v336_v32  ;;  %v240_v32 = vld [vmem:[%s3707_s10 + $0xc0] sm:$0xff]  ;;  %v427_v56 = vshrl.u32 %v3846_v48, 16 }
  0x29   : > { %2773 = vmatprep.subr.bf16.mxu0 %v3517_v21  ;;  %3318 = vmatprep.subr.bf16.mxu1 %v3723_v25  ;;  %v536_v21 = vrot.slane %v416_v15, 1  ;;  %v3834_v42 = vpack.c.bf16 %v241_v33, %v240_v32  ;;  %v3883_v15 = vsel %vm3755_vm4, %v411_v49, 0 }
  0x2b   : > { %v537_v40 = vor.u32 %v536_v21, %v413_v14  ;;  %v420_v52 = vshrl.u32 %v3834_v42, 16  ;;  %v423_v53 = vshll.u32 %v3834_v42, 16  ;;  %v245_v14 = vld [vmem:[%s3707_s10 + $0xe8] sm:$0xff]  ;;  %v246_v21 = vld [vmem:[%s3707_s10 + $0xf0] sm:$0xff] }
  0x2c   : > { %2774 = vmatpush3.bf16.msra.mxu0 %v3519_v29  ;;  %3326 = vmatpush3.bf16.msra.mxu1 %v3723_v25  ;;  %v3525_v29 = vld [vmem:[%s4618_s1 + $0x10] sm:$0xff]  }
  0x2d   : > { %3167 = vmatprep.subr.bf16.mxu0 %v3616_v1  ;;  %2895 = vmatprep.subr.bf16.mxu1 %v3520_v41  ;;  %v3832_v41 = vpack.c.bf16 %v221_v31, %v220_v23  ;;  %v538_v61 = vrot.slane %v423_v53, 1  ;;  %v422_v23 = vrot.slane %v420_v52, 7  ;;  %v3529_v31 = vld [vmem:[%s4618_s1 + $0x20] sm:$0xff]  }
  0x2f   : > { %982 = vmatmul.mubr.bf16.vlgmr.msra.gmra.mrb[0].mxu0 %v3772_v57  ;;  %3200 = vmatmul.mubr.bf16.vlgmr.msra.gmra.mrb[0].mxu1 %v3793_v5  ;;  %v350_v54 = vshrl.u32 %v3832_v41, 16  ;;  %v353_v55 = vshll.u32 %v3832_v41, 16  ;;  %v539_v8 = vor.u32 %v538_v61, %v420_v52  ;;  %v3531_v61 = vld [vmem:[%s4618_s1 + $0x28] sm:$0xff]  }
  0x30   : > { %3168 = vmatpush3.bf16.msra.mxu0 %v3616_v1  ;;  %2896 = vmatpush3.bf16.msra.mxu1 %v3521_v46  ;;  %v348_v1 = vor.u32 %v346_v2, %v345_v11  ;;  %v3841_v46 = vsel %vm3745_vm3, %v535_v28, 0  ;;  %v540_v2 = vrot.slane %v430_v58, 1  ;;  %v223_v11 = vld [vmem:[%s3707_s10 + $0x38] sm:$0xff] }
  0x31   : > { %989 = vmatprep.mubr.bf16.mxu0 %v3765_v51  ;;  %2897 = vmatprep.subr.bf16.mxu1 %v3522_v63  ;;  %v352_v63 = vrot.slane %v350_v54, 7  ;;  %v3897_v28 = vsel %vm3745_vm3, %v539_v8, 0  ;;  %v429_v8 = vrot.slane %v427_v56, 7 }
  0x32   : > { %3169 = vmatprep.subr.bf16.mxu0 %v3629_v4  ;;  %v3830_v39 = vsel %vm3755_vm4, %v348_v1, 0  ;;  %3203 = vmatprep.mubr.bf16.mxu1 %v3841_v46  ;;  %v541_v18 = vor.u32 %v540_v2, %v427_v56  ;;  %v3891_v1 = vpack.c.bf16 %v245_v14, %v244_v12  ;;  %v225_v2 = vld [vmem:[%s3707_s10 + $0x48] sm:$0xff]  ;;  %v226_v14 = vld [vmem:[%s3707_s10 + $0x50] sm:$0xff] }
  0x33   : > { %v355_v9 = vor.u32 %v353_v55, %v352_v63  ;;  %v432_v56 = vor.u32 %v430_v58, %v429_v8 }
  0x34   : > { %3170 = vmatpush3.bf16.msra.mxu0 %v3629_v4  ;;  %2898 = vmatpush3.bf16.msra.mxu1 %v3523_v17  ;;  %v3852_v4 = vsel %vm3745_vm3, %v537_v40, 0  ;;  %v3887_v17 = vsel %vm3755_vm4, %v418_v50, 0  ;;  %v3911_v33 = vsel %vm3745_vm3, %v541_v18, 0  ;;  %v434_v36 = vshrl.u32 %v3891_v1, 16 }
  0x35   : > { %3171 = vmatprep.subr.bf16.mxu0 %v3641_v7  ;;  %2899 = vmatprep.subr.bf16.mxu1 %v3524_v22  ;;  %v247_v22 = vld [vmem:[%s3707_s10 + $0xf8] sm:$0xff]  ;;  %v437_v38 = vshll.u32 %v3891_v1, 16  ;;  %v425_v50 = vor.u32 %v423_v53, %v422_v23 }
  0x36   : > { %v3906_v32 = vpack.c.bf16 %v247_v22, %v246_v21  ;;  %v436_v18 = vrot.slane %v434_v36, 7  ;;  %v227_v23 = vld [vmem:[%s3707_s10 + $0x58] sm:$0xff] }
  0x37   : > { %990 = vmatmul.mubr.bf16.gmra.mrb[4].mxu0 %v3830_v39  ;;  %3204 = vmatmul.mubr.bf16.gmra.mrb[4].mxu1 %v3852_v4  ;;  %v542_v52 = vrot.slane %v437_v38, 1 }
  0x38   : > { %997 = vmatprep.mubr.bf16.mxu0 %v3832_v41  ;;  %2900 = vmatpush3.bf16.msra.mxu1 %v3525_v29  ;;  %v3901_v29 = vsel %vm3755_vm4, %v355_v9, 0  ;;  %v444_v49 = vshll.u32 %v3906_v32, 16 }
  0x39   : > { %3172 = vmatpush3.bf16.msra.mxu0 %v3641_v7  ;;  %2901 = vmatprep.subr.bf16.mxu1 %v3526_v47  ;;  %v3889_v7 = vpack.c.bf16 %v223_v11, %v222_v6  ;;  %v441_v47 = vshrl.u32 %v3906_v32, 16  ;;  %v3938_v6 = vsel %vm3755_vm4, %v425_v50, 0  ;;  %v3532_v11 = vld [vmem:[%s4618_s1 + $0x70] sm:$0xff]   ;;  %v3978_v50 = vsel %vm3755_vm4, %v432_v56, 0  ;;  %v3543_v56 = vld [vmem:[%s4618_s1 + $0x1c0] sm:$0xff]  }
  0x3a   : > { %3173 = vmatprep.subr.bf16.mxu0 %v3654_v10  ;;  %3207 = vmatprep.mubr.bf16.mxu1 %v3897_v28  ;;  %v544_v63 = vrot.slane %v444_v49, 1 }
  0x3b   : > { %v357_v40 = vshrl.u32 %v3889_v7, 16  ;;  %v360_v45 = vshll.u32 %v3889_v7, 16  ;;  %v443_v21 = vrot.slane %v441_v47, 7 }
  0x3c   : > { %2902 = vmatpush3.bf16.msra.mxu1 %v3527_v60  ;;  %v545_v9 = vor.u32 %v544_v63, %v441_v47  ;;  %v3967_v47 = vpack.c.bf16 %v227_v23, %v226_v14  ;;  %v3537_v23 = vld [vmem:[%s4618_s1 + $0x88] sm:$0xff]  }
  0x3d   : > { %2903 = vmatprep.subr.bf16.mxu1 %v3528_v0  ;;  %3174 = vmatpush3.bf16.msra.mxu0 %v3654_v10  ;;  %v359_v60 = vrot.slane %v357_v40, 7  ;;  %v543_v10 = vor.u32 %v542_v52, %v434_v36  ;;  %v224_v0 = vld [vmem:[%s3707_s10 + $0x40] sm:$0xff]  ;;  %v439_v52 = vor.u32 %v437_v38, %v436_v18  ;;  %v4016_v18 = vsel %vm3745_vm3, %v3816_v27, 0 }
  0x3e   : > { %3175 = vmatprep.subr.bf16.mxu0 %v3669_v13  ;;  %v3943_v12 = vpack.c.bf16 %v225_v2, %v224_v0  ;;  %v3971_v58 = vsel %vm3745_vm3, %v545_v9, 0  ;;  %v3535_v0 = vld [vmem:[%s4618_s1 + $0x38] sm:$0xff]   ;;  %v3576_v2 = vmov 0   ;;  %v374_v8 = vshll.u32 %v3967_v47, 16 }
  0x3f   : > { %998 = vmatmul.mubr.bf16.gmra.mrb[8].mxu0 %v3901_v29  ;;  %3208 = vmatmul.mubr.bf16.gmra.mrb[8].mxu1 %v3911_v33  ;;  %v362_v53 = vor.u32 %v360_v45, %v359_v60  ;;  %v3949_v22 = vsel %vm3745_vm3, %v543_v10, 0  ;;  %v446_v60 = vor.u32 %v444_v49, %v443_v21  ;;  %v371_v49 = vshrl.u32 %v3967_v47, 16  ;;  %v228_v10 = vld [vmem:[%s3707_s10 + $0x60] sm:$0xff] }
  0x40   : > { %1005 = vmatprep.mubr.bf16.mxu0 %v3889_v7  ;;  %2904 = vmatpush3.bf16.msra.mxu1 %v3529_v31  ;;  %v3958_v31 = vsel %vm3745_vm3, %v3805_v20, 0  ;;  %v364_v36 = vshrl.u32 %v3943_v12, 16  ;;  %v3533_v20 = vld [vmem:[%s4618_s1 + $0x30] sm:$0xff]   ;;  %v4004_v9 = vsel %vm3755_vm4, %v439_v52, 0  ;;  %v518_v52 = vrot.slane %v353_v55, 1 }
  0x41   : > { %2905 = vmatprep.subr.bf16.mxu1 %v3530_v44  ;;  %3176 = vmatpush3.bf16.msra.mxu0 %v3669_v13  ;;  %v3963_v13 = vsel %vm3755_vm4, %v362_v53, 0  ;;  %v367_v44 = vshll.u32 %v3943_v12, 16  ;;  %v229_v53 = vld [vmem:[%s3707_s10 + $0x68] sm:$0xff]  ;;  %v4011_v14 = vsel %vm3755_vm4, %v446_v60, 0  ;;  %v373_v21 = vrot.slane %v371_v49, 7 }
  0x42   : > { %3177 = vmatprep.subr.bf16.mxu0 %v3686_v16  ;;  %3211 = vmatprep.mubr.bf16.mxu1 %v3949_v22  ;;  %v366_v63 = vrot.slane %v364_v36, 7 }
  0x43   : > { %v376_v60 = vor.u32 %v374_v8, %v373_v21  ;;  %v522_v55 = vrot.slane %v367_v44, 1 }
  0x44   : > { %2906 = vmatpush3.bf16.msra.mxu1 %v3531_v61  ;;  %v3534_v61 = vld [vmem:[%s4618_s1 + $0x78] sm:$0xff]   ;;  %v369_v38 = vor.u32 %v367_v44, %v366_v63  ;;  %v520_v63 = vrot.slane %v360_v45, 1 }
  0x45   : > { %2907 = vmatprep.subr.bf16.mxu1 %v3532_v11  ;;  %3178 = vmatpush3.bf16.msra.mxu0 %v3686_v16  ;;  %v3536_v16 = vld [vmem:[%s4618_s1 + $0x80] sm:$0xff]   ;;  %v4006_v11 = vpack.c.bf16 %v229_v53, %v228_v10 }
  0x46   : > { %3179 = vmatprep.subr.bf16.mxu0 %v3700_v19  ;;  %v521_v53 = vor.u32 %v520_v63, %v357_v40  ;;  %v3540_v63 = vld [vmem:[%s4618_s1 + $0xa0] sm:$0xff]  }
  0x47   : > { %1006 = vmatmul.mubr.bf16.gmra.mrb[12].mxu0 %v3963_v13  ;;  %3212 = vmatmul.mubr.bf16.gmra.mrb[12].mxu1 %v3971_v58  ;;  %v378_v27 = vshrl.u32 %v4006_v11, 16  ;;  %v381_v10 = vshll.u32 %v4006_v11, 16 }
  0x48   : > { %1013 = vmatprep.mubr.bf16.mxu0 %v3943_v12  ;;  %2908 = vmatpush3.bf16.msra.mxu1 %v3533_v20  ;;  %v230_v20 = vld [vmem:[%s3707_s10 + $0x70] sm:$0xff]  ;;  %v4062_v44 = vsel %vm3745_vm3, %v521_v53, 0 }
  0x49   : > { %1447 = vmatprep.mubr.bf16.mxu1 %v3576_v2  ;;  %2909 = vmatprep.subr.bf16.mxu1 %v3534_v61  ;;  %v231_v61 = vld [vmem:[%s3707_s10 + $0x78] sm:$0xff]  ;;  %v380_v21 = vrot.slane %v378_v27, 7 }
  0x4a   : > { %3180 = vmatpush3.bf16.msra.mxu0 %v3700_v19  ;;  %v4020_v19 = vsel %vm3755_vm4, %v369_v38, 0  ;;  %v519_v38 = vor.u32 %v518_v52, %v350_v54  ;;  %v4048_v45 = vpack.c.bf16 %v231_v61, %v230_v20  ;;  %v4058_v54 = vsel %vm3755_vm4, %v376_v60, 0 }
  0x4b   : > { %3181 = vmatprep.subr.bf16.mxu0 %v3723_v25  ;;  %v383_v52 = vor.u32 %v381_v10, %v380_v21  ;;  %v3551_v21 = vld [vmem:[%s4618_s1 + $0xb8] sm:$0xff]  }
  0x4c   : > { %2910 = vmatpush3.bf16.msra.mxu1 %v3535_v0  ;;  %v524_v0 = vrot.slane %v374_v8, 1  ;;  %v388_v8 = vshll.u32 %v4048_v45, 16 }
  0x4d   : > { %3215 = vmatprep.subr.bf16.mxu1 %v3536_v16 }
  0x4e   : > { %3182 = vmatpush3.bf16.msra.mxu0 %v3723_v25  ;;  %v3538_v25 = vld [vmem:[%s4618_s1 + $0x90] sm:$0xff]   ;;  %v525_v40 = vor.u32 %v524_v0, %v371_v49  ;;  %v385_v49 = vshrl.u32 %v4048_v45, 16  ;;  %v528_v60 = vrot.slane %v388_v8, 1 }
  0x4f   : > { %1014 = vmatmul.mubr.bf16.gmra.mrb[16].mxu0 %v4020_v19  ;;  %3031 = vmatprep.subr.bf16.mxu0 %v3543_v56  ;;  %v3542_v0 = vld [vmem:[%s4618_s1 + $0xb0] sm:$0xff]  }
  0x50   : > { %1448 = vmatmul.mubr.bf16.vlgmr.msra.gmra.mrb[16].mxu1 %v3576_v2  ;;  %1021 = vmatprep.mubr.bf16.mxu0 %v3967_v47  ;;  %v4074_v20 = vsel %vm3745_vm3, %v525_v40, 0  ;;  %v3545_v40 = vld [vmem:[%s4618_s1 + $0x1c8] sm:$0xff]  }
  0x51   : > { %3216 = vmatpush3.bf16.msra.mxu1 %v3536_v16  ;;  %1455 = vmatprep.mubr.bf16.mxu1 %v3725_v26  ;;  %v4052_v26 = vsel %vm3745_vm3, %v519_v38, 0  ;;  %v523_v16 = vor.u32 %v522_v55, %v364_v36  ;;  %v3539_v36 = vld [vmem:[%s4618_s1 + $0x98] sm:$0xff]   ;;  %v529_v38 = vor.u32 %v528_v60, %v385_v49  ;;  %v387_v55 = vrot.slane %v385_v49, 7  ;;  %v3548_v49 = vld [vmem:[%s4618_s1 + $0x190] sm:$0xff]   ;;  %v3552_v60 = vld [vmem:[%s4618_s1 + $0x1e0] sm:$0xff]  }
  0x52   : > { %3217 = vmatprep.subr.bf16.mxu1 %v3537_v23 }
  0x53   : > { %v4067_v56 = vsel %vm3745_vm3, %v523_v16, 0  ;;  %v3544_v16 = vld [vmem:[%s4618_s1 + $0x180] sm:$0xff]  }
  0x55   : > { %3218 = vmatpush3.bf16.msra.mxu1 %v3537_v23  ;;  %v526_v23 = vrot.slane %v381_v10, 1  ;;  %v4094_v10 = vsel %vm3745_vm3, %v529_v38, 0  ;;  %v3555_v38 = vld [vmem:[%s4618_s1 + $0x1a8] sm:$0xff]  }
  0x56   : > { %3219 = vmatprep.subr.bf16.mxu1 %v3538_v25 }
  0x57   : > { %1022 = vmatmul.mubr.bf16.gmra.mrb[20].mxu0 %v4058_v54  ;;  %v527_v61 = vor.u32 %v526_v23, %v378_v27  ;;  %v3541_v27 = vld [vmem:[%s4618_s1 + $0xa8] sm:$0xff]   ;;  %v3549_v23 = vld [vmem:[%s4618_s1 + $0x1d8] sm:$0xff]  }
  0x58   : > { %1456 = vmatmul.mubr.bf16.gmra.mrb[20].mxu1 %v3772_v57  ;;  %1029 = vmatprep.mubr.bf16.mxu0 %v4006_v11  ;;  %v4090_v57 = vsel %vm3755_vm4, %v383_v52, 0  ;;  %v3550_v52 = vld [vmem:[%s4618_s1 + $0x198] sm:$0xff]  }
  0x59   : > { %1463 = vmatprep.mubr.bf16.mxu1 %v3765_v51  ;;  %3220 = vmatpush3.bf16.msra.mxu1 %v3538_v25  ;;  %v4086_v53 = vsel %vm3745_vm3, %v527_v61, 0  ;;  %v390_v25 = vor.u32 %v388_v8, %v387_v55  ;;  %v3546_v8 = vld [vmem:[%s4618_s1 + $0x188] sm:$0xff]   ;;  %v3553_v61 = vld [vmem:[%s4618_s1 + $0x1a0] sm:$0xff]   ;;  %v3556_v55 = vld [vmem:[%s4618_s1 + $0x1f0] sm:$0xff]  }
  0x5a   : > { %3221 = vmatprep.subr.bf16.mxu1 %v3539_v36 }
  0x5b   : > { %v4108_v37 = vsel %vm3755_vm4, %v390_v25, 0  ;;  %v3558_v25 = vld [vmem:[%s4618_s1 + $0x1f8] sm:$0xff]  }
  0x5d   : > { %3222 = vmatpush3.bf16.msra.mxu1 %v3539_v36  ;;  %v3547_v36 = vld [vmem:[%s4618_s1 + $0x1d0] sm:$0xff]  }
  0x5e   : > { %3223 = vmatprep.subr.bf16.mxu1 %v3540_v63 }
  0x5f   : > { %1030 = vmatmul.mubr.bf16.gmra.mrb[24].mxu0 %v4090_v57 }
  0x60   : > { %1464 = vmatmul.mubr.bf16.gmra.mrb[24].mxu1 %v3830_v39  ;;  %1037 = vmatprep.mubr.bf16.mxu0 %v4048_v45 }
  0x61   : > { %1471 = vmatprep.mubr.bf16.mxu1 %v3832_v41  ;;  %3224 = vmatpush3.bf16.msra.mxu1 %v3540_v63  ;;  %v3554_v63 = vld [vmem:[%s4618_s1 + $0x1e8] sm:$0xff]  }
  0x62   : > { %3225 = vmatprep.subr.bf16.mxu1 %v3541_v27 }
  0x65   : > { %3226 = vmatpush3.bf16.msra.mxu1 %v3541_v27  ;;  %v3557_v27 = vld [vmem:[%s4618_s1 + $0x1b0] sm:$0xff]  }
  0x66   : > { %3227 = vmatprep.subr.bf16.mxu1 %v3542_v0 }
  0x67   : > { %1038 = vmatmul.mubr.bf16.gmra.mrb[28].mxu0 %v4108_v37 }
  0x68   : > { %1472 = vmatmul.mubr.bf16.gmra.mrb[28].mxu1 %v3901_v29  ;;  %1045 = vmatprep.mubr.bf16.mxu0 %v3732_v30 }
  0x69   : > { %1479 = vmatprep.mubr.bf16.mxu1 %v3889_v7  ;;  %3228 = vmatpush3.bf16.msra.mxu1 %v3542_v0  ;;  %v3559_v0 = vld [vmem:[%s4618_s1 + $0x1b8] sm:$0xff]  }
  0x6a   : > { %3229 = vmatprep.subr.bf16.mxu1 %v3551_v21 }
  0x6d   : > { %3230 = vmatpush3.bf16.msra.mxu1 %v3551_v21  ;;  %v3561_v21 = vld [vmem:[%s4618_s1 + $0x208] sm:$0xff]  }
  0x6e   : > { %3263 = vmatprep.subr.bf16.mxu1 %v4120_v43 }
  0x6f   : > { %1046 = vmatmul.mubr.bf16.gmra.mrb[32].mxu0 %v3814_v24 }
  0x70   : > { %1480 = vmatmul.mubr.bf16.gmra.mrb[32].mxu1 %v3963_v13  ;;  %1053 = vmatprep.mubr.bf16.mxu0 %v3738_v34 }
  0x71   : > { %1487 = vmatprep.mubr.bf16.mxu1 %v3943_v12 }
  0x77   : > { %1054 = vmatmul.mubr.bf16.gmra.mrb[36].mxu0 %v3826_v35 }
  0x78   : > { %1488 = vmatmul.mubr.bf16.gmra.mrb[36].mxu1 %v4020_v19  ;;  %1061 = vmatprep.mubr.bf16.mxu0 %v3775_v59 }
  0x79   : > { %1495 = vmatprep.mubr.bf16.mxu1 %v3967_v47 }
  0x7f   : > { %1062 = vmatmul.mubr.bf16.gmra.mrb[40].mxu0 %v3883_v15 }
  0x80   : > { %1496 = vmatmul.mubr.bf16.gmra.mrb[40].mxu1 %v4058_v54  ;;  %1069 = vmatprep.mubr.bf16.mxu0 %v3787_v3 }
  0x81   : > { %1503 = vmatprep.mubr.bf16.mxu1 %v4006_v11 }
  0x87   : > { %1070 = vmatmul.mubr.bf16.gmra.mrb[44].mxu0 %v3887_v17 }
  0x88   : > { %1504 = vmatmul.mubr.bf16.gmra.mrb[44].mxu1 %v4090_v57  ;;  %1077 = vmatprep.mubr.bf16.mxu0 %v3834_v42 }
  0x89   : > { %1511 = vmatprep.mubr.bf16.mxu1 %v4048_v45 }
  0x8f   : > { %1078 = vmatmul.mubr.bf16.gmra.mrb[48].mxu0 %v3938_v6 }
  0x90   : > { %1512 = vmatmul.mubr.bf16.gmra.mrb[48].mxu1 %v4108_v37  ;;  %1085 = vmatprep.mubr.bf16.mxu0 %v3846_v48 }
  0x91   : > { %1519 = vmatprep.mubr.bf16.mxu1 %v3732_v30 }
  0x97   : > { %1086 = vmatmul.mubr.bf16.gmra.mrb[52].mxu0 %v3978_v50 }
  0x98   : > { %1520 = vmatmul.mubr.bf16.gmra.mrb[52].mxu1 %v3814_v24  ;;  %1093 = vmatprep.mubr.bf16.mxu0 %v3891_v1 }
  0x99   : > { %1527 = vmatprep.mubr.bf16.mxu1 %v3738_v34 }
  0x9f   : > { %1094 = vmatmul.mubr.bf16.gmra.mrb[56].mxu0 %v4004_v9 }
  0xa0   : > { %1528 = vmatmul.mubr.bf16.gmra.mrb[56].mxu1 %v3826_v35  ;;  %1101 = vmatprep.mubr.bf16.mxu0 %v3906_v32 }
  0xa1   : > { %1535 = vmatprep.mubr.bf16.mxu1 %v3775_v59 }
  0xa7   : > { %1102 = vmatmul.mubr.bf16.gmra.mrb[60].mxu0 %v4011_v14 }
  0xa8   : > { %1536 = vmatmul.mubr.bf16.gmra.mrb[60].mxu1 %v3883_v15  ;;  %3183 = vmatprep.mubr.bf16.mxu0 %v3958_v31 }
  0xa9   : > { %1543 = vmatprep.mubr.bf16.mxu1 %v3787_v3 }
  0xaf   : > { %3184 = vmatmul.mubr.bf16.vlgmr.msra.gmra.mrb[64].mxu0 %v4016_v18 }
  0xb0   : > { %1544 = vmatmul.mubr.bf16.gmra.mrb[64].mxu1 %v3887_v17  ;;  %3032 = vmatpush3.bf16.msra.mxu0 %v3544_v16  ;;  %v3563_v16 = vld [vmem:[%s4618_s1 + $0x218] sm:$0xff]  }
  0xb1   : > { %3033 = vmatprep.subr.bf16.mxu0 %v3545_v40  ;;  %3187 = vmatprep.mubr.bf16.mxu0 %v4052_v26 }
  0xb2   : > { %1551 = vmatprep.mubr.bf16.mxu1 %v3834_v42 }
  0xb4   : > { %3034 = vmatpush3.bf16.msra.mxu0 %v3546_v8 }
  0xb5   : > { %3035 = vmatprep.subr.bf16.mxu0 %v3547_v36 }
  0xb7   : > { %3188 = vmatmul.mubr.bf16.gmra.mrb[68].mxu0 %v4062_v44 }
  0xb8   : > { %1552 = vmatmul.mubr.bf16.gmra.mrb[68].mxu1 %v3938_v6  ;;  %3036 = vmatpush3.bf16.msra.mxu0 %v3548_v49 }
  0xb9   : > { %3037 = vmatprep.subr.bf16.mxu0 %v3549_v23  ;;  %3191 = vmatprep.mubr.bf16.mxu0 %v4067_v56 }
  0xba   : > { %1559 = vmatprep.mubr.bf16.mxu1 %v3846_v48 }
  0xbc   : > { %3038 = vmatpush3.bf16.msra.mxu0 %v3550_v52 }
  0xbd   : > { %3039 = vmatprep.subr.bf16.mxu0 %v3552_v60 }
  0xbf   : > { %3192 = vmatmul.mubr.bf16.gmra.mrb[72].mxu0 %v4074_v20 }
  0xc0   : > { %1560 = vmatmul.mubr.bf16.gmra.mrb[72].mxu1 %v3978_v50  ;;  %3040 = vmatpush3.bf16.msra.mxu0 %v3553_v61 }
  0xc1   : > { %3041 = vmatprep.subr.bf16.mxu0 %v3554_v63  ;;  %3195 = vmatprep.mubr.bf16.mxu0 %v4086_v53 }
  0xc2   : > { %1567 = vmatprep.mubr.bf16.mxu1 %v3891_v1 }
  0xc4   : > { %3042 = vmatpush3.bf16.msra.mxu0 %v3555_v38 }
  0xc5   : > { %3043 = vmatprep.subr.bf16.mxu0 %v3556_v55 }
  0xc7   : > { %3196 = vmatmul.mubr.bf16.gmra.mrb[76].mxu0 %v4094_v10 }
  0xc8   : > { %1568 = vmatmul.mubr.bf16.gmra.mrb[76].mxu1 %v4004_v9  ;;  %3044 = vmatpush3.bf16.msra.mxu0 %v3557_v27 }
  0xc9   : > { %3045 = vmatprep.subr.bf16.mxu0 %v3558_v25  ;;  %3231 = vmatprep.mubr.bf16.mxu1 %v3576_v2 }
  0xca   : > { %2011 = vmatprep.mubr.bf16.mxu0 %v3765_v51  ;;  %v3562_v51 = vld [vmem:[%s4618_s1 + $0x210] sm:$0xff]  }
  0xcc   : > { %3046 = vmatpush3.bf16.msra.mxu0 %v3559_v0 }
  0xcf   : > { %2012 = vmatmul.mubr.bf16.vlgmr.msra.gmra.mrb[80].mxu0 %v3830_v39  ;;  %v3564_v39 = vld [vmem:[%s4618_s1 + $0x220] sm:$0xff]  }
  0xd0   : > { %3232 = vmatmul.mubr.bf16.vlgmr.msra.gmra.mrb[80].mxu1 %v3958_v31  ;;  %2019 = vmatprep.mubr.bf16.mxu0 %v3832_v41  ;;  %v3565_v41 = vld [vmem:[%s4618_s1 + $0x228] sm:$0xff]  }
  0xd1   : > { %3264 = vmatpush3.bf16.msra.mxu1 %v4120_v43  ;;  %3235 = vmatprep.mubr.bf16.mxu1 %v4016_v18 }
  0xd2   : > { %3265 = vmatprep.subr.bf16.mxu1 %v3561_v21 }
  0xd5   : > { %3266 = vmatpush3.bf16.msra.mxu1 %v3561_v21 }
  0xd6   : > { %3267 = vmatprep.subr.bf16.mxu1 %v3562_v51 }
  0xd7   : > { %2020 = vmatmul.mubr.bf16.gmra.mrb[84].mxu0 %v3901_v29  ;;  %v3567_v29 = vld [vmem:[%s4618_s1 + $0x238] sm:$0xff]  }
  0xd8   : > { %3236 = vmatmul.mubr.bf16.gmra.mrb[84].mxu1 %v4052_v26  ;;  %2027 = vmatprep.mubr.bf16.mxu0 %v3889_v7  ;;  %v3566_v7 = vld [vmem:[%s4618_s1 + $0x230] sm:$0xff]  }
  0xd9   : > { %3239 = vmatprep.mubr.bf16.mxu1 %v4062_v44  ;;  %3268 = vmatpush3.bf16.msra.mxu1 %v3562_v51 }
  0xda   : > { %3269 = vmatprep.subr.bf16.mxu1 %v3563_v16 }
  0xdd   : > { %3270 = vmatpush3.bf16.msra.mxu1 %v3563_v16 }
  0xde   : > { %3271 = vmatprep.subr.bf16.mxu1 %v3564_v39 }
  0xdf   : > { %2028 = vmatmul.mubr.bf16.gmra.mrb[88].mxu0 %v3963_v13 }
  0xe0   : > { %3240 = vmatmul.mubr.bf16.gmra.mrb[88].mxu1 %v4067_v56  ;;  %2035 = vmatprep.mubr.bf16.mxu0 %v3943_v12 }
  0xe1   : > { %3243 = vmatprep.mubr.bf16.mxu1 %v4074_v20  ;;  %3272 = vmatpush3.bf16.msra.mxu1 %v3564_v39 }
  0xe2   : > { %3273 = vmatprep.subr.bf16.mxu1 %v3565_v41 }
  0xe5   : > { %3274 = vmatpush3.bf16.msra.mxu1 %v3565_v41 }
  0xe6   : > { %3275 = vmatprep.subr.bf16.mxu1 %v3566_v7 }
  0xe7   : > { %2036 = vmatmul.mubr.bf16.gmra.mrb[92].mxu0 %v4020_v19 }
  0xe8   : > { %3244 = vmatmul.mubr.bf16.gmra.mrb[92].mxu1 %v4086_v53  ;;  %2043 = vmatprep.mubr.bf16.mxu0 %v3967_v47 }
  0xe9   : > { %3247 = vmatprep.mubr.bf16.mxu1 %v4094_v10  ;;  %3276 = vmatpush3.bf16.msra.mxu1 %v3566_v7 }
  0xea   : > { %3277 = vmatprep.subr.bf16.mxu1 %v3567_v29 }
  0xed   : > { %3278 = vmatpush3.bf16.msra.mxu1 %v3567_v29 }
  0xef   : > { %2044 = vmatmul.mubr.bf16.gmra.mrb[96].mxu0 %v4058_v54 }
  0xf0   : > { %3248 = vmatmul.mubr.bf16.gmra.mrb[0].mxu1 %v3780_v62  ;;  %2051 = vmatprep.mubr.bf16.mxu0 %v4006_v11 }
  0xf1   : > { %3251 = vmatprep.mubr.bf16.mxu1 %v3793_v5 }
  0xf7   : > { %2052 = vmatmul.mubr.bf16.gmra.mrb[100].mxu0 %v4090_v57 }
  0xf8   : > { %3252 = vmatmul.mubr.bf16.gmra.mrb[4].mxu1 %v3841_v46  ;;  %2059 = vmatprep.mubr.bf16.mxu0 %v4048_v45 }
  0xf9   : > { %3255 = vmatprep.mubr.bf16.mxu1 %v3852_v4 }
  0xff   : > { %2060 = vmatmul.mubr.bf16.gmra.mrb[104].mxu0 %v4108_v37 }
 0x100   : > { %3256 = vmatmul.mubr.bf16.gmra.mrb[8].mxu1 %v3897_v28  ;;  %2067 = vmatprep.mubr.bf16.mxu0 %v3732_v30 }
 0x101   : > { %3259 = vmatprep.mubr.bf16.mxu1 %v3911_v33 }
 0x102   : > { %v2775_v12 = vpop.f32.mrb[0].mxu0 }
 0x103   : > { %v2776_v31 = vpop.f32.mrb[1].mxu0 }
 0x104   : > { %v4266_v13 = vadd.f32 %v2776_v31, %v2775_v12  ;;  %v2778_v47 = vpop.f32.mrb[2].mxu0 }
 0x105   : > { %v2779_v11 = vpop.f32.mrb[3].mxu0 }
 0x106   : > { %v4268_v19 = vadd.f32 %v2779_v11, %v2778_v47 }
 0x107   : > { %2068 = vmatmul.mubr.bf16.gmra.mrb[108].mxu0 %v3814_v24 }
 0x108   : > { %3260 = vmatmul.mubr.bf16.gmra.mrb[12].mxu1 %v3949_v22  ;;  %2075 = vmatprep.mubr.bf16.mxu0 %v3738_v34 }
 0x109   : > { %3279 = vmatprep.mubr.bf16.mxu1 %v4016_v18 }
 0x10a   : > { %v2781_v45 = vpop.f32.mrb[4].mxu0 }
 0x10b   : > { %v2782_v30 = vpop.f32.mrb[5].mxu0 }
 0x10c   : > { %v4274_v54 = vadd.f32 %v2782_v30, %v2781_v45  ;;  %v2784_v57 = vpop.f32.mrb[6].mxu0 }
 0x10d   : > { %v2785_v37 = vpop.f32.mrb[7].mxu0 }
 0x10e   : > { %v4276_v43 = vadd.f32 %v2785_v37, %v2784_v57 }
 0x10f   : > { %2076 = vmatmul.mubr.bf16.gmra.mrb[112].mxu0 %v3826_v35 }
 0x110   : > { %3280 = vmatmul.mubr.bf16.vlgmr.msra.gmra.mrb[80].mxu1 %v4052_v26  ;;  %2083 = vmatprep.mubr.bf16.mxu0 %v3775_v59 }
 0x111   : > { %3283 = vmatprep.mubr.bf16.mxu1 %v4062_v44 }
 0x112   : > { %v2787_v24 = vpop.f32.mrb[8].mxu0 }
 0x113   : > { %v2788_v34 = vpop.f32.mrb[9].mxu0 }
 0x114   : > { %v4282_v40 = vadd.f32 %v2788_v34, %v2787_v24  ;;  %v2790_v18 = vpop.f32.mrb[10].mxu0 }
 0x115   : > { %v2791_v8 = vpop.f32.mrb[11].mxu0 }
 0x116   : > { %v4284_v36 = vadd.f32 %v2791_v8, %v2790_v18 }
 0x117   : > { %2084 = vmatmul.mubr.bf16.gmra.mrb[116].mxu0 %v3883_v15 }
 0x118   : > { %3284 = vmatmul.mubr.bf16.gmra.mrb[84].mxu1 %v4067_v56  ;;  %2091 = vmatprep.mubr.bf16.mxu0 %v3787_v3 }
 0x119   : > { %3287 = vmatprep.mubr.bf16.mxu1 %v4074_v20 }
 0x11a   : > { %v2793_v35 = vpop.f32.mrb[12].mxu0 }
 0x11b   : > { %v2794_v59 = vpop.f32.mrb[13].mxu0 }
 0x11c   : > { %v4290_v26 = vadd.f32 %v2794_v59, %v2793_v35  ;;  %v2796_v44 = vpop.f32.mrb[14].mxu0 }
 0x11d   : > { %v2797_v49 = vpop.f32.mrb[15].mxu0 }
 0x11e   : > { %v4292_v23 = vadd.f32 %v2797_v49, %v2796_v44 }
 0x11f   : > { %2092 = vmatmul.mubr.bf16.gmra.mrb[120].mxu0 %v3887_v17 }
 0x120   : > { %3288 = vmatmul.mubr.bf16.gmra.mrb[88].mxu1 %v4086_v53  ;;  %2099 = vmatprep.mubr.bf16.mxu0 %v3834_v42 }
 0x121   : > { %3291 = vmatprep.mubr.bf16.mxu1 %v4094_v10 }
 0x122   : > { %v2799_v15 = vpop.f32.mrb[16].mxu0 }
 0x123   : > { %v2911_v3 = vpop.f32.mrb[16].mxu1  ;;  %v2800_v56 = vpop.f32.mrb[17].mxu0 }
 0x124   : > { %v4298_v20 = vadd.f32 %v2800_v56, %v2799_v15  ;;  %v2912_v52 = vpop.f32.mrb[17].mxu1  ;;  %v2802_v60 = vpop.f32.mrb[18].mxu0 }
 0x125   : > { %v4300_v61 = vadd.f32 %v2912_v52, %v2911_v3  ;;  %v2914_v63 = vpop.f32.mrb[18].mxu1  ;;  %v2803_v38 = vpop.f32.mrb[19].mxu0 }
 0x126   : > { %v4302_v55 = vadd.f32 %v2803_v38, %v2802_v60  ;;  %v2915_v17 = vpop.f32.mrb[19].mxu1 }
 0x127   : > { %v4304_v27 = vadd.f32 %v2915_v17, %v2914_v63  ;;  %2100 = vmatmul.mubr.bf16.gmra.mrb[124].mxu0 %v3938_v6 }
 0x128   : > { %3292 = vmatmul.mubr.bf16.gmra.mrb[92].mxu1 %v3780_v62  ;;  %2107 = vmatprep.mubr.bf16.mxu0 %v3846_v48 }
 0x129   : > { %3295 = vmatprep.mubr.bf16.mxu1 %v3793_v5 }
 0x12a   : > { %v2805_v42 = vpop.f32.mrb[20].mxu0 }
 0x12b   : > { %v2917_v53 = vpop.f32.mrb[20].mxu1  ;;  %v2806_v10 = vpop.f32.mrb[21].mxu0 }
 0x12c   : > { %v4310_v25 = vadd.f32 %v2806_v10, %v2805_v42  ;;  %v2918_v0 = vpop.f32.mrb[21].mxu1  ;;  %v2808_v21 = vpop.f32.mrb[22].mxu0 }
 0x12d   : > { %v4312_v51 = vadd.f32 %v2918_v0, %v2917_v53  ;;  %v2920_v16 = vpop.f32.mrb[22].mxu1  ;;  %v2809_v39 = vpop.f32.mrb[23].mxu0 }
 0x12e   : > { %v4314_v41 = vadd.f32 %v2809_v39, %v2808_v21  ;;  %v2921_v6 = vpop.f32.mrb[23].mxu1 }
 0x12f   : > { %v4316_v7 = vadd.f32 %v2921_v6, %v2920_v16  ;;  %2108 = vmatmul.mubr.bf16.gmra.mrb[128].mxu0 %v3978_v50 }
 0x130   : > { %3296 = vmatmul.mubr.bf16.gmra.mrb[0].mxu1 %v3841_v46  ;;  %2115 = vmatprep.mubr.bf16.mxu0 %v3891_v1 }
 0x131   : > { %3299 = vmatprep.mubr.bf16.mxu1 %v3852_v4 }
 0x132   : > { %v2811_v62 = vpop.f32.mrb[24].mxu0 }
 0x133   : > { %v2923_v5 = vpop.f32.mrb[24].mxu1  ;;  %v2812_v48 = vpop.f32.mrb[25].mxu0 }
 0x134   : > { %v4322_v29 = vadd.f32 %v2812_v48, %v2811_v62  ;;  %v2924_v12 = vpop.f32.mrb[25].mxu1  ;;  %v2814_v31 = vpop.f32.mrb[26].mxu0 }
 0x135   : > { %v4324_v47 = vadd.f32 %v2924_v12, %v2923_v5  ;;  %v2926_v11 = vpop.f32.mrb[26].mxu1  ;;  %v2815_v45 = vpop.f32.mrb[27].mxu0 }
 0x136   : > { %v4326_v30 = vadd.f32 %v2815_v45, %v2814_v31  ;;  %v2927_v50 = vpop.f32.mrb[27].mxu1 }
 0x137   : > { %v4328_v57 = vadd.f32 %v2927_v50, %v2926_v11  ;;  %2116 = vmatmul.mubr.bf16.gmra.mrb[132].mxu0 %v4004_v9 }
 0x138   : > { %3300 = vmatmul.mubr.bf16.gmra.mrb[4].mxu1 %v3897_v28  ;;  %2123 = vmatprep.mubr.bf16.mxu0 %v3906_v32 }
 0x139   : > { %3303 = vmatprep.mubr.bf16.mxu1 %v3911_v33 }
 0x13a   : > { %v2817_v46 = vpop.f32.mrb[28].mxu0 }
 0x13b   : > { %v2929_v4 = vpop.f32.mrb[28].mxu1  ;;  %v2818_v1 = vpop.f32.mrb[29].mxu0 }
 0x13c   : > { %v4334_v37 = vadd.f32 %v2818_v1, %v2817_v46  ;;  %v2930_v24 = vpop.f32.mrb[29].mxu1  ;;  %v2820_v34 = vpop.f32.mrb[30].mxu0 }
 0x13d   : > { %v4336_v18 = vadd.f32 %v2930_v24, %v2929_v4  ;;  %v2932_v8 = vpop.f32.mrb[30].mxu1  ;;  %v2821_v35 = vpop.f32.mrb[31].mxu0 }
 0x13e   : > { %v4338_v59 = vadd.f32 %v2821_v35, %v2820_v34  ;;  %v2933_v9 = vpop.f32.mrb[31].mxu1 }
 0x13f   : > { %v4340_v44 = vadd.f32 %v2933_v9, %v2932_v8  ;;  %2124 = vmatmul.mubr.bf16.gmra.mrb[136].mxu0 %v4011_v14 }
 0x140   : > { %3304 = vmatmul.mubr.bf16.gmra.mrb[8].mxu1 %v3949_v22  ;;  %2131 = vmatprep.mubr.bf16.mxu0 %v3576_v2 }
 0x141   : > { %3307 = vmatprep.mubr.bf16.mxu1 %v3971_v58 }
 0x142   : > { %v2823_v28 = vpop.f32.mrb[32].mxu0 }
 0x143   : > { %v2935_v32 = vpop.f32.mrb[32].mxu1  ;;  %v2824_v33 = vpop.f32.mrb[33].mxu0 }
 0x144   : > { %v2825_v49 = vadd.f32 %v2824_v33, %v2823_v28  ;;  %v2936_v15 = vpop.f32.mrb[33].mxu1  ;;  %v2826_v3 = vpop.f32.mrb[34].mxu0 }
 0x145   : > { %v4346_v56 = vadd.f32 %v2936_v15, %v2935_v32  ;;  %v2938_v52 = vpop.f32.mrb[34].mxu1  ;;  %v2827_v60 = vpop.f32.mrb[35].mxu0 }
 0x146   : > { %v2828_v63 = vadd.f32 %v2827_v60, %v2826_v3  ;;  %v2939_v38 = vpop.f32.mrb[35].mxu1 }
 0x147   : > { %v4348_v17 = vadd.f32 %v2939_v38, %v2938_v52  ;;  %2132 = vmatmul.mubr.bf16.gmra.mrb[140].mxu0 %v3576_v2 }
 0x148   : > { %3308 = vmatmul.mubr.bf16.gmra.mrb[12].mxu1 %v3576_v2 }
 0x14a   : > { %v2829_v22 = vpop.f32.mrb[36].mxu0 }
 0x14b   : > { %v2941_v58 = vpop.f32.mrb[36].mxu1  ;;  %v2830_v14 = vpop.f32.mrb[37].mxu0 }
 0x14c   : > { %v2831_v42 = vadd.f32 %v2830_v14, %v2829_v22  ;;  %v2942_v53 = vpop.f32.mrb[37].mxu1  ;;  %v2832_v10 = vpop.f32.mrb[38].mxu0 }
 0x14d   : > { %v4352_v0 = vadd.f32 %v2942_v53, %v2941_v58  ;;  %v2944_v21 = vpop.f32.mrb[38].mxu1  ;;  %v2833_v16 = vpop.f32.mrb[39].mxu0 }
 0x14e   : > { %v2834_v39 = vadd.f32 %v2833_v16, %v2832_v10  ;;  %v2945_v6 = vpop.f32.mrb[39].mxu1 }
 0x14f   : > { %v4354_v62 = vadd.f32 %v2945_v6, %v2944_v21 }
 0x152   : > { %v2835_v5 = vpop.f32.mrb[40].mxu0 }
 0x153   : > { %v2947_v48 = vpop.f32.mrb[40].mxu1  ;;  %v2836_v12 = vpop.f32.mrb[41].mxu0 }
 0x154   : > { %v2837_v31 = vadd.f32 %v2836_v12, %v2835_v5  ;;  %v2948_v11 = vpop.f32.mrb[41].mxu1  ;;  %v2838_v2 = vpop.f32.mrb[42].mxu0 }
 0x155   : > { %v4356_v45 = vadd.f32 %v2948_v11, %v2947_v48  ;;  %v2950_v50 = vpop.f32.mrb[42].mxu1  ;;  %v2839_v46 = vpop.f32.mrb[43].mxu0 }
 0x156   : > { %v2840_v4 = vadd.f32 %v2839_v46, %v2838_v2  ;;  %v2951_v1 = vpop.f32.mrb[43].mxu1 }
 0x157   : > { %v4358_v24 = vadd.f32 %v2951_v1, %v2950_v50 }
 0x15a   : > { %v2841_v34 = vpop.f32.mrb[44].mxu0 }
 0x15b   : > { %v2953_v8 = vpop.f32.mrb[44].mxu1  ;;  %v2842_v35 = vpop.f32.mrb[45].mxu0 }
 0x15c   : > { %v2843_v9 = vadd.f32 %v2842_v35, %v2841_v34  ;;  %v2954_v28 = vpop.f32.mrb[45].mxu1  ;;  %v2844_v32 = vpop.f32.mrb[46].mxu0 }
 0x15d   : > { %v4360_v33 = vadd.f32 %v2954_v28, %v2953_v8  ;;  %v2956_v15 = vpop.f32.mrb[46].mxu1  ;;  %v2845_v3 = vpop.f32.mrb[47].mxu0 }
 0x15e   : > { %v2846_v52 = vadd.f32 %v2845_v3, %v2844_v32  ;;  %v2957_v60 = vpop.f32.mrb[47].mxu1 }
 0x15f   : > { %v4362_v38 = vadd.f32 %v2957_v60, %v2956_v15 }
 0x162   : > { %v2847_v22 = vpop.f32.mrb[48].mxu0 }
 0x163   : > { %v2959_v58 = vpop.f32.mrb[48].mxu1  ;;  %v2848_v14 = vpop.f32.mrb[49].mxu0 }
 0x164   : > { %v4364_v53 = vadd.f32 %v2848_v14, %v2847_v22  ;;  %v2960_v10 = vpop.f32.mrb[49].mxu1  ;;  %v2850_v21 = vpop.f32.mrb[50].mxu0 }
 0x165   : > { %v2961_v16 = vadd.f32 %v2960_v10, %v2959_v58  ;;  %v2962_v6 = vpop.f32.mrb[50].mxu1  ;;  %v2851_v5 = vpop.f32.mrb[51].mxu0 }
 0x166   : > { %v4366_v48 = vadd.f32 %v2851_v5, %v2850_v21  ;;  %v2963_v12 = vpop.f32.mrb[51].mxu1 }
 0x167   : > { %v4368_v11 = vadd.f32 %v2961_v16, %v2825_v49  ;;  %v2964_v2 = vadd.f32 %v2963_v12, %v2962_v6 }
 0x169   : > { %v4370_v50 = vadd.f32 %v2964_v2, %v2828_v63 }
 0x16a   : > { %v2853_v46 = vpop.f32.mrb[52].mxu0 }
 0x16b   : > { %v2965_v1 = vpop.f32.mrb[52].mxu1  ;;  %v2854_v34 = vpop.f32.mrb[53].mxu0 }
 0x16c   : > { %v4372_v8 = vadd.f32 %v2854_v34, %v2853_v46  ;;  %v2966_v35 = vpop.f32.mrb[53].mxu1  ;;  %v2856_v28 = vpop.f32.mrb[54].mxu0 }
 0x16d   : > { %v2967_v32 = vadd.f32 %v2966_v35, %v2965_v1  ;;  %v2968_v15 = vpop.f32.mrb[54].mxu1  ;;  %v2857_v3 = vpop.f32.mrb[55].mxu0 }
 0x16e   : > { %v4374_v60 = vadd.f32 %v2857_v3, %v2856_v28  ;;  %v2969_v22 = vpop.f32.mrb[55].mxu1 }
 0x16f   : > { %v4376_v58 = vadd.f32 %v2967_v32, %v2831_v42  ;;  %v2970_v49 = vadd.f32 %v2969_v22, %v2968_v15 }
 0x171   : > { %v4378_v14 = vadd.f32 %v2970_v49, %v2834_v39 }
 0x172   : > { %v2859_v63 = vpop.f32.mrb[56].mxu0 }
 0x173   : > { %v2971_v10 = vpop.f32.mrb[56].mxu1  ;;  %v2860_v21 = vpop.f32.mrb[57].mxu0 }
 0x174   : > { %v4380_v16 = vadd.f32 %v2860_v21, %v2859_v63  ;;  %v2972_v6 = vpop.f32.mrb[57].mxu1  ;;  %v2862_v5 = vpop.f32.mrb[58].mxu0 }
 0x175   : > { %v2973_v12 = vadd.f32 %v2972_v6, %v2971_v10  ;;  %v2974_v2 = vpop.f32.mrb[58].mxu1  ;;  %v2863_v46 = vpop.f32.mrb[59].mxu0 }
 0x176   : > { %v4382_v1 = vadd.f32 %v2863_v46, %v2862_v5  ;;  %v2975_v34 = vpop.f32.mrb[59].mxu1 }
 0x177   : > { %v4384_v35 = vadd.f32 %v2973_v12, %v2837_v31  ;;  %v2976_v42 = vadd.f32 %v2975_v34, %v2974_v2 }
 0x179   : > { %v4386_v28 = vadd.f32 %v2976_v42, %v2840_v4 }
 0x17a   : > { %v2865_v39 = vpop.f32.mrb[60].mxu0 }
 0x17b   : > { %4626 = vst [vmem:[#allocation3_spill] sm:$0xff] %v4386_v28  ;;  %v2977_v32 = vpop.f32.mrb[60].mxu1  ;;  %v2866_v15 = vpop.f32.mrb[61].mxu0 }
 0x17c   : > { %v4388_v3 = vadd.f32 %v2866_v15, %v2865_v39  ;;  %v2978_v22 = vpop.f32.mrb[61].mxu1  ;;  %v2868_v49 = vpop.f32.mrb[62].mxu0 }
 0x17d   : > { %v2979_v63 = vadd.f32 %v2978_v22, %v2977_v32  ;;  %v2980_v21 = vpop.f32.mrb[62].mxu1  ;;  %v2869_v10 = vpop.f32.mrb[63].mxu0 }
 0x17e   : > { %v4390_v6 = vadd.f32 %v2869_v10, %v2868_v49  ;;  %v2981_v5 = vpop.f32.mrb[63].mxu1 }
 0x17f   : > { %v4392_v46 = vadd.f32 %v2979_v63, %v2843_v9  ;;  %v2982_v31 = vadd.f32 %v2981_v5, %v2980_v21 }
 0x181   : > { %v4394_v12 = vadd.f32 %v2982_v31, %v2846_v52 }
 0x182   : > { %v3185_v4 = vpop.f32.mrb[64].mxu0 }
 0x183   : > { %v1153_v2 = vadd.f32 %v3185_v4, %v4274_v54  ;;  %v2983_v34 = vpop.f32.mrb[64].mxu1  ;;  %v1144_v42 = vpop.f32.mrb[65].mxu0 }
 0x184   : > { %v1145_v39 = vadd.f32 %v4266_v13, %v1144_v42  ;;  %v2984_v15 = vpop.f32.mrb[65].mxu1  ;;  %v3186_v28 = vpop.f32.mrb[66].mxu0 }
 0x185   : > { %v4399_v32 = vadd.f32 %v4312_v51, %v1153_v2  ;;  %v2985_v22 = vadd.f32 %v2984_v15, %v2983_v34  ;;  %v1156_v49 = vadd.f32 %v3186_v28, %v4276_v43  ;;  %v2986_v9 = vpop.f32.mrb[66].mxu1  ;;  %v1147_v63 = vpop.f32.mrb[67].mxu0 }
 0x186   : > { %v4403_v52 = vadd.f32 %v4300_v61, %v1145_v39  ;;  %v1148_v21 = vadd.f32 %v4268_v19, %v1147_v63  ;;  %v2987_v54 = vpop.f32.mrb[67].mxu1 }
 0x187   : > { %v4407_v10 = vadd.f32 %v2985_v22, %v4364_v53  ;;  %v4410_v13 = vadd.f32 %v4316_v7, %v1156_v49  ;;  %v2988_v5 = vadd.f32 %v2987_v54, %v2986_v9 }
 0x188   : > { %v4413_v51 = vadd.f32 %v4304_v27, %v1148_v21 }
 0x189   : > { %v4416_v43 = vadd.f32 %v2988_v5, %v4366_v48 }
 0x18a   : > { %v3189_v28 = vpop.f32.mrb[68].mxu0 }
 0x18b   : > { %v1169_v61 = vadd.f32 %v3189_v28, %v4290_v26  ;;  %v2989_v31 = vpop.f32.mrb[68].mxu1  ;;  %v1160_v4 = vpop.f32.mrb[69].mxu0 }
 0x18c   : > { %v1161_v19 = vadd.f32 %v4282_v40, %v1160_v4  ;;  %v2990_v2 = vpop.f32.mrb[69].mxu1  ;;  %v3190_v53 = vpop.f32.mrb[70].mxu0 }
 0x18d   : > { %v4421_v34 = vadd.f32 %v4336_v18, %v1169_v61  ;;  %v2991_v7 = vadd.f32 %v2990_v2, %v2989_v31  ;;  %v1172_v42 = vadd.f32 %v3190_v53, %v4292_v23  ;;  %v2992_v27 = vpop.f32.mrb[70].mxu1  ;;  %v1163_v39 = vpop.f32.mrb[71].mxu0 }
 0x18e   : > { %v4425_v48 = vadd.f32 %v4324_v47, %v1161_v19  ;;  %v1164_v15 = vadd.f32 %v4284_v36, %v1163_v39  ;;  %v2993_v26 = vpop.f32.mrb[71].mxu1 }
 0x18f   : > { %v4429_v22 = vadd.f32 %v2991_v7, %v4372_v8  ;;  %v4432_v40 = vadd.f32 %v4340_v44, %v1172_v42  ;;  %v2994_v49 = vadd.f32 %v2993_v26, %v2992_v27 }
 0x190   : > { %v4435_v18 = vadd.f32 %v4328_v57, %v1164_v15 }
 0x191   : > { %v4438_v23 = vadd.f32 %v2994_v49, %v4374_v60 }
 0x192   : > { %v3193_v9 = vpop.f32.mrb[72].mxu0 }
 0x193   : > { %v1185_v47 = vadd.f32 %v3193_v9, %v4310_v25  ;;  %v2995_v63 = vpop.f32.mrb[72].mxu1  ;;  %v1176_v21 = vpop.f32.mrb[73].mxu0 }
 0x194   : > { %v1177_v36 = vadd.f32 %v4298_v20, %v1176_v21  ;;  %v2996_v54 = vpop.f32.mrb[73].mxu1  ;;  %v3194_v8 = vpop.f32.mrb[74].mxu0 }
 0x195   : > { %v4443_v5 = vadd.f32 %v4352_v0, %v1185_v47  ;;  %v2997_v44 = vadd.f32 %v2996_v54, %v2995_v63  ;;  %v1188_v28 = vadd.f32 %v3194_v8, %v4314_v41  ;;  %v2998_v57 = vpop.f32.mrb[74].mxu1  ;;  %v1179_v61 = vpop.f32.mrb[75].mxu0 }
 0x196   : > { %v4447_v60 = vadd.f32 %v4346_v56, %v1177_v36  ;;  %v1180_v31 = vadd.f32 %v4302_v55, %v1179_v61  ;;  %v2999_v25 = vpop.f32.mrb[75].mxu1 }
 0x197   : > { %v4451_v4 = vadd.f32 %v2997_v44, %v4380_v16  ;;  %v4454_v20 = vadd.f32 %v4354_v62, %v1188_v28  ;;  %v3000_v19 = vadd.f32 %v2999_v25, %v2998_v57 }
 0x198   : > { %v1485_v0 = vadd.f32 %v4348_v17, %v1180_v31 }
 0x199   : > { %v4458_v2 = vadd.f32 %v3000_v19, %v4382_v1 }
 0x19a   : > { %v3197_v41 = vpop.f32.mrb[76].mxu0 }
 0x19b   : > { %v1201_v53 = vadd.f32 %v3197_v41, %v4334_v37  ;;  %v3001_v56 = vpop.f32.mrb[76].mxu1  ;;  %v1192_v7 = vpop.f32.mrb[77].mxu0 }
 0x19c   : > { %v1193_v55 = vadd.f32 %v4322_v29, %v1192_v7  ;;  %v3002_v42 = vpop.f32.mrb[77].mxu1  ;;  %v3198_v27 = vpop.f32.mrb[78].mxu0 }
 0x19d   : > { %v4463_v16 = vadd.f32 %v4360_v33, %v1201_v53  ;;  %v3003_v62 = vadd.f32 %v3002_v42, %v3001_v56  ;;  %v1204_v39 = vadd.f32 %v3198_v27, %v4338_v59  ;;  %v3004_v15 = vpop.f32.mrb[78].mxu1  ;;  %v1195_v17 = vpop.f32.mrb[79].mxu0 }
 0x19e   : > { %v1498_v1 = vadd.f32 %v4356_v45, %v1193_v55  ;;  %v1196_v26 = vadd.f32 %v4326_v30, %v1195_v17  ;;  %v3005_v49 = vpop.f32.mrb[79].mxu1 }
 0x19f   : > { %v4469_v37 = vadd.f32 %v3003_v62, %v4388_v3  ;;  %v4472_v29 = vadd.f32 %v4362_v38, %v1204_v39  ;;  %v3006_v9 = vadd.f32 %v3005_v49, %v3004_v15 }
 0x1a0   : > { %v1501_v33 = vadd.f32 %v4358_v24, %v1196_v26 }
 0x1a1   : > { %v4476_v47 = vadd.f32 %v3006_v9, %v4390_v6 }
 0x1a2   : > { %v3047_v59 = vpop.f32.mrb[80].mxu0 }
 0x1a3   : > { %v3048_v63 = vpop.f32.mrb[81].mxu0 }
 0x1a4   : > { %v3049_v21 = vadd.f32 %v3048_v63, %v3047_v59  ;;  %v3050_v36 = vpop.f32.mrb[82].mxu0 }
 0x1a5   : > { %v3051_v45 = vpop.f32.mrb[83].mxu0 }
 0x1a6   : > { %v3052_v54 = vadd.f32 %v3051_v45, %v3050_v36  ;;  %v4479_v30 = vadd.f32 %v3049_v21, %v4403_v52 }
 0x1a8   : > { %v4482_v3 = vadd.f32 %v3052_v54, %v4413_v51 }
 0x1aa   : > { %v3053_v38 = vpop.f32.mrb[84].mxu0 }
 0x1ab   : > { %v3054_v8 = vpop.f32.mrb[85].mxu0 }
 0x1ac   : > { %v3055_v44 = vadd.f32 %v3054_v8, %v3053_v38  ;;  %v3056_v28 = vpop.f32.mrb[86].mxu0 }
 0x1ad   : > { %v3057_v24 = vpop.f32.mrb[87].mxu0 }
 0x1ae   : > { %v3058_v57 = vadd.f32 %v3057_v24, %v3056_v28  ;;  %v3329_v6 = vadd.f32 %v3055_v44, %v4399_v32 }
 0x1b0   : > { %v3337_v61 = vadd.f32 %v3058_v57, %v4410_v13 }
 0x1b2   : > { %v3059_v31 = vpop.f32.mrb[88].mxu0 }
 0x1b3   : > { %v3060_v25 = vpop.f32.mrb[89].mxu0 }
 0x1b4   : > { %v3061_v19 = vadd.f32 %v3060_v25, %v3059_v31  ;;  %v3062_v41 = vpop.f32.mrb[90].mxu0 }
 0x1b5   : > { %v3063_v53 = vpop.f32.mrb[91].mxu0 }
 0x1b6   : > { %v3064_v52 = vadd.f32 %v3063_v53, %v3062_v41  ;;  %v4487_v56 = vadd.f32 %v3061_v19, %v4425_v48 }
 0x1b8   : > { %v4490_v51 = vadd.f32 %v3064_v52, %v4435_v18 }
 0x1ba   : > { %v3065_v7 = vpop.f32.mrb[92].mxu0 }
 0x1bb   : > { %v3066_v55 = vpop.f32.mrb[93].mxu0 }
 0x1bc   : > { %v3067_v42 = vadd.f32 %v3066_v55, %v3065_v7  ;;  %v3068_v27 = vpop.f32.mrb[94].mxu0 }
 0x1bd   : > { %v3069_v62 = vpop.f32.mrb[95].mxu0 }
 0x1be   : > { %v3070_v32 = vadd.f32 %v3069_v62, %v3068_v27  ;;  %v4493_v13 = vadd.f32 %v3067_v42, %v4421_v34 }
 0x1c0   : > { %v4496_v39 = vadd.f32 %v3070_v32, %v4432_v40 }
 0x1c2   : > { %v3071_v15 = vpop.f32.mrb[96].mxu0 }
 0x1c3   : > { %v3072_v17 = vpop.f32.mrb[97].mxu0 }
 0x1c4   : > { %v3073_v26 = vadd.f32 %v3072_v17, %v3071_v15  ;;  %v3074_v48 = vpop.f32.mrb[98].mxu0 }
 0x1c5   : > { %v3075_v49 = vpop.f32.mrb[99].mxu0 }
 0x1c6   : > { %v3076_v9 = vadd.f32 %v3075_v49, %v3074_v48  ;;  %v4499_v18 = vadd.f32 %v3073_v26, %v4447_v60 }
 0x1c8   : > { %v4501_v59 = vadd.f32 %v3076_v9, %v1485_v0 }
 0x1ca   : > { %v3077_v63 = vpop.f32.mrb[100].mxu0 }
 0x1cb   : > { %v3078_v21 = vpop.f32.mrb[101].mxu0 }
 0x1cc   : > { %v3079_v36 = vadd.f32 %v3078_v21, %v3077_v63  ;;  %v3080_v45 = vpop.f32.mrb[102].mxu0 }
 0x1cd   : > { %v3081_v34 = vpop.f32.mrb[103].mxu0 }
 0x1ce   : > { %v3082_v54 = vadd.f32 %v3081_v34, %v3080_v45  ;;  %v4504_v40 = vadd.f32 %v3079_v36, %v4443_v5 }
 0x1d0   : > { %v4507_v38 = vadd.f32 %v3082_v54, %v4454_v20 }
 0x1d2   : > { %v3083_v8 = vpop.f32.mrb[104].mxu0 }
 0x1d3   : > { %v3084_v44 = vpop.f32.mrb[105].mxu0 }
 0x1d4   : > { %v3085_v28 = vadd.f32 %v3084_v44, %v3083_v8  ;;  %v3086_v60 = vpop.f32.mrb[106].mxu0 }
 0x1d5   : > { %v3087_v24 = vpop.f32.mrb[107].mxu0 }
 0x1d6   : > { %v3088_v0 = vadd.f32 %v3087_v24, %v3086_v60  ;;  %v4509_v57 = vadd.f32 %v3085_v28, %v1498_v1 }
 0x1d8   : > { %v4511_v31 = vadd.f32 %v3088_v0, %v1501_v33 }
 0x1da   : > { %v3089_v25 = vpop.f32.mrb[108].mxu0 }
 0x1db   : > { %v3090_v19 = vpop.f32.mrb[109].mxu0 }
 0x1dc   : > { %v3091_v41 = vadd.f32 %v3090_v19, %v3089_v25  ;;  %v3092_v53 = vpop.f32.mrb[110].mxu0 }
 0x1dd   : > { %v3093_v5 = vpop.f32.mrb[111].mxu0 }
 0x1de   : > { %v3094_v52 = vadd.f32 %v3093_v5, %v3092_v53  ;;  %v4514_v20 = vadd.f32 %v3091_v41, %v4463_v16 }
 0x1e0   : > { %v4517_v7 = vadd.f32 %v3094_v52, %v4472_v29 }
 0x1e2   : > { %v3095_v55 = vpop.f32.mrb[112].mxu0 }
 0x1e3   : > { %v3281_v1 = vpop.f32.mrb[80].mxu1  ;;  %v3096_v33 = vpop.f32.mrb[113].mxu0 }
 0x1e4   : > { %v3330_v42 = vadd.f32 %v3329_v6, %v3281_v1  ;;  %v3097_v27 = vadd.f32 %v3096_v33, %v3095_v55  ;;  %v2174_v16 = vpop.f32.mrb[81].mxu1  ;;  %v3098_v62 = vpop.f32.mrb[114].mxu0 }
 0x1e5   : > { %v3334_v29 = vadd.f32 %v4479_v30, %v2174_v16  ;;  %v3282_v32 = vpop.f32.mrb[82].mxu1  ;;  %v3099_v15 = vpop.f32.mrb[115].mxu0 }
 0x1e6   : > { %2335 = vst [vmem:[%s4524_s29 + $0x10] sm:$0xff] %v3330_v42  ;;  %v3338_v17 = vadd.f32 %v3337_v61, %v3282_v32  ;;  %v3100_v26 = vadd.f32 %v3099_v15, %v3098_v62  ;;  %v2177_v48 = vpop.f32.mrb[83].mxu1  ;;  %v4529_v49 = vadd.f32 %v4368_v11, %v3097_v27  ;;  %v2405_v45 = vmul.f32 %v3330_v42, %v3330_v42 }
 0x1e7   : > { %2333 = vst [vmem:[%s4524_s29] sm:$0xff] %v3334_v29  ;;  %v3342_v9 = vadd.f32 %v4482_v3, %v2177_v48  ;;  %v2403_v63 = vmul.f32 %v3334_v29, %v3334_v29 }
 0x1e8   : > { %2336 = vst [vmem:[%s4524_s29 + $0x18] sm:$0xff] %v3338_v17  ;;  %v4535_v6 = vadd.f32 %v4370_v50, %v3100_v26  ;;  %v2406_v60 = vmul.f32 %v3338_v17, %v3338_v17 }
 0x1e9   : > { %2334 = vst [vmem:[%s4524_s29 + $0x8] sm:$0xff] %v3342_v9  ;;  %v2365_v21 = vadd.f32 %v3342_v9, %v3334_v29  ;;  %v2404_v30 = vmul.f32 %v3342_v9, %v3342_v9 }
 0x1ea   : > { %v3101_v36 = vpop.f32.mrb[116].mxu0 }
 0x1eb   : > { %v2366_v61 = vadd.f32 %v3330_v42, %v2365_v21  ;;  %v2435_v34 = vadd.f32 %v2404_v30, %v2403_v63  ;;  %v3285_v54 = vpop.f32.mrb[84].mxu1  ;;  %v3102_v8 = vpop.f32.mrb[117].mxu0 }
 0x1ec   : > { %v3346_v11 = vadd.f32 %v4493_v13, %v3285_v54  ;;  %v3103_v44 = vadd.f32 %v3102_v8, %v3101_v36  ;;  %v2190_v3 = vpop.f32.mrb[85].mxu1  ;;  %v3104_v28 = vpop.f32.mrb[118].mxu0 }
 0x1ed   : > { %v2436_v50 = vadd.f32 %v2435_v34, %v2405_v45  ;;  %v3350_v24 = vadd.f32 %v4487_v56, %v2190_v3  ;;  %v2367_v0 = vadd.f32 %v3338_v17, %v2366_v61  ;;  %v3286_v25 = vpop.f32.mrb[86].mxu1  ;;  %v3105_v19 = vpop.f32.mrb[119].mxu0 }
 0x1ee   : > { %2339 = vst [vmem:[%s4524_s29 + $0x30] sm:$0xff] %v3346_v11  ;;  %v3354_v41 = vadd.f32 %v4496_v39, %v3286_v25  ;;  %v3106_v53 = vadd.f32 %v3105_v19, %v3104_v28  ;;  %v2193_v5 = vpop.f32.mrb[87].mxu1  ;;  %v4543_v52 = vadd.f32 %v4376_v58, %v3103_v44  ;;  %v2409_v62 = vmul.f32 %v3346_v11, %v3346_v11 }
 0x1ef   : > { %2337 = vst [vmem:[%s4524_s29 + $0x20] sm:$0xff] %v3350_v24  ;;  %v2368_v13 = vadd.f32 %v3350_v24, %v2367_v0  ;;  %v2407_v55 = vmul.f32 %v3350_v24, %v3350_v24  ;;  %v2437_v1 = vadd.f32 %v2436_v50, %v2406_v60  ;;  %v3358_v33 = vadd.f32 %v4490_v51, %v2193_v5 }
 0x1f0   : > { %2340 = vst [vmem:[%s4524_s29 + $0x38] sm:$0xff] %v3354_v41  ;;  %v4549_v56 = vadd.f32 %v4378_v14, %v3106_v53  ;;  %v2410_v9 = vmul.f32 %v3354_v41, %v3354_v41 }
 0x1f1   : > { %v2438_v42 = vadd.f32 %v2437_v1, %v2407_v55  ;;  %2338 = vst [vmem:[%s4524_s29 + $0x28] sm:$0xff] %v3358_v33  ;;  %v2369_v27 = vadd.f32 %v3358_v33, %v2368_v13  ;;  %v2408_v16 = vmul.f32 %v3358_v33, %v3358_v33 }
 0x1f2   : > { %v3107_v39 = vpop.f32.mrb[120].mxu0 }
 0x1f3   : > { %v2370_v29 = vadd.f32 %v3346_v11, %v2369_v27  ;;  %v2439_v58 = vadd.f32 %v2438_v42, %v2408_v16  ;;  %v3289_v32 = vpop.f32.mrb[88].mxu1  ;;  %v3108_v15 = vpop.f32.mrb[121].mxu0 }
 0x1f4   : > { %v3362_v17 = vadd.f32 %v4504_v40, %v3289_v32  ;;  %v3109_v26 = vadd.f32 %v3108_v15, %v3107_v39  ;;  %v2206_v51 = vpop.f32.mrb[89].mxu1  ;;  %v3110_v48 = vpop.f32.mrb[122].mxu0 }
 0x1f5   : > { %v2440_v14 = vadd.f32 %v2439_v58, %v2409_v62  ;;  %v3366_v63 = vadd.f32 %v4499_v18, %v2206_v51  ;;  %v2371_v21 = vadd.f32 %v3354_v41, %v2370_v29  ;;  %v3290_v30 = vpop.f32.mrb[90].mxu1  ;;  %v3111_v36 = vpop.f32.mrb[123].mxu0  ;;  %v4627_v18 = vld [vmem:[#allocation3_spill] sm:$0xff] }
 0x1f6   : > { %2343 = vst [vmem:[%s4524_s29 + $0x50] sm:$0xff] %v3362_v17  ;;  %v3370_v45 = vadd.f32 %v4507_v38, %v3290_v30  ;;  %v3112_v61 = vadd.f32 %v3111_v36, %v3110_v48  ;;  %v2209_v34 = vpop.f32.mrb[91].mxu1  ;;  %v4557_v54 = vadd.f32 %v4384_v35, %v3109_v26  ;;  %v2413_v24 = vmul.f32 %v3362_v17, %v3362_v17 }
 0x1f7   : > { %2341 = vst [vmem:[%s4524_s29 + $0x40] sm:$0xff] %v3366_v63  ;;  %v2372_v40 = vadd.f32 %v3366_v63, %v2371_v21  ;;  %v2411_v8 = vmul.f32 %v3366_v63, %v3366_v63  ;;  %v2441_v11 = vadd.f32 %v2440_v14, %v2410_v9  ;;  %v3374_v44 = vadd.f32 %v4501_v59, %v2209_v34 }
 0x1f8   : > { %2344 = vst [vmem:[%s4524_s29 + $0x58] sm:$0xff] %v3370_v45  ;;  %v4563_v3 = vadd.f32 %v4627_v18, %v3112_v61  ;;  %v2414_v13 = vmul.f32 %v3370_v45, %v3370_v45 }
 0x1f9   : > { %v2442_v28 = vadd.f32 %v2441_v11, %v2411_v8  ;;  %2342 = vst [vmem:[%s4524_s29 + $0x48] sm:$0xff] %v3374_v44  ;;  %v2373_v60 = vadd.f32 %v3374_v44, %v2372_v40  ;;  %v2412_v50 = vmul.f32 %v3374_v44, %v3374_v44 }
 0x1fa   : > { %v3113_v38 = vpop.f32.mrb[124].mxu0 }
 0x1fb   : > { %v2374_v0 = vadd.f32 %v3362_v17, %v2373_v60  ;;  %v2443_v35 = vadd.f32 %v2442_v28, %v2412_v50  ;;  %v3293_v25 = vpop.f32.mrb[92].mxu1  ;;  %v3114_v19 = vpop.f32.mrb[125].mxu0 }
 0x1fc   : > { %v3378_v41 = vadd.f32 %v4514_v20, %v3293_v25  ;;  %v3115_v53 = vadd.f32 %v3114_v19, %v3113_v38  ;;  %v2222_v59 = vpop.f32.mrb[93].mxu1  ;;  %v3116_v5 = vpop.f32.mrb[126].mxu0 }
 0x1fd   : > { %v2444_v55 = vadd.f32 %v2443_v35, %v2413_v24  ;;  %v3382_v1 = vadd.f32 %v4509_v57, %v2222_v59  ;;  %v2375_v33 = vadd.f32 %v3370_v45, %v2374_v0  ;;  %v3294_v42 = vpop.f32.mrb[94].mxu1  ;;  %v3117_v27 = vpop.f32.mrb[127].mxu0 }
 0x1fe   : > { %2347 = vst [vmem:[%s4524_s29 + $0x70] sm:$0xff] %v3378_v41  ;;  %v3386_v16 = vadd.f32 %v4517_v7, %v3294_v42  ;;  %v3118_v39 = vadd.f32 %v3117_v27, %v3116_v5  ;;  %v2225_v62 = vpop.f32.mrb[95].mxu1  ;;  %v3404_v29 = vadd.f32 %v4392_v46, %v3115_v53  ;;  %v2417_v7 = vmul.f32 %v3378_v41, %v3378_v41 }
 0x1ff   : > { %2345 = vst [vmem:[%s4524_s29 + $0x60] sm:$0xff] %v3382_v1  ;;  %v2376_v20 = vadd.f32 %v3382_v1, %v2375_v33  ;;  %v2415_v58 = vmul.f32 %v3382_v1, %v3382_v1  ;;  %v2445_v32 = vadd.f32 %v2444_v55, %v2414_v13  ;;  %v3390_v15 = vadd.f32 %v4511_v31, %v2225_v62 }
 0x200   : > { %2348 = vst [vmem:[%s4524_s29 + $0x78] sm:$0xff] %v3386_v16  ;;  %v3410_v57 = vadd.f32 %v4394_v12, %v3118_v39  ;;  %v2418_v45 = vmul.f32 %v3386_v16, %v3386_v16 }
 0x201   : > { %v2446_v17 = vadd.f32 %v2445_v32, %v2415_v58  ;;  %2346 = vst [vmem:[%s4524_s29 + $0x68] sm:$0xff] %v3390_v15  ;;  %v2377_v26 = vadd.f32 %v3390_v15, %v2376_v20  ;;  %v2416_v51 = vmul.f32 %v3390_v15, %v3390_v15 }
 0x202   : > { %v3119_v48 = vpop.f32.mrb[128].mxu0 }
 0x203   : > { %v2378_v9 = vadd.f32 %v3378_v41, %v2377_v26  ;;  %v2447_v14 = vadd.f32 %v2446_v17, %v2416_v51  ;;  %v3297_v63 = vpop.f32.mrb[0].mxu1  ;;  %v3120_v46 = vpop.f32.mrb[129].mxu0 }
 0x204   : > { %v3393_v21 = vadd.f32 %v4543_v52, %v3297_v63  ;;  %v3121_v30 = vadd.f32 %v3120_v46, %v3119_v48  ;;  %v2238_v36 = vpop.f32.mrb[1].mxu1  ;;  %v3122_v31 = vpop.f32.mrb[130].mxu0 }
 0x205   : > { %v2448_v12 = vadd.f32 %v2447_v14, %v2417_v7  ;;  %v3396_v61 = vadd.f32 %v4529_v49, %v2238_v36  ;;  %v2379_v34 = vadd.f32 %v3386_v16, %v2378_v9  ;;  %v3298_v40 = vpop.f32.mrb[2].mxu1  ;;  %v3123_v8 = vpop.f32.mrb[131].mxu0 }
 0x206   : > { %2351 = vst [vmem:[%s4524_s29 + $0x90] sm:$0xff] %v3393_v21  ;;  %v3399_v11 = vadd.f32 %v4549_v56, %v3298_v40  ;;  %v3124_v44 = vadd.f32 %v3123_v8, %v3122_v31  ;;  %v2241_v18 = vpop.f32.mrb[3].mxu1  ;;  %v3419_v28 = vadd.f32 %v4407_v10, %v3121_v30  ;;  %v2421_v56 = vmul.f32 %v3393_v21, %v3393_v21 }
 0x207   : > { %2349 = vst [vmem:[%s4524_s29 + $0x80] sm:$0xff] %v3396_v61  ;;  %v2380_v52 = vadd.f32 %v3396_v61, %v2379_v34  ;;  %v2419_v60 = vmul.f32 %v3396_v61, %v3396_v61  ;;  %v2449_v50 = vadd.f32 %v2448_v12, %v2418_v45  ;;  %v3402_v38 = vadd.f32 %v4535_v6, %v2241_v18 }
 0x208   : > { %2352 = vst [vmem:[%s4524_s29 + $0x98] sm:$0xff] %v3399_v11  ;;  %v3425_v49 = vadd.f32 %v4416_v43, %v3124_v44  ;;  %v2422_v6 = vmul.f32 %v3399_v11, %v3399_v11 }
 0x209   : > { %v2450_v24 = vadd.f32 %v2449_v50, %v2419_v60  ;;  %2350 = vst [vmem:[%s4524_s29 + $0x88] sm:$0xff] %v3402_v38  ;;  %v2381_v0 = vadd.f32 %v3402_v38, %v2380_v52  ;;  %v2420_v35 = vmul.f32 %v3402_v38, %v3402_v38 }
 0x20a   : > { %v3125_v25 = vpop.f32.mrb[132].mxu0 }
 0x20b   : > { %v2382_v19 = vadd.f32 %v3393_v21, %v2381_v0  ;;  %v2451_v41 = vadd.f32 %v2450_v24, %v2420_v35  ;;  %v3301_v53 = vpop.f32.mrb[4].mxu1  ;;  %v3126_v10 = vpop.f32.mrb[133].mxu0 }
 0x20c   : > { %v3405_v59 = vadd.f32 %v3404_v29, %v3301_v53  ;;  %v3127_v5 = vadd.f32 %v3126_v10, %v3125_v25  ;;  %v2254_v13 = vpop.f32.mrb[5].mxu1  ;;  %v3128_v55 = vpop.f32.mrb[134].mxu0 }
 0x20d   : > { %v2452_v1 = vadd.f32 %v2451_v41, %v2421_v56  ;;  %v3408_v43 = vadd.f32 %v4557_v54, %v2254_v13  ;;  %v2383_v33 = vadd.f32 %v3399_v11, %v2382_v19  ;;  %v3302_v42 = vpop.f32.mrb[6].mxu1  ;;  %v3129_v27 = vpop.f32.mrb[135].mxu0 }
 0x20e   : > { %2355 = vst [vmem:[%s4524_s29 + $0xb0] sm:$0xff] %v3405_v59  ;;  %v3411_v16 = vadd.f32 %v3410_v57, %v3302_v42  ;;  %v3130_v39 = vadd.f32 %v3129_v27, %v3128_v55  ;;  %v2257_v62 = vpop.f32.mrb[7].mxu1  ;;  %v3416_v20 = vadd.f32 %v4429_v22, %v3127_v5  ;;  %v2425_v57 = vmul.f32 %v3405_v59, %v3405_v59 }
 0x20f   : > { %2353 = vst [vmem:[%s4524_s29 + $0xa0] sm:$0xff] %v3408_v43  ;;  %v2384_v29 = vadd.f32 %v3408_v43, %v2383_v33  ;;  %v2423_v58 = vmul.f32 %v3408_v43, %v3408_v43  ;;  %v2453_v32 = vadd.f32 %v2452_v1, %v2422_v6  ;;  %v3414_v15 = vadd.f32 %v4563_v3, %v2257_v62 }
 0x210   : > { %2356 = vst [vmem:[%s4524_s29 + $0xb8] sm:$0xff] %v3411_v16  ;;  %v3422_v17 = vadd.f32 %v4438_v23, %v3130_v39  ;;  %v2426_v3 = vmul.f32 %v3411_v16, %v3411_v16 }
 0x211   : > { %v2454_v54 = vadd.f32 %v2453_v32, %v2423_v58  ;;  %2354 = vst [vmem:[%s4524_s29 + $0xa8] sm:$0xff] %v3414_v15  ;;  %v2385_v26 = vadd.f32 %v3414_v15, %v2384_v29  ;;  %v2424_v51 = vmul.f32 %v3414_v15, %v3414_v15 }
 0x212   : > { %v3131_v48 = vpop.f32.mrb[136].mxu0 }
 0x213   : > { %v2386_v7 = vadd.f32 %v3405_v59, %v2385_v26  ;;  %v2455_v9 = vadd.f32 %v2454_v54, %v2424_v51  ;;  %v3305_v14 = vpop.f32.mrb[8].mxu1  ;;  %v3132_v22 = vpop.f32.mrb[137].mxu0 }
 0x214   : > { %v3417_v63 = vadd.f32 %v3416_v20, %v3305_v14  ;;  %v3133_v46 = vadd.f32 %v3132_v22, %v3131_v48  ;;  %v2270_v21 = vpop.f32.mrb[9].mxu1  ;;  %v3134_v30 = vpop.f32.mrb[138].mxu0 }
 0x215   : > { %v2456_v36 = vadd.f32 %v2455_v9, %v2425_v57  ;;  %v3420_v23 = vadd.f32 %v3419_v28, %v2270_v21  ;;  %v2387_v31 = vadd.f32 %v3411_v16, %v2386_v7  ;;  %v3306_v45 = vpop.f32.mrb[10].mxu1  ;;  %v3135_v12 = vpop.f32.mrb[139].mxu0 }
 0x216   : > { %2359 = vst [vmem:[%s4524_s29 + $0xd0] sm:$0xff] %v3417_v63  ;;  %v3423_v61 = vadd.f32 %v3422_v17, %v3306_v45  ;;  %v3136_v34 = vadd.f32 %v3135_v12, %v3134_v30  ;;  %v2273_v40 = vpop.f32.mrb[11].mxu1  ;;  %v3431_v8 = vadd.f32 %v4451_v4, %v3133_v46  ;;  %v2429_v0 = vmul.f32 %v3417_v63, %v3417_v63 }
 0x217   : > { %2357 = vst [vmem:[%s4524_s29 + $0xc0] sm:$0xff] %v3420_v23  ;;  %v2388_v11 = vadd.f32 %v3420_v23, %v2387_v31  ;;  %v2427_v44 = vmul.f32 %v3420_v23, %v3420_v23  ;;  %v2457_v18 = vadd.f32 %v2456_v36, %v2426_v3  ;;  %v3426_v52 = vadd.f32 %v3425_v49, %v2273_v40 }
 0x218   : > { %2360 = vst [vmem:[%s4524_s29 + $0xd8] sm:$0xff] %v3423_v61  ;;  %v3437_v60 = vadd.f32 %v4458_v2, %v3136_v34  ;;  %v2430_v10 = vmul.f32 %v3423_v61, %v3423_v61 }
 0x219   : > { %v2458_v50 = vadd.f32 %v2457_v18, %v2427_v44  ;;  %2358 = vst [vmem:[%s4524_s29 + $0xc8] sm:$0xff] %v3426_v52  ;;  %v2389_v28 = vadd.f32 %v3426_v52, %v2388_v11  ;;  %v2428_v38 = vmul.f32 %v3426_v52, %v3426_v52 }
 0x21a   : > { %v3137_v24 = vpop.f32.mrb[140].mxu0 }
 0x21b   : > { %v2390_v35 = vadd.f32 %v3417_v63, %v2389_v28  ;;  %v2459_v25 = vadd.f32 %v2458_v50, %v2428_v38  ;;  %v3309_v56 = vpop.f32.mrb[12].mxu1  ;;  %v3138_v19 = vpop.f32.mrb[141].mxu0 }
 0x21c   : > { %v3139_v4 = vadd.f32 %v3138_v19, %v3137_v24  ;;  %v2286_v41 = vpop.f32.mrb[13].mxu1  ;;  %v3140_v53 = vpop.f32.mrb[142].mxu0 }
 0x21d   : > { %v2460_v59 = vadd.f32 %v2459_v25, %v2429_v0  ;;  %v3432_v49 = vadd.f32 %v3431_v8, %v2286_v41  ;;  %v2391_v5 = vadd.f32 %v3423_v61, %v2390_v35  ;;  %v3310_v2 = vpop.f32.mrb[14].mxu1  ;;  %v3141_v13 = vpop.f32.mrb[143].mxu0 }
 0x21e   : > { %v3428_v55 = vadd.f32 %v4469_v37, %v3139_v4  ;;  %v3142_v6 = vadd.f32 %v3141_v13, %v3140_v53  ;;  %v2289_v1 = vpop.f32.mrb[15].mxu1 }
 0x21f   : > { %2361 = vst [vmem:[%s4524_s29 + $0xe0] sm:$0xff] %v3432_v49  ;;  %v2392_v43 = vadd.f32 %v3432_v49, %v2391_v5  ;;  %v2431_v33 = vmul.f32 %v3432_v49, %v3432_v49  ;;  %v2461_v42 = vadd.f32 %v2460_v59, %v2430_v10  ;;  %v3438_v27 = vadd.f32 %v3437_v60, %v2289_v1 }
 0x220   : > { %v3429_v16 = vadd.f32 %v3428_v55, %v3309_v56  ;;  %v3434_v39 = vadd.f32 %v4476_v47, %v3142_v6 }
 0x221   : > { %v2462_v62 = vadd.f32 %v2461_v42, %v2431_v33  ;;  %2362 = vst [vmem:[%s4524_s29 + $0xe8] sm:$0xff] %v3438_v27  ;;  %v2393_v20 = vadd.f32 %v3438_v27, %v2392_v43  ;;  %v2432_v29 = vmul.f32 %v3438_v27, %v3438_v27 }
 0x222   : > { %2363 = vst [vmem:[%s4524_s29 + $0xf0] sm:$0xff] %v3429_v16  ;;  %v2433_v58 = vmul.f32 %v3429_v16, %v3429_v16  ;;  %v3435_v32 = vadd.f32 %v3434_v39, %v3310_v2 }
 0x223   : > { %v2394_v15 = vadd.f32 %v3429_v16, %v2393_v20  ;;  %v2463_v37 = vadd.f32 %v2462_v62, %v2432_v29 }
 0x224   : > { %2364 = vst [vmem:[%s4524_s29 + $0xf8] sm:$0xff] %v3435_v32  ;;  %v2434_v17 = vmul.f32 %v3435_v32, %v3435_v32 }
 0x225   : > { %v2395_v54 = vadd.f32 %v3435_v32, %v2394_v15  ;;  %v2464_v26 = vadd.f32 %v2463_v37, %v2433_v58 }
 0x227   : > { %v2396_v51 = vrot.slane %v2395_v54, 4  ;;  %v2465_v48 = vadd.f32 %v2464_v26, %v2434_v17 }
 0x229   : > { %v2397_v57 = vadd.f32 %v2396_v51, %v2395_v54  ;;  %v2466_v7 = vrot.slane %v2465_v48, 4 }
 0x22b   : > { %v2398_v47 = vrot.slane %v2397_v57, 2  ;;  %v2467_v9 = vadd.f32 %v2466_v7, %v2465_v48 }
 0x22d   : > { %v2399_v14 = vadd.f32 %v2398_v47, %v2397_v57  ;;  %v2468_v22 = vrot.slane %v2467_v9, 2 }
 0x22f   : > { %v2400_v63 = vrot.slane %v2399_v14, 1  ;;  %v2469_v46 = vadd.f32 %v2468_v22, %v2467_v9 }
 0x231   : > { %v2401_v21 = vadd.f32 %v2400_v63, %v2399_v14  ;;  %v2470_v30 = vrot.slane %v2469_v46, 1 }
 0x233   : > { %2402 = vst [vmem:[%s211_s5] sm:$0x1] %v2401_v21  ;;  %v2471_v3 = vadd.f32 %v2470_v30, %v2469_v46 }
 0x235   : > { %2472 = vst [vmem:[%s214_s8] sm:$0x1] %v2471_v3 }
 0x236 PF: > { %s15_s15 = sadd.s32 1, %s3574_s15  }
 0x237   : > { %p12_p4 = scmp.ge.s32.totalorder %s15_s15, 4  }
 0x239   :  { %14 = sbr.rel (!%p12_p4) target bundleno = 1 (0x1), region = 86 }

// kernel: basic_block_forward.4
= control target key start
LH: loop header
LB: loop body
LE: loop exit
PB: predicated region body
PF: predicated region fallthrough
CT: control target
= control target key end

     0   :  { %s3778_s21 = smov 0   ;;  %s5000_s0 = inlined_call_operand.vmem [shape: f32[2,16,16,128], index: 0, kind: input, shape index: {}]   ;;  %s5001_s1 = inlined_call_operand.vmem [shape: bf16[3,384,128], index: 1, kind: input, shape index: {}]   ;;  %s5002_s2 = inlined_call_operand.vmem [shape: f32[1,128], index: 2, kind: input, shape index: {}]   ;;  %s5003_s3 = inlined_call_operand.vmem [shape: f32[1,128], index: 3, kind: input, shape index: {}]   ;;  %s5004_s4 = inlined_call_operand.vmem [shape: f32[2,16,16,128], index: 4, kind: output, shape index: {0}]   ;;  %s5005_s5 = inlined_call_operand.vmem [shape: f32[2,1,128], index: 5, kind: output, shape index: {1}]   ;;  %s5006_s6 = inlined_call_operand.vmem [shape: f32[2,1,128], index: 6, kind: output, shape index: {2}]  }
   0x1 LB: > { %s2742_s22 = sadd.s32 4294967295, %s3740_s21   ;;  %p2746_p0 = scmp.ge.s32.totalorder %s3740_s21, 1  ;;  %s3740_s21 = sphi %s3778_s21, %s17_s21  }
   0x2   : > { %p217_p1 = scmp.lt.s32.totalorder %s3740_s21, 3 }
   0x4   : > { %p218_p2 = pnand %p2746_p0, %p217_p1 }
   0x6   : > { %221 = sbr.rel (%p218_p2) target bundleno = 570 (0x23a), region = 36 }
   0xd   : > { %v3662_v0 = vld [vmem:[%s5001_s1 + $0x100] sm:$0xff]   ;;  %v3665_v3 = vld [vmem:[%s5001_s1 + $0x108] sm:$0xff]   ;;  %v3668_v6 = vld [vmem:[%s5001_s1 + $0x110] sm:$0xff]   ;;  %p253_p3 = scmp.lt.s32.totalorder %s2742_s22, 1  ;;  %vm627_vm0 = vcmask 1047552  }
   0xe   : > { %v3792_v1 = vld [vmem:[%s5001_s1 + $0x140] sm:$0xff]   ;;  %2925 = vmatprep.subr.bf16.mxu0 %v3662_v0  ;;  %v3805_v4 = vld [vmem:[%s5001_s1 + $0x148] sm:$0xff]   ;;  %v3817_v7 = vld [vmem:[%s5001_s1 + $0x150] sm:$0xff]   ;;  %vm726_vm1 = vsmask.f32 7424 }
   0xf   : > { %v3664_v2 = vld [vmem:[%s5001_s1 + $0xc0] sm:$0xff]   ;;  %3477 = vmatprep.subr.bf16.mxu1 %v3792_v1  ;;  %v3667_v5 = vld [vmem:[%s5001_s1 + $0xc8] sm:$0xff]   ;;  %v3670_v8 = vld [vmem:[%s5001_s1 + $0xd0] sm:$0xff]   ;;  %s5033_s22 = smov (!%p253_p3, %s2742_s22), 1  ;;  %vm628_vm2 = vsmask.f32 7938 }
  0x10   : > { %2926 = vmatpush3.bf16.msra.mxu0 %v3664_v2  ;;  %3485 = vmatpush3.bf16.msra.mxu1 %v3792_v1  ;;  %v3671_v9 = vld [vmem:[%s5001_s1 + $0x118] sm:$0xff]   ;;  %v3674_v12 = vld [vmem:[%s5001_s1 + $0x120] sm:$0xff]   ;;  %v3677_v15 = vld [vmem:[%s5001_s1 + $0x128] sm:$0xff]   ;;  %s2923_s11 = sshll.u32 %s5033_s22, 8  ;;  %s265_s7 = scalar_lea.vmem %s5005_s5, %s5033_s22 }
  0x11   : > { %2927 = vmatprep.subr.bf16.mxu0 %v3665_v3  ;;  %3478 = vmatprep.subr.bf16.mxu1 %v3805_v4  ;;  %v3830_v10 = vld [vmem:[%s5001_s1 + $0x158] sm:$0xff]   ;;  %v3845_v13 = vld [vmem:[%s5001_s1 + $0x160] sm:$0xff]   ;;  %v3862_v16 = vld [vmem:[%s5001_s1 + $0x168] sm:$0xff]   ;;  %s3883_s20 = scalar_lea.vmem %s5000_s0, %s2923_s11  ;;  %s4897_s29 = scalar_lea.vmem %s5004_s4, %s2923_s11 }
  0x12   : > { %v3673_v11 = vld [vmem:[%s5001_s1 + $0xd8] sm:$0xff]   ;;  %v3676_v14 = vld [vmem:[%s5001_s1 + $0xe0] sm:$0xff]   ;;  %v3679_v17 = vld [vmem:[%s5001_s1 + $0xe8] sm:$0xff]   ;;  %s268_s10 = scalar_lea.vmem %s5006_s6, %s5033_s22 }
  0x13   : > { %v3680_v18 = vld [vmem:[%s5001_s1 + $0x130] sm:$0xff]   ;;  %v3683_v21 = vld [vmem:[%s5001_s1 + $0x138] sm:$0xff]   ;;  %v270_v23 = vld [vmem:[%s3883_s20] sm:$0xff] }
  0x14   : > { %2928 = vmatpush3.bf16.msra.mxu0 %v3667_v5  ;;  %3486 = vmatpush3.bf16.msra.mxu1 %v3805_v4  ;;  %v3876_v19 = vld [vmem:[%s5001_s1 + $0x170] sm:$0xff]   ;;  %v3894_v22 = vld [vmem:[%s5001_s1 + $0x178] sm:$0xff]   ;;  %v271_v24 = vld [vmem:[%s3883_s20 + $0x8] sm:$0xff] }
  0x15   : > { %2929 = vmatprep.subr.bf16.mxu0 %v3668_v6  ;;  %3479 = vmatprep.subr.bf16.mxu1 %v3817_v7  ;;  %v3682_v20 = vld [vmem:[%s5001_s1 + $0xf0] sm:$0xff]   ;;  %v3902_v25 = vld [vmem:[%s5002_s2] ss:$0 sm:$0xff]  ;;  %v287_v30 = vld [vmem:[%s3883_s20 + $0x88] sm:$0xff] }
  0x16   : > { %v309_v26 = vmul.f32 %v3902_v25, %v270_v23  ;;  %v310_v27 = vmul.f32 %v3902_v25, %v271_v24  ;;  %v3910_v28 = vld [vmem:[%s5003_s3] ss:$0 sm:$0xff]  ;;  %v326_v32 = vmul.f32 %v3902_v25, %v287_v30  ;;  %v288_v33 = vld [vmem:[%s3883_s20 + $0x90] sm:$0xff]  ;;  %v289_v34 = vld [vmem:[%s3883_s20 + $0x98] sm:$0xff] }
  0x17   : > { %v286_v29 = vld [vmem:[%s3883_s20 + $0x80] sm:$0xff]  ;;  %v327_v37 = vmul.f32 %v3902_v25, %v288_v33  ;;  %v328_v38 = vmul.f32 %v3902_v25, %v289_v34  ;;  %v3685_v39 = vld [vmem:[%s5001_s1 + $0xf8] sm:$0xff]   ;;  %v272_v52 = vld [vmem:[%s3883_s20 + $0x10] sm:$0xff] }
  0x18   : > { %2930 = vmatpush3.bf16.msra.mxu0 %v3670_v8  ;;  %3487 = vmatpush3.bf16.msra.mxu1 %v3817_v7  ;;  %v325_v31 = vmul.f32 %v3902_v25, %v286_v29  ;;  %v348_v35 = vadd.f32 %v3910_v28, %v309_v26  ;;  %v349_v36 = vadd.f32 %v3910_v28, %v310_v27  ;;  %v3686_v46 = vld [vmem:[%s5001_s1 + $0x40] sm:$0xff]   ;;  %v273_v54 = vld [vmem:[%s3883_s20 + $0x18] sm:$0xff]  ;;  %v291_v61 = vld [vmem:[%s3883_s20 + $0xa8] sm:$0xff] }
  0x19   : > { %2931 = vmatprep.subr.bf16.mxu0 %v3671_v9  ;;  %3480 = vmatprep.subr.bf16.mxu1 %v3830_v10  ;;  %v365_v41 = vadd.f32 %v3910_v28, %v326_v32  ;;  %v366_v44 = vadd.f32 %v3910_v28, %v327_v37  ;;  %v367_v45 = vadd.f32 %v3910_v28, %v328_v38  ;;  %v290_v56 = vld [vmem:[%s3883_s20 + $0xa0] sm:$0xff]  ;;  %v292_v3 = vld [vmem:[%s3883_s20 + $0xb0] sm:$0xff]  ;;  %vm3966_vm3 = vmand %vm627_vm0, %vm628_vm2 }
  0x1a   : > { %v364_v40 = vadd.f32 %v3910_v28, %v325_v31  ;;  %v380_v42 = vmax.f32 %v348_v35, 0.0  ;;  %v381_v43 = vmax.f32 %v349_v36, 0.0  ;;  %v311_v55 = vmul.f32 %v3902_v25, %v272_v52  ;;  %vm3974_vm4 = vmand %vm627_vm0, %vm726_vm1  ;;  %v274_v32 = vld [vmem:[%s3883_s20 + $0x20] sm:$0xff]  ;;  %v3688_v36 = vld [vmem:[%s5001_s1 + $0x48] sm:$0xff]  }
  0x1b   : > { %v397_v48 = vmax.f32 %v365_v41, 0.0  ;;  %v398_v50 = vmax.f32 %v366_v44, 0.0  ;;  %v399_v51 = vmax.f32 %v367_v45, 0.0  ;;  %v312_v60 = vmul.f32 %v3902_v25, %v273_v54  ;;  %v3687_v35 = vld [vmem:[%s5001_s1] sm:$0xff]   ;;  %v295_v45 = vld [vmem:[%s3883_s20 + $0xc8] sm:$0xff] }
  0x1c   : > { %2932 = vmatpush3.bf16.msra.mxu0 %v3673_v11  ;;  %3488 = vmatpush3.bf16.msra.mxu1 %v3830_v10  ;;  %v396_v47 = vmax.f32 %v364_v40, 0.0  ;;  %v3934_v49 = vpack.c.bf16 %v381_v43, %v380_v42  ;;  %v350_v0 = vadd.f32 %v3910_v28, %v311_v55  ;;  %v329_v2 = vmul.f32 %v3902_v25, %v290_v56  ;;  %v293_v11 = vld [vmem:[%s3883_s20 + $0xb8] sm:$0xff]  ;;  %v294_v44 = vld [vmem:[%s3883_s20 + $0xc0] sm:$0xff] }
  0x1d   : > { %2933 = vmatprep.subr.bf16.mxu0 %v3674_v12  ;;  %3481 = vmatprep.subr.bf16.mxu1 %v3845_v13  ;;  %v3947_v59 = vpack.c.bf16 %v399_v51, %v398_v50  ;;  %v351_v9 = vadd.f32 %v3910_v28, %v312_v60  ;;  %v331_v26 = vmul.f32 %v3902_v25, %v292_v3  ;;  %v3689_v51 = vld [vmem:[%s5001_s1 + $0x8] sm:$0xff]   ;;  %v3690_v60 = vld [vmem:[%s5001_s1 + $0x50] sm:$0xff]  }
  0x1e   : > { %v3938_v53 = vpack.c.bf16 %v397_v48, %v396_v47  ;;  %1145 = vmatprep.mubr.bf16.mxu0 %v3934_v49  ;;  %v5010_v57 = vshrl.u32 %v3934_v49, 16  ;;  %v503_v58 = vshll.u32 %v3934_v49, 16  ;;  %v332_v31 = vmul.f32 %v3902_v25, %v293_v11 }
  0x1f   : > { %v563_v6 = vshrl.u32 %v3947_v59, 16  ;;  %v566_v8 = vshll.u32 %v3947_v59, 16  ;;  %v383_v24 = vmax.f32 %v351_v9, 0.0  ;;  %v370_v38 = vadd.f32 %v3910_v28, %v331_v26 }
  0x20   : > { %2934 = vmatpush3.bf16.msra.mxu0 %v3676_v14  ;;  %3489 = vmatpush3.bf16.msra.mxu1 %v3845_v13  ;;  %v556_v62 = vshrl.u32 %v3938_v53, 16  ;;  %v559_v63 = vshll.u32 %v3938_v53, 16  ;;  %v502_v5 = vrot.slane %v5010_v57, 7  ;;  %v371_v42 = vadd.f32 %v3910_v28, %v332_v31  ;;  %v3717_v14 = vld [vmem:[%s5001_s1 + $0xb8] sm:$0xff]  }
  0x21   : > { %2935 = vmatprep.subr.bf16.mxu0 %v3677_v15  ;;  %3482 = vmatprep.subr.bf16.mxu1 %v3862_v16  ;;  %v382_v15 = vmax.f32 %v350_v0, 0.0  ;;  %v696_v23 = vrot.slane %v566_v8, 1  ;;  %v313_v43 = vmul.f32 %v3902_v25, %v274_v32  ;;  %v402_v50 = vmax.f32 %v370_v38, 0.0 }
  0x22   : > { %v694_v12 = vrot.slane %v559_v63, 1  ;;  %v403_v54 = vmax.f32 %v371_v42, 0.0  ;;  %v334_v0 = vmul.f32 %v3902_v25, %v295_v45 }
  0x23   : > { %v697_v34 = vor.u32 %v696_v23, %v563_v6  ;;  %v4000_v37 = vpack.c.bf16 %v383_v24, %v382_v15 }
  0x24   : > { %2936 = vmatpush3.bf16.msra.mxu0 %v3679_v17  ;;  %3490 = vmatpush3.bf16.msra.mxu1 %v3862_v16  ;;  %v330_v17 = vmul.f32 %v3902_v25, %v291_v61  ;;  %v695_v27 = vor.u32 %v694_v12, %v556_v62  ;;  %v333_v61 = vmul.f32 %v3902_v25, %v294_v44 }
  0x25   : > { %2937 = vmatprep.subr.bf16.mxu0 %v3680_v18  ;;  %3483 = vmatprep.subr.bf16.mxu1 %v3876_v19  ;;  %v368_v18 = vadd.f32 %v3910_v28, %v329_v2  ;;  %v507_v47 = vshrl.u32 %v4000_v37, 16  ;;  %v510_v48 = vshll.u32 %v4000_v37, 16  ;;  %v296_v2 = vld [vmem:[%s3883_s20 + $0xd0] sm:$0xff]  ;;  %v4041_v9 = vpack.c.bf16 %v403_v54, %v402_v50  ;;  %v298_v54 = vld [vmem:[%s3883_s20 + $0xe0] sm:$0xff] }
  0x26   : > { %v369_v29 = vadd.f32 %v3910_v28, %v330_v17  ;;  %v4006_v40 = vsel %vm3974_vm4, %v695_v27, 0  ;;  %v372_v17 = vadd.f32 %v3910_v28, %v333_v61  ;;  %v3694_v61 = vld [vmem:[%s5001_s1 + $0x60] sm:$0xff]  }
  0x27   : > { %v400_v30 = vmax.f32 %v368_v18, 0.0  ;;  %3365 = vmatprep.mubr.bf16.mxu1 %v4006_v40  ;;  %v509_v56 = vrot.slane %v507_v47, 7  ;;  %v373_v18 = vadd.f32 %v3910_v28, %v334_v0  ;;  %v577_v24 = vshrl.u32 %v4041_v9, 16  ;;  %v299_v0 = vld [vmem:[%s3883_s20 + $0xe8] sm:$0xff] }
  0x28   : > { %2938 = vmatpush3.bf16.msra.mxu0 %v3682_v20  ;;  %3491 = vmatpush3.bf16.msra.mxu1 %v3876_v19  ;;  %v401_v41 = vmax.f32 %v369_v29, 0.0  ;;  %v580_v26 = vshll.u32 %v4041_v9, 16  ;;  %v276_v29 = vld [vmem:[%s3883_s20 + $0x30] sm:$0xff]  ;;  %v404_v32 = vmax.f32 %v372_v17, 0.0 }
  0x29   : > { %2939 = vmatprep.subr.bf16.mxu0 %v3683_v21  ;;  %3484 = vmatprep.subr.bf16.mxu1 %v3894_v22  ;;  %v505_v21 = vor.u32 %v503_v58, %v502_v5  ;;  %v512_v12 = vor.u32 %v510_v48, %v509_v56  ;;  %v315_v50 = vmul.f32 %v3902_v25, %v276_v29  ;;  %v3708_v20 = vld [vmem:[%s5001_s1 + $0xb0] sm:$0xff]  }
  0x2a   : > { %v4026_v52 = vpack.c.bf16 %v401_v41, %v400_v30  ;;  %v277_v30 = vld [vmem:[%s3883_s20 + $0x38] sm:$0xff]  ;;  %v700_v38 = vrot.slane %v580_v26, 1 }
  0x2b   : > { %v3990_v33 = vsel %vm3966_vm3, %v505_v21, 0  ;;  %v297_v21 = vld [vmem:[%s3883_s20 + $0xd8] sm:$0xff]  ;;  %v4059_v31 = vsel %vm3966_vm3, %v512_v12, 0 }
  0x2c   : > { %2940 = vmatpush3.bf16.msra.mxu0 %v3685_v39  ;;  %3492 = vmatpush3.bf16.msra.mxu1 %v3894_v22  ;;  %v275_v39 = vld [vmem:[%s3883_s20 + $0x28] sm:$0xff]  ;;  %v570_v3 = vshrl.u32 %v4026_v52, 16  ;;  %v573_v5 = vshll.u32 %v4026_v52, 16  ;;  %v336_v42 = vmul.f32 %v3902_v25, %v297_v21  ;;  %v354_v21 = vadd.f32 %v3910_v28, %v315_v50 }
  0x2d   : > { %3333 = vmatprep.subr.bf16.mxu0 %v3792_v1  ;;  %3061 = vmatprep.subr.bf16.mxu1 %v3686_v46  ;;  %v4016_v46 = vsel %vm3974_vm4, %v697_v34, 0  ;;  %v314_v55 = vmul.f32 %v3902_v25, %v275_v39  ;;  %v405_v34 = vmax.f32 %v373_v18, 0.0  ;;  %v3692_v39 = vld [vmem:[%s5001_s1 + $0x58] sm:$0xff]  }
  0x2e   : > { %v698_v23 = vrot.slane %v573_v5, 1 }
  0x2f   : > { %1146 = vmatmul.mubr.bf16.vlgmr.msra.gmra.mrb[0].mxu0 %v3990_v33  ;;  %3366 = vmatmul.mubr.bf16.vlgmr.msra.gmra.mrb[0].mxu1 %v4016_v46  ;;  %v353_v11 = vadd.f32 %v3910_v28, %v314_v55  ;;  %v4079_v44 = vpack.c.bf16 %v405_v34, %v404_v32  ;;  %v301_v32 = vld [vmem:[%s3883_s20 + $0xf8] sm:$0xff] }
  0x30   : > { %3334 = vmatpush3.bf16.msra.mxu0 %v3792_v1  ;;  %1153 = vmatprep.mubr.bf16.mxu0 %v4000_v37  ;;  %v352_v1 = vadd.f32 %v3910_v28, %v313_v43  ;;  %v3693_v43 = vld [vmem:[%s5001_s1 + $0x18] sm:$0xff]  }
  0x31   : > { %3062 = vmatpush3.bf16.msra.mxu1 %v3687_v35  ;;  %3335 = vmatprep.subr.bf16.mxu0 %v3805_v4  ;;  %v385_v27 = vmax.f32 %v353_v11, 0.0  ;;  %v335_v35 = vmul.f32 %v3902_v25, %v296_v2  ;;  %v587_v2 = vshll.u32 %v4079_v44, 16  ;;  %v375_v11 = vadd.f32 %v3910_v28, %v336_v42 }
  0x32   : > { %3063 = vmatprep.subr.bf16.mxu1 %v3688_v36  ;;  %v384_v15 = vmax.f32 %v352_v1, 0.0  ;;  %v699_v36 = vor.u32 %v698_v23, %v570_v3  ;;  %v701_v1 = vor.u32 %v700_v38, %v577_v24 }
  0x33   : > { %v374_v45 = vadd.f32 %v3910_v28, %v335_v35  ;;  %v407_v29 = vmax.f32 %v375_v11, 0.0  ;;  %v386_v35 = vmax.f32 %v354_v21, 0.0 }
  0x34   : > { %3336 = vmatpush3.bf16.msra.mxu0 %v3805_v4  ;;  %v3691_v4 = vld [vmem:[%s5001_s1 + $0x10] sm:$0xff]   ;;  %v4073_v41 = vpack.c.bf16 %v385_v27, %v384_v15  ;;  %v4088_v55 = vsel %vm3974_vm4, %v699_v36, 0  ;;  %v4107_v17 = vsel %vm3974_vm4, %v701_v1, 0  ;;  %v702_v27 = vrot.slane %v587_v2, 1 }
  0x35   : > { %3337 = vmatprep.subr.bf16.mxu0 %v3817_v7  ;;  %3064 = vmatpush3.bf16.msra.mxu1 %v3689_v51  ;;  %v316_v51 = vmul.f32 %v3902_v25, %v277_v30  ;;  %v406_v12 = vmax.f32 %v374_v45, 0.0  ;;  %v300_v15 = vld [vmem:[%s3883_s20 + $0xf0] sm:$0xff]  ;;  %v337_v30 = vmul.f32 %v3902_v25, %v298_v54  ;;  %v3696_v45 = vld [vmem:[%s5001_s1 + $0x68] sm:$0xff]   ;;  %v278_v54 = vld [vmem:[%s3883_s20 + $0x40] sm:$0xff] }
  0x36   : > { %3065 = vmatprep.subr.bf16.mxu1 %v3690_v60  ;;  %v5008_v56 = vshrl.u32 %v4073_v41, 16  ;;  %v5009_v60 = vshll.u32 %v4073_v41, 16  ;;  %3369 = vmatprep.mubr.bf16.mxu1 %v4088_v55  ;;  %v339_v38 = vmul.f32 %v3902_v25, %v300_v15 }
  0x37   : > { %1154 = vmatmul.mubr.bf16.gmra.mrb[4].mxu0 %v4059_v31  ;;  %v355_v23 = vadd.f32 %v3910_v28, %v316_v51  ;;  %3370 = vmatmul.mubr.bf16.gmra.mrb[4].mxu1 %v4107_v17  ;;  %v4126_v42 = vpack.c.bf16 %v407_v29, %v406_v12  ;;  %v376_v50 = vadd.f32 %v3910_v28, %v337_v30  ;;  %v279_v12 = vld [vmem:[%s3883_s20 + $0x48] sm:$0xff] }
  0x38   : > { %3338 = vmatpush3.bf16.msra.mxu0 %v3817_v7  ;;  %1161 = vmatprep.mubr.bf16.mxu0 %v4073_v41  ;;  %v584_v7 = vshrl.u32 %v4079_v44, 16  ;;  %v516_v18 = vrot.slane %v5008_v56, 7  ;;  %v378_v11 = vadd.f32 %v3910_v28, %v339_v38  ;;  %v317_v38 = vmul.f32 %v3902_v25, %v278_v54  ;;  %v282_v56 = vld [vmem:[%s3883_s20 + $0x60] sm:$0xff] }
  0x39   : > { %3339 = vmatprep.subr.bf16.mxu0 %v3830_v10  ;;  %3066 = vmatpush3.bf16.msra.mxu1 %v3691_v4  ;;  %v338_v4 = vmul.f32 %v3902_v25, %v299_v0  ;;  %v387_v36 = vmax.f32 %v355_v23, 0.0  ;;  %v340_v0 = vmul.f32 %v3902_v25, %v301_v32  ;;  %v5011_v21 = vshll.u32 %v4126_v42, 16 }
  0x3a   : > { %3067 = vmatprep.subr.bf16.mxu1 %v3692_v39  ;;  %v519_v34 = vor.u32 %v5009_v60, %v516_v18  ;;  %v703_v39 = vor.u32 %v702_v27, %v584_v7  ;;  %v591_v18 = vshrl.u32 %v4126_v42, 16  ;;  %v408_v23 = vmax.f32 %v376_v50, 0.0  ;;  %v280_v27 = vld [vmem:[%s3883_s20 + $0x50] sm:$0xff]  ;;  %v283_v60 = vld [vmem:[%s3883_s20 + $0x68] sm:$0xff] }
  0x3b   : > { %v377_v51 = vadd.f32 %v3910_v28, %v338_v4  ;;  %v4141_v1 = vpack.c.bf16 %v387_v36, %v386_v35  ;;  %v379_v32 = vadd.f32 %v3910_v28, %v340_v0  ;;  %v704_v35 = vrot.slane %v5011_v21, 1  ;;  %v284_v21 = vld [vmem:[%s3883_s20 + $0x70] sm:$0xff] }
  0x3c   : > { %3340 = vmatpush3.bf16.msra.mxu0 %v3830_v10  ;;  %v3695_v10 = vld [vmem:[%s5001_s1 + $0x20] sm:$0xff]   ;;  %v4148_v15 = vsel %vm3974_vm4, %v703_v39, 0  ;;  %v410_v36 = vmax.f32 %v378_v11, 0.0  ;;  %v318_v39 = vmul.f32 %v3902_v25, %v279_v12  ;;  %v319_v11 = vmul.f32 %v3902_v25, %v280_v27 }
  0x3d   : > { %3341 = vmatprep.subr.bf16.mxu0 %v3845_v13  ;;  %3068 = vmatpush3.bf16.msra.mxu1 %v3693_v43  ;;  %v4139_v43 = vsel %vm3966_vm3, %v519_v34, 0  ;;  %v409_v29 = vmax.f32 %v377_v51, 0.0  ;;  %v5007_v30 = vshrl.u32 %v4141_v1, 16  ;;  %v5012_v4 = vshll.u32 %v4141_v1, 16  ;;  %v281_v34 = vld [vmem:[%s3883_s20 + $0x58] sm:$0xff] }
  0x3e   : > { %3069 = vmatprep.subr.bf16.mxu1 %v3694_v61  ;;  %v3697_v61 = vld [vmem:[%s5001_s1 + $0x28] sm:$0xff]   ;;  %3373 = vmatprep.mubr.bf16.mxu1 %v4148_v15  ;;  %v411_v0 = vmax.f32 %v379_v32, 0.0  ;;  %v356_v54 = vadd.f32 %v3910_v28, %v317_v38  ;;  %v357_v12 = vadd.f32 %v3910_v28, %v318_v39  ;;  %v358_v57 = vadd.f32 %v3910_v28, %v319_v11 }
  0x3f   : > { %1162 = vmatmul.mubr.bf16.gmra.mrb[8].mxu0 %v4139_v43  ;;  %v4168_v50 = vpack.c.bf16 %v409_v29, %v408_v23  ;;  %v523_v51 = vrot.slane %v5007_v30, 7  ;;  %v320_v23 = vmul.f32 %v3902_v25, %v281_v34 }
  0x40   : > { %1169 = vmatprep.mubr.bf16.mxu0 %v4141_v1  ;;  %3342 = vmatpush3.bf16.msra.mxu0 %v3845_v13  ;;  %v705_v13 = vor.u32 %v704_v35, %v591_v18  ;;  %v4189_v30 = vpack.c.bf16 %v411_v0, %v410_v36  ;;  %v3700_v35 = vld [vmem:[%s5001_s1 + $0x78] sm:$0xff]   ;;  %v388_v34 = vmax.f32 %v356_v54, 0.0  ;;  %v389_v39 = vmax.f32 %v357_v12, 0.0 }
  0x41   : > { %3070 = vmatpush3.bf16.msra.mxu1 %v3695_v10  ;;  %v3698_v10 = vld [vmem:[%s5001_s1 + $0x70] sm:$0xff]   ;;  %3343 = vmatprep.subr.bf16.mxu0 %v3862_v16  ;;  %v598_v29 = vshrl.u32 %v4168_v50, 16  ;;  %v5013_v27 = vshll.u32 %v4168_v50, 16  ;;  %v526_v32 = vor.u32 %v5012_v4, %v523_v51  ;;  %v321_v54 = vmul.f32 %v3902_v25, %v282_v56  ;;  %v285_v12 = vld [vmem:[%s3883_s20 + $0x78] sm:$0xff] }
  0x42   : > { %3071 = vmatprep.subr.bf16.mxu1 %v3696_v45  ;;  %v3699_v45 = vld [vmem:[%s5001_s1 + $0x30] sm:$0xff]   ;;  %v4198_v38 = vsel %vm3974_vm4, %v705_v13, 0  ;;  %v605_v0 = vshrl.u32 %v4189_v30, 16  ;;  %v4213_v11 = vpack.c.bf16 %v389_v39, %v388_v34  ;;  %v390_v13 = vmax.f32 %v358_v57, 0.0  ;;  %v3701_v57 = vld [vmem:[%s5001_s1 + $0x38] sm:$0xff]  }
  0x43   : > { %3374 = vmatmul.mubr.bf16.gmra.mrb[8].mxu1 %v4198_v38  ;;  %v706_v36 = vrot.slane %v5013_v27, 1  ;;  %v4208_v51 = vsel %vm3966_vm3, %v526_v32, 0  ;;  %v323_v27 = vmul.f32 %v3902_v25, %v284_v21  ;;  %v360_v39 = vadd.f32 %v3910_v28, %v321_v54  ;;  %v4241_v21 = vld [vmem:[%s5001_s1 + $0x80] sm:$0xff]  }
  0x44   : > { %3344 = vmatpush3.bf16.msra.mxu0 %v3862_v16  ;;  %v359_v16 = vadd.f32 %v3910_v28, %v320_v23  ;;  %v528_v56 = vshrl.u32 %v4213_v11, 16  ;;  %v531_v23 = vshll.u32 %v4213_v11, 16 }
  0x45   : > { %3072 = vmatpush3.bf16.msra.mxu1 %v3697_v61  ;;  %v5014_v61 = vshll.u32 %v4189_v30, 16  ;;  %3345 = vmatprep.subr.bf16.mxu0 %v3876_v19  ;;  %v707_v32 = vor.u32 %v706_v36, %v598_v29 }
  0x46   : > { %3073 = vmatprep.subr.bf16.mxu1 %v3698_v10  ;;  %v322_v10 = vmul.f32 %v3902_v25, %v283_v60  ;;  %v391_v34 = vmax.f32 %v359_v16, 0.0  ;;  %v530_v16 = vrot.slane %v528_v56, 7 }
  0x47   : > { %1170 = vmatmul.mubr.bf16.gmra.mrb[12].mxu0 %v4208_v51  ;;  %v708_v4 = vrot.slane %v5014_v61, 1  ;;  %v4234_v36 = vsel %vm3974_vm4, %v707_v32, 0  ;;  %v324_v61 = vmul.f32 %v3902_v25, %v285_v12 }
  0x48   : > { %1177 = vmatprep.mubr.bf16.mxu0 %v4213_v11  ;;  %3346 = vmatpush3.bf16.msra.mxu0 %v3876_v19  ;;  %v4249_v54 = vpack.c.bf16 %v391_v34, %v390_v13  ;;  %v558_v19 = vrot.slane %v556_v62, 7  ;;  %v3709_v13 = vld [vmem:[%s5001_s1 + $0x1c0] sm:$0xff]  }
  0x49   : > { %3074 = vmatpush3.bf16.msra.mxu1 %v3699_v45  ;;  %v709_v60 = vor.u32 %v708_v4, %v605_v0  ;;  %v361_v45 = vadd.f32 %v3910_v28, %v322_v10  ;;  %3377 = vmatprep.mubr.bf16.mxu1 %v4234_v36  ;;  %v392_v4 = vmax.f32 %v360_v39, 0.0  ;;  %v363_v25 = vadd.f32 %v3910_v28, %v324_v61 }
  0x4a   : > { %3075 = vmatprep.subr.bf16.mxu1 %v3700_v35  ;;  %v362_v35 = vadd.f32 %v3910_v28, %v323_v27  ;;  %3347 = vmatprep.subr.bf16.mxu0 %v3894_v22  ;;  %v533_v27 = vor.u32 %v531_v23, %v530_v16  ;;  %v535_v12 = vshrl.u32 %v4249_v54, 16  ;;  %v538_v34 = vshll.u32 %v4249_v54, 16 }
  0x4b   : > { %v4255_v32 = vsel %vm3974_vm4, %v709_v60, 0  ;;  %v393_v10 = vmax.f32 %v361_v45, 0.0  ;;  %v395_v62 = vmax.f32 %v363_v25, 0.0  ;;  %v561_v61 = vor.u32 %v559_v63, %v558_v19 }
  0x4c   : > { %v394_v39 = vmax.f32 %v362_v35, 0.0  ;;  %3378 = vmatmul.mubr.bf16.gmra.mrb[12].mxu1 %v4255_v32  ;;  %v5015_v60 = vmov 0   ;;  %v4278_v45 = vsel %vm3966_vm3, %v533_v27, 0  ;;  %v537_v16 = vrot.slane %v535_v12, 7  ;;  %3348 = vmatpush3.bf16.msra.mxu0 %v3894_v22 }
  0x4d   : > { %3076 = vmatpush3.bf16.msra.mxu1 %v3701_v57  ;;  %v4269_v28 = vpack.c.bf16 %v393_v10, %v392_v4  ;;  %v565_v57 = vrot.slane %v563_v6, 7  ;;  %1611 = vmatprep.mubr.bf16.mxu1 %v5015_v60  ;;  %v572_v4 = vrot.slane %v570_v3, 7  ;;  %v579_v35 = vrot.slane %v577_v24, 7 }
  0x4e   : > { %3381 = vmatprep.subr.bf16.mxu1 %v4241_v21  ;;  %v680_v63 = vrot.slane %v510_v48, 1  ;;  %v4291_v10 = vpack.c.bf16 %v395_v62, %v394_v39  ;;  %v4295_v25 = vsel %vm3966_vm3, %v561_v61, 0  ;;  %3197 = vmatprep.subr.bf16.mxu0 %v3709_v13  ;;  %v540_v3 = vor.u32 %v538_v34, %v537_v16  ;;  %v3703_v13 = vld [vmem:[%s5001_s1 + $0x88] sm:$0xff]  }
  0x4f   : > { %1178 = vmatmul.mubr.bf16.gmra.mrb[16].mxu0 %v4278_v45  ;;  %v542_v6 = vshrl.u32 %v4269_v28, 16  ;;  %v568_v22 = vor.u32 %v566_v8, %v565_v57  ;;  %v575_v48 = vor.u32 %v573_v5, %v572_v4  ;;  %v582_v24 = vor.u32 %v580_v26, %v579_v35 }
  0x50   : > { %1185 = vmatprep.mubr.bf16.mxu0 %v4249_v54  ;;  %v545_v27 = vshll.u32 %v4269_v28, 16  ;;  %v586_v39 = vrot.slane %v584_v7, 7  ;;  %v549_v62 = vshrl.u32 %v4291_v10, 16  ;;  %v4327_v61 = vsel %vm3966_vm3, %v540_v3, 0 }
  0x51   : > { %v544_v19 = vrot.slane %v542_v6, 7  ;;  %v4315_v8 = vsel %vm3966_vm3, %v568_v22, 0  ;;  %v4319_v5 = vsel %vm3966_vm3, %v575_v48, 0  ;;  %v4323_v26 = vsel %vm3966_vm3, %v582_v24, 0 }
  0x52   : > { %v589_v7 = vor.u32 %v587_v2, %v586_v39  ;;  %v593_v57 = vrot.slane %v591_v18, 7  ;;  %v600_v16 = vrot.slane %v598_v29, 7  ;;  %v607_v4 = vrot.slane %v605_v0, 7 }
  0x53   : > { %v678_v35 = vrot.slane %v503_v58, 1  ;;  %v681_v22 = vor.u32 %v680_v63, %v507_v47  ;;  %v552_v3 = vshll.u32 %v4291_v10, 16  ;;  %v5021_v18 = vshll.u32 %v4126_v42, 16 }
  0x54   : > { %1612 = vmatmul.mubr.bf16.vlgmr.msra.gmra.mrb[16].mxu1 %v5015_v60  ;;  %v4345_v2 = vsel %vm3966_vm3, %v589_v7, 0  ;;  %v5022_v58 = vshll.u32 %v4168_v50, 16  ;;  %v5023_v47 = vshll.u32 %v4189_v30, 16  ;;  %v5024_v48 = vshrl.u32 %v3934_v49, 16 }
  0x55   : > { %v596_v29 = vor.u32 %v5021_v18, %v593_v57  ;;  %3382 = vmatpush3.bf16.msra.mxu1 %v4241_v21  ;;  %1619 = vmatprep.mubr.bf16.mxu1 %v3934_v49  ;;  %v4359_v39 = vsel %vm3974_vm4, %v681_v22, 0  ;;  %v547_v7 = vor.u32 %v545_v27, %v544_v19  ;;  %v3704_v21 = vld [vmem:[%s5001_s1 + $0x90] sm:$0xff]  }
  0x56   : > { %v603_v0 = vor.u32 %v5022_v58, %v600_v16  ;;  %v610_v63 = vor.u32 %v5023_v47, %v607_v4  ;;  %v679_v24 = vor.u32 %v678_v35, %v5024_v48  ;;  %3383 = vmatprep.subr.bf16.mxu1 %v3703_v13  ;;  %v5025_v16 = vshll.u32 %v4073_v41, 16 }
  0x57   : > { %1186 = vmatmul.mubr.bf16.gmra.mrb[20].mxu0 %v4327_v61  ;;  %v4367_v57 = vsel %vm3966_vm3, %v596_v29, 0  ;;  %v5026_v4 = vshll.u32 %v4141_v1, 16  ;;  %v686_v29 = vrot.slane %v531_v23, 1  ;;  %v5027_v58 = vshrl.u32 %v4073_v41, 16  ;;  %v3705_v23 = vld [vmem:[%s5001_s1 + $0x98] sm:$0xff]  }
  0x58   : > { %v682_v49 = vrot.slane %v5025_v16, 1  ;;  %1193 = vmatprep.mubr.bf16.mxu0 %v4269_v28  ;;  %v4376_v19 = vsel %vm3966_vm3, %v603_v0, 0  ;;  %v4380_v22 = vsel %vm3966_vm3, %v610_v63, 0  ;;  %v4384_v18 = vsel %vm3974_vm4, %v679_v24, 0 }
  0x59   : > { %v684_v35 = vrot.slane %v5026_v4, 1  ;;  %v5028_v48 = vshrl.u32 %v4141_v1, 16  ;;  %v688_v0 = vrot.slane %v538_v34, 1  ;;  %v690_v4 = vrot.slane %v545_v27, 1  ;;  %3384 = vmatpush3.bf16.msra.mxu1 %v3703_v13 }
  0x5a   : > { %v683_v47 = vor.u32 %v682_v49, %v5027_v58  ;;  %v551_v63 = vrot.slane %v549_v62, 7  ;;  %v687_v60 = vor.u32 %v686_v29, %v528_v56  ;;  %v692_v24 = vrot.slane %v552_v3, 1  ;;  %3385 = vmatprep.subr.bf16.mxu1 %v3704_v21 }
  0x5b   : > { %v685_v16 = vor.u32 %v684_v35, %v5028_v48  ;;  %v689_v34 = vor.u32 %v688_v0, %v535_v12  ;;  %v691_v27 = vor.u32 %v690_v4, %v542_v6  ;;  %v4411_v56 = vsel %vm3966_vm3, %v547_v7, 0  ;;  %v3706_v12 = vld [vmem:[%s5001_s1 + $0xa0] sm:$0xff]   ;;  %v3707_v6 = vld [vmem:[%s5001_s1 + $0xa8] sm:$0xff]   ;;  %v3714_v0 = vld [vmem:[%s5001_s1 + $0x190] sm:$0xff]  }
  0x5c   : > { %v4401_v49 = vsel %vm3974_vm4, %v683_v47, 0  ;;  %v4415_v13 = vsel %vm3974_vm4, %v687_v60, 0  ;;  %v693_v29 = vor.u32 %v692_v24, %v549_v62  ;;  %1620 = vmatmul.mubr.bf16.gmra.mrb[20].mxu1 %v3990_v33  ;;  %v554_v33 = vor.u32 %v552_v3, %v551_v63  ;;  %v4459_v3 = vld [vmem:[%s5001_s1 + $0x200] sm:$0xff]   ;;  %v3712_v48 = vld [vmem:[%s5001_s1 + $0x188] sm:$0xff]   ;;  %v3715_v4 = vld [vmem:[%s5001_s1 + $0x1d8] sm:$0xff]  }
  0x5d   : > { %v4405_v35 = vsel %vm3974_vm4, %v685_v16, 0  ;;  %v4420_v58 = vsel %vm3974_vm4, %v689_v34, 0  ;;  %v4424_v47 = vsel %vm3974_vm4, %v691_v27, 0  ;;  %1627 = vmatprep.mubr.bf16.mxu1 %v4000_v37  ;;  %3386 = vmatpush3.bf16.msra.mxu1 %v3704_v21  ;;  %v3710_v7 = vld [vmem:[%s5001_s1 + $0x180] sm:$0xff]   ;;  %v3711_v21 = vld [vmem:[%s5001_s1 + $0x1c8] sm:$0xff]   ;;  %v3713_v16 = vld [vmem:[%s5001_s1 + $0x1d0] sm:$0xff]  }
  0x5e   : > { %v4432_v60 = vsel %vm3974_vm4, %v693_v29, 0  ;;  %3387 = vmatprep.subr.bf16.mxu1 %v3705_v23  ;;  %v4441_v62 = vsel %vm3966_vm3, %v554_v33, 0  ;;  %v3716_v63 = vld [vmem:[%s5001_s1 + $0x198] sm:$0xff]   ;;  %v3718_v24 = vld [vmem:[%s5001_s1 + $0x1e0] sm:$0xff]   ;;  %v3720_v34 = vld [vmem:[%s5001_s1 + $0x1e8] sm:$0xff]  }
  0x5f   : > { %1194 = vmatmul.mubr.bf16.gmra.mrb[24].mxu0 %v4411_v56  ;;  %v3721_v27 = vld [vmem:[%s5001_s1 + $0x1a8] sm:$0xff]   ;;  %v3722_v29 = vld [vmem:[%s5001_s1 + $0x1f0] sm:$0xff]   ;;  %v3724_v33 = vld [vmem:[%s5001_s1 + $0x1f8] sm:$0xff]  }
  0x60   : > { %1201 = vmatprep.mubr.bf16.mxu0 %v4291_v10 }
  0x61   : > { %3388 = vmatpush3.bf16.msra.mxu1 %v3705_v23  ;;  %v3719_v23 = vld [vmem:[%s5001_s1 + $0x1a0] sm:$0xff]  }
  0x62   : > { %3389 = vmatprep.subr.bf16.mxu1 %v3706_v12 }
  0x64   : > { %1628 = vmatmul.mubr.bf16.gmra.mrb[24].mxu1 %v4059_v31 }
  0x65   : > { %1635 = vmatprep.mubr.bf16.mxu1 %v4073_v41  ;;  %3390 = vmatpush3.bf16.msra.mxu1 %v3706_v12  ;;  %v3723_v12 = vld [vmem:[%s5001_s1 + $0x1b0] sm:$0xff]  }
  0x66   : > { %3391 = vmatprep.subr.bf16.mxu1 %v3707_v6 }
  0x67   : > { %1202 = vmatmul.mubr.bf16.gmra.mrb[28].mxu0 %v4441_v62 }
  0x68   : > { %1209 = vmatprep.mubr.bf16.mxu0 %v3938_v53 }
  0x69   : > { %3392 = vmatpush3.bf16.msra.mxu1 %v3707_v6  ;;  %v3725_v6 = vld [vmem:[%s5001_s1 + $0x1b8] sm:$0xff]  }
  0x6a   : > { %3393 = vmatprep.subr.bf16.mxu1 %v3708_v20 }
  0x6c   : > { %1636 = vmatmul.mubr.bf16.gmra.mrb[28].mxu1 %v4139_v43 }
  0x6d   : > { %1643 = vmatprep.mubr.bf16.mxu1 %v4141_v1  ;;  %3394 = vmatpush3.bf16.msra.mxu1 %v3708_v20  ;;  %v5029_v20 = vmov 0  }
  0x6e   : > { %3395 = vmatprep.subr.bf16.mxu1 %v3717_v14 }
  0x6f   : > { %1210 = vmatmul.mubr.bf16.gmra.mrb[32].mxu0 %v4295_v25 }
  0x70   : > { %1217 = vmatprep.mubr.bf16.mxu0 %v3947_v59 }
  0x71   : > { %3396 = vmatpush3.bf16.msra.mxu1 %v3717_v14  ;;  %v3727_v14 = vld [vmem:[%s5001_s1 + $0x208] sm:$0xff]  }
  0x72   : > { %3429 = vmatprep.subr.bf16.mxu1 %v4459_v3 }
  0x74   : > { %1644 = vmatmul.mubr.bf16.gmra.mrb[32].mxu1 %v4208_v51 }
  0x75   : > { %1651 = vmatprep.mubr.bf16.mxu1 %v4213_v11 }
  0x77   : > { %1218 = vmatmul.mubr.bf16.gmra.mrb[36].mxu0 %v4315_v8 }
  0x78   : > { %1225 = vmatprep.mubr.bf16.mxu0 %v4026_v52 }
  0x7c   : > { %1652 = vmatmul.mubr.bf16.gmra.mrb[36].mxu1 %v4278_v45 }
  0x7d   : > { %1659 = vmatprep.mubr.bf16.mxu1 %v4249_v54 }
  0x7f   : > { %1226 = vmatmul.mubr.bf16.gmra.mrb[40].mxu0 %v4319_v5 }
  0x80   : > { %1233 = vmatprep.mubr.bf16.mxu0 %v4041_v9 }
  0x84   : > { %1660 = vmatmul.mubr.bf16.gmra.mrb[40].mxu1 %v4327_v61 }
  0x85   : > { %1667 = vmatprep.mubr.bf16.mxu1 %v4269_v28 }
  0x87   : > { %1234 = vmatmul.mubr.bf16.gmra.mrb[44].mxu0 %v4323_v26 }
  0x88   : > { %1241 = vmatprep.mubr.bf16.mxu0 %v4079_v44 }
  0x8c   : > { %1668 = vmatmul.mubr.bf16.gmra.mrb[44].mxu1 %v4411_v56 }
  0x8d   : > { %1675 = vmatprep.mubr.bf16.mxu1 %v4291_v10 }
  0x8f   : > { %1242 = vmatmul.mubr.bf16.gmra.mrb[48].mxu0 %v4345_v2 }
  0x90   : > { %1249 = vmatprep.mubr.bf16.mxu0 %v4126_v42 }
  0x94   : > { %1676 = vmatmul.mubr.bf16.gmra.mrb[48].mxu1 %v4441_v62 }
  0x95   : > { %1683 = vmatprep.mubr.bf16.mxu1 %v3938_v53 }
  0x97   : > { %1250 = vmatmul.mubr.bf16.gmra.mrb[52].mxu0 %v4367_v57 }
  0x98   : > { %1257 = vmatprep.mubr.bf16.mxu0 %v4168_v50 }
  0x9c   : > { %1684 = vmatmul.mubr.bf16.gmra.mrb[52].mxu1 %v4295_v25 }
  0x9d   : > { %1691 = vmatprep.mubr.bf16.mxu1 %v3947_v59 }
  0x9f   : > { %1258 = vmatmul.mubr.bf16.gmra.mrb[56].mxu0 %v4376_v19 }
  0xa0   : > { %1265 = vmatprep.mubr.bf16.mxu0 %v4189_v30 }
  0xa4   : > { %1692 = vmatmul.mubr.bf16.gmra.mrb[56].mxu1 %v4315_v8 }
  0xa5   : > { %1699 = vmatprep.mubr.bf16.mxu1 %v4026_v52 }
  0xa7   : > { %1266 = vmatmul.mubr.bf16.gmra.mrb[60].mxu0 %v4380_v22 }
  0xa8   : > { %3349 = vmatprep.mubr.bf16.mxu0 %v4384_v18 }
  0xac   : > { %1700 = vmatmul.mubr.bf16.gmra.mrb[60].mxu1 %v4319_v5 }
  0xad   : > { %1707 = vmatprep.mubr.bf16.mxu1 %v4041_v9 }
  0xaf   : > { %3350 = vmatmul.mubr.bf16.vlgmr.msra.gmra.mrb[64].mxu0 %v4359_v39 }
  0xb0   : > { %3198 = vmatpush3.bf16.msra.mxu0 %v3710_v7  ;;  %3353 = vmatprep.mubr.bf16.mxu0 %v4401_v49 }
  0xb1   : > { %3199 = vmatprep.subr.bf16.mxu0 %v3711_v21 }
  0xb4   : > { %3200 = vmatpush3.bf16.msra.mxu0 %v3712_v48  ;;  %1708 = vmatmul.mubr.bf16.gmra.mrb[64].mxu1 %v4323_v26 }
  0xb5   : > { %3201 = vmatprep.subr.bf16.mxu0 %v3713_v16  ;;  %1715 = vmatprep.mubr.bf16.mxu1 %v4079_v44 }
  0xb7   : > { %3354 = vmatmul.mubr.bf16.gmra.mrb[68].mxu0 %v4405_v35 }
  0xb8   : > { %3202 = vmatpush3.bf16.msra.mxu0 %v3714_v0  ;;  %3357 = vmatprep.mubr.bf16.mxu0 %v4415_v13 }
  0xb9   : > { %3203 = vmatprep.subr.bf16.mxu0 %v3715_v4 }
  0xbc   : > { %3204 = vmatpush3.bf16.msra.mxu0 %v3716_v63  ;;  %1716 = vmatmul.mubr.bf16.gmra.mrb[68].mxu1 %v4345_v2 }
  0xbd   : > { %3205 = vmatprep.subr.bf16.mxu0 %v3718_v24  ;;  %1723 = vmatprep.mubr.bf16.mxu1 %v4126_v42 }
  0xbf   : > { %3358 = vmatmul.mubr.bf16.gmra.mrb[72].mxu0 %v4420_v58 }
  0xc0   : > { %3206 = vmatpush3.bf16.msra.mxu0 %v3719_v23  ;;  %3361 = vmatprep.mubr.bf16.mxu0 %v4424_v47 }
  0xc1   : > { %3207 = vmatprep.subr.bf16.mxu0 %v3720_v34 }
  0xc4   : > { %3208 = vmatpush3.bf16.msra.mxu0 %v3721_v27  ;;  %1724 = vmatmul.mubr.bf16.gmra.mrb[72].mxu1 %v4367_v57 }
  0xc5   : > { %3209 = vmatprep.subr.bf16.mxu0 %v3722_v29  ;;  %1731 = vmatprep.mubr.bf16.mxu1 %v4168_v50 }
  0xc7   : > { %3362 = vmatmul.mubr.bf16.gmra.mrb[76].mxu0 %v4432_v60 }
  0xc8   : > { %3210 = vmatpush3.bf16.msra.mxu0 %v3723_v12  ;;  %2175 = vmatprep.mubr.bf16.mxu0 %v4000_v37  ;;  %v3728_v37 = vld [vmem:[%s5001_s1 + $0x210] sm:$0xff]  }
  0xc9   : > { %3211 = vmatprep.subr.bf16.mxu0 %v3724_v33 }
  0xcc   : > { %3212 = vmatpush3.bf16.msra.mxu0 %v3725_v6  ;;  %1732 = vmatmul.mubr.bf16.gmra.mrb[76].mxu1 %v4376_v19 }
  0xcd   : > { %3397 = vmatprep.mubr.bf16.mxu1 %v5029_v20 }
  0xcf   : > { %2176 = vmatmul.mubr.bf16.vlgmr.msra.gmra.mrb[80].mxu0 %v4059_v31  ;;  %v3729_v31 = vld [vmem:[%s5001_s1 + $0x218] sm:$0xff]  }
  0xd0   : > { %2183 = vmatprep.mubr.bf16.mxu0 %v4073_v41  ;;  %v3730_v41 = vld [vmem:[%s5001_s1 + $0x220] sm:$0xff]  }
  0xd4   : > { %3398 = vmatmul.mubr.bf16.vlgmr.msra.gmra.mrb[80].mxu1 %v4384_v18 }
  0xd5   : > { %3430 = vmatpush3.bf16.msra.mxu1 %v4459_v3  ;;  %3401 = vmatprep.mubr.bf16.mxu1 %v4359_v39 }
  0xd6   : > { %3431 = vmatprep.subr.bf16.mxu1 %v3727_v14 }
  0xd7   : > { %2184 = vmatmul.mubr.bf16.gmra.mrb[84].mxu0 %v4139_v43  ;;  %v3731_v43 = vld [vmem:[%s5001_s1 + $0x228] sm:$0xff]  }
  0xd8   : > { %2191 = vmatprep.mubr.bf16.mxu0 %v4141_v1  ;;  %v3732_v1 = vld [vmem:[%s5001_s1 + $0x230] sm:$0xff]  }
  0xd9   : > { %3432 = vmatpush3.bf16.msra.mxu1 %v3727_v14 }
  0xda   : > { %3433 = vmatprep.subr.bf16.mxu1 %v3728_v37 }
  0xdc   : > { %3402 = vmatmul.mubr.bf16.gmra.mrb[84].mxu1 %v4401_v49 }
  0xdd   : > { %3405 = vmatprep.mubr.bf16.mxu1 %v4405_v35  ;;  %3434 = vmatpush3.bf16.msra.mxu1 %v3728_v37 }
  0xde   : > { %3435 = vmatprep.subr.bf16.mxu1 %v3729_v31 }
  0xdf   : > { %2192 = vmatmul.mubr.bf16.gmra.mrb[88].mxu0 %v4208_v51  ;;  %v3733_v51 = vld [vmem:[%s5001_s1 + $0x238] sm:$0xff]  }
  0xe0   : > { %2199 = vmatprep.mubr.bf16.mxu0 %v4213_v11 }
  0xe1   : > { %3436 = vmatpush3.bf16.msra.mxu1 %v3729_v31 }
  0xe2   : > { %3437 = vmatprep.subr.bf16.mxu1 %v3730_v41 }
  0xe4   : > { %3406 = vmatmul.mubr.bf16.gmra.mrb[88].mxu1 %v4415_v13 }
  0xe5   : > { %3409 = vmatprep.mubr.bf16.mxu1 %v4420_v58  ;;  %3438 = vmatpush3.bf16.msra.mxu1 %v3730_v41 }
  0xe6   : > { %3439 = vmatprep.subr.bf16.mxu1 %v3731_v43 }
  0xe7   : > { %2200 = vmatmul.mubr.bf16.gmra.mrb[92].mxu0 %v4278_v45 }
  0xe8   : > { %2207 = vmatprep.mubr.bf16.mxu0 %v4249_v54 }
  0xe9   : > { %3440 = vmatpush3.bf16.msra.mxu1 %v3731_v43 }
  0xea   : > { %3441 = vmatprep.subr.bf16.mxu1 %v3732_v1 }
  0xec   : > { %3410 = vmatmul.mubr.bf16.gmra.mrb[92].mxu1 %v4424_v47 }
  0xed   : > { %3413 = vmatprep.mubr.bf16.mxu1 %v4432_v60  ;;  %3442 = vmatpush3.bf16.msra.mxu1 %v3732_v1 }
  0xee   : > { %3443 = vmatprep.subr.bf16.mxu1 %v3733_v51 }
  0xef   : > { %2208 = vmatmul.mubr.bf16.gmra.mrb[96].mxu0 %v4327_v61 }
  0xf0   : > { %2215 = vmatprep.mubr.bf16.mxu0 %v4269_v28 }
  0xf1   : > { %3444 = vmatpush3.bf16.msra.mxu1 %v3733_v51 }
  0xf4   : > { %3414 = vmatmul.mubr.bf16.gmra.mrb[0].mxu1 %v4006_v40 }
  0xf5   : > { %3417 = vmatprep.mubr.bf16.mxu1 %v4016_v46 }
  0xf7   : > { %2216 = vmatmul.mubr.bf16.gmra.mrb[100].mxu0 %v4411_v56 }
  0xf8   : > { %2223 = vmatprep.mubr.bf16.mxu0 %v4291_v10 }
  0xfc   : > { %3418 = vmatmul.mubr.bf16.gmra.mrb[4].mxu1 %v4088_v55 }
  0xfd   : > { %3421 = vmatprep.mubr.bf16.mxu1 %v4107_v17 }
  0xff   : > { %2224 = vmatmul.mubr.bf16.gmra.mrb[104].mxu0 %v4441_v62 }
 0x100   : > { %2231 = vmatprep.mubr.bf16.mxu0 %v3938_v53 }
 0x102   : > { %v2941_v11 = vpop.f32.mrb[0].mxu0 }
 0x103   : > { %v2942_v54 = vpop.f32.mrb[1].mxu0 }
 0x104   : > { %v4602_v28 = vadd.f32 %v2942_v54, %v2941_v11  ;;  %v2944_v45 = vpop.f32.mrb[2].mxu0  ;;  %3422 = vmatmul.mubr.bf16.gmra.mrb[8].mxu1 %v4148_v15 }
 0x105   : > { %v2945_v61 = vpop.f32.mrb[3].mxu0  ;;  %3425 = vmatprep.mubr.bf16.mxu1 %v4198_v38 }
 0x106   : > { %v4604_v18 = vadd.f32 %v2945_v61, %v2944_v45 }
 0x107   : > { %2232 = vmatmul.mubr.bf16.gmra.mrb[108].mxu0 %v4295_v25 }
 0x108   : > { %2239 = vmatprep.mubr.bf16.mxu0 %v3947_v59 }
 0x10a   : > { %v2947_v10 = vpop.f32.mrb[4].mxu0 }
 0x10b   : > { %v2948_v56 = vpop.f32.mrb[5].mxu0 }
 0x10c   : > { %v4610_v62 = vadd.f32 %v2948_v56, %v2947_v10  ;;  %v2950_v53 = vpop.f32.mrb[6].mxu0  ;;  %3426 = vmatmul.mubr.bf16.gmra.mrb[12].mxu1 %v4234_v36 }
 0x10d   : > { %v2951_v3 = vpop.f32.mrb[7].mxu0  ;;  %3445 = vmatprep.mubr.bf16.mxu1 %v4359_v39 }
 0x10e   : > { %v4612_v7 = vadd.f32 %v2951_v3, %v2950_v53 }
 0x10f   : > { %2240 = vmatmul.mubr.bf16.gmra.mrb[112].mxu0 %v4315_v8 }
 0x110   : > { %2247 = vmatprep.mubr.bf16.mxu0 %v4026_v52 }
 0x112   : > { %v2953_v21 = vpop.f32.mrb[8].mxu0 }
 0x113   : > { %v2954_v25 = vpop.f32.mrb[9].mxu0 }
 0x114   : > { %v4618_v48 = vadd.f32 %v2954_v25, %v2953_v21  ;;  %v2956_v59 = vpop.f32.mrb[10].mxu0  ;;  %3446 = vmatmul.mubr.bf16.vlgmr.msra.gmra.mrb[80].mxu1 %v4401_v49 }
 0x115   : > { %v2957_v16 = vpop.f32.mrb[11].mxu0  ;;  %3449 = vmatprep.mubr.bf16.mxu1 %v4405_v35 }
 0x116   : > { %v4621_v0 = vadd.f32 %v2957_v16, %v2956_v59 }
 0x117   : > { %2248 = vmatmul.mubr.bf16.gmra.mrb[116].mxu0 %v4319_v5 }
 0x118   : > { %2255 = vmatprep.mubr.bf16.mxu0 %v4041_v9 }
 0x11a   : > { %v2959_v39 = vpop.f32.mrb[12].mxu0 }
 0x11b   : > { %v2960_v8 = vpop.f32.mrb[13].mxu0 }
 0x11c   : > { %v4626_v4 = vadd.f32 %v2960_v8, %v2959_v39  ;;  %v2962_v52 = vpop.f32.mrb[14].mxu0  ;;  %3450 = vmatmul.mubr.bf16.gmra.mrb[84].mxu1 %v4415_v13 }
 0x11d   : > { %v2963_v63 = vpop.f32.mrb[15].mxu0  ;;  %3453 = vmatprep.mubr.bf16.mxu1 %v4420_v58 }
 0x11e   : > { %v4629_v24 = vadd.f32 %v2963_v63, %v2962_v52 }
 0x11f   : > { %2256 = vmatmul.mubr.bf16.gmra.mrb[120].mxu0 %v4323_v26 }
 0x120   : > { %2263 = vmatprep.mubr.bf16.mxu0 %v4079_v44 }
 0x122   : > { %v2965_v49 = vpop.f32.mrb[16].mxu0 }
 0x123   : > { %v2966_v5 = vpop.f32.mrb[17].mxu0 }
 0x124   : > { %v4634_v35 = vadd.f32 %v2966_v5, %v2965_v49  ;;  %v2968_v9 = vpop.f32.mrb[18].mxu0  ;;  %3454 = vmatmul.mubr.bf16.gmra.mrb[88].mxu1 %v4424_v47 }
 0x125   : > { %v2969_v23 = vpop.f32.mrb[19].mxu0  ;;  %3457 = vmatprep.mubr.bf16.mxu1 %v4432_v60 }
 0x126   : > { %v4637_v34 = vadd.f32 %v2969_v23, %v2968_v9 }
 0x127   : > { %2264 = vmatmul.mubr.bf16.gmra.mrb[124].mxu0 %v4345_v2  ;;  %v3077_v13 = vpop.f32.mrb[16].mxu1 }
 0x128   : > { %2271 = vmatprep.mubr.bf16.mxu0 %v4126_v42  ;;  %v3078_v26 = vpop.f32.mrb[17].mxu1 }
 0x129   : > { %v4642_v58 = vadd.f32 %v3078_v26, %v3077_v13  ;;  %v3080_v44 = vpop.f32.mrb[18].mxu1 }
 0x12a   : > { %v2971_v27 = vpop.f32.mrb[20].mxu0  ;;  %v3081_v29 = vpop.f32.mrb[19].mxu1 }
 0x12b   : > { %v2972_v12 = vpop.f32.mrb[21].mxu0  ;;  %v4644_v33 = vadd.f32 %v3081_v29, %v3080_v44 }
 0x12c   : > { %v4646_v47 = vadd.f32 %v2972_v12, %v2971_v27  ;;  %v2974_v6 = vpop.f32.mrb[22].mxu0  ;;  %3458 = vmatmul.mubr.bf16.gmra.mrb[92].mxu1 %v4006_v40 }
 0x12d   : > { %v2975_v60 = vpop.f32.mrb[23].mxu0  ;;  %3461 = vmatprep.mubr.bf16.mxu1 %v4016_v46 }
 0x12e   : > { %v4649_v14 = vadd.f32 %v2975_v60, %v2974_v6 }
 0x12f   : > { %2272 = vmatmul.mubr.bf16.gmra.mrb[128].mxu0 %v4367_v57  ;;  %v3083_v42 = vpop.f32.mrb[20].mxu1 }
 0x130   : > { %2279 = vmatprep.mubr.bf16.mxu0 %v4168_v50  ;;  %v3084_v2 = vpop.f32.mrb[21].mxu1 }
 0x131   : > { %v4654_v37 = vadd.f32 %v3084_v2, %v3083_v42  ;;  %v3086_v31 = vpop.f32.mrb[22].mxu1 }
 0x132   : > { %v2977_v41 = vpop.f32.mrb[24].mxu0  ;;  %v3087_v43 = vpop.f32.mrb[23].mxu1 }
 0x133   : > { %v2978_v1 = vpop.f32.mrb[25].mxu0  ;;  %v4656_v51 = vadd.f32 %v3087_v43, %v3086_v31 }
 0x134   : > { %v4658_v40 = vadd.f32 %v2978_v1, %v2977_v41  ;;  %v2980_v11 = vpop.f32.mrb[26].mxu0  ;;  %3462 = vmatmul.mubr.bf16.gmra.mrb[0].mxu1 %v4088_v55 }
 0x135   : > { %v2981_v46 = vpop.f32.mrb[27].mxu0  ;;  %3465 = vmatprep.mubr.bf16.mxu1 %v4107_v17 }
 0x136   : > { %v4661_v54 = vadd.f32 %v2981_v46, %v2980_v11 }
 0x137   : > { %2280 = vmatmul.mubr.bf16.gmra.mrb[132].mxu0 %v4376_v19  ;;  %v3089_v50 = vpop.f32.mrb[24].mxu1 }
 0x138   : > { %2287 = vmatprep.mubr.bf16.mxu0 %v4189_v30  ;;  %v3090_v57 = vpop.f32.mrb[25].mxu1 }
 0x139   : > { %v4666_v45 = vadd.f32 %v3090_v57, %v3089_v50  ;;  %v3092_v61 = vpop.f32.mrb[26].mxu1 }
 0x13a   : > { %v2983_v10 = vpop.f32.mrb[28].mxu0  ;;  %v3093_v56 = vpop.f32.mrb[27].mxu1 }
 0x13b   : > { %v2984_v53 = vpop.f32.mrb[29].mxu0  ;;  %v4668_v3 = vadd.f32 %v3093_v56, %v3092_v61 }
 0x13c   : > { %v4670_v55 = vadd.f32 %v2984_v53, %v2983_v10  ;;  %v2986_v21 = vpop.f32.mrb[30].mxu0  ;;  %3466 = vmatmul.mubr.bf16.gmra.mrb[4].mxu1 %v4148_v15 }
 0x13d   : > { %v2987_v17 = vpop.f32.mrb[31].mxu0  ;;  %3469 = vmatprep.mubr.bf16.mxu1 %v4198_v38 }
 0x13e   : > { %v4673_v25 = vadd.f32 %v2987_v17, %v2986_v21 }
 0x13f   : > { %2288 = vmatmul.mubr.bf16.gmra.mrb[136].mxu0 %v4380_v22  ;;  %v3095_v30 = vpop.f32.mrb[28].mxu1 }
 0x140   : > { %2295 = vmatprep.mubr.bf16.mxu0 %v5029_v20  ;;  %v3096_v19 = vpop.f32.mrb[29].mxu1 }
 0x141   : > { %v4678_v59 = vadd.f32 %v3096_v19, %v3095_v30  ;;  %v3098_v16 = vpop.f32.mrb[30].mxu1 }
 0x142   : > { %v2989_v39 = vpop.f32.mrb[32].mxu0  ;;  %v3099_v8 = vpop.f32.mrb[31].mxu1 }
 0x143   : > { %v2990_v52 = vpop.f32.mrb[33].mxu0  ;;  %v4680_v63 = vadd.f32 %v3099_v8, %v3098_v16 }
 0x144   : > { %v4682_v15 = vadd.f32 %v2990_v52, %v2989_v39  ;;  %v2992_v49 = vpop.f32.mrb[34].mxu0  ;;  %3470 = vmatmul.mubr.bf16.gmra.mrb[8].mxu1 %v4234_v36 }
 0x145   : > { %v2993_v38 = vpop.f32.mrb[35].mxu0  ;;  %3473 = vmatprep.mubr.bf16.mxu1 %v4255_v32 }
 0x146   : > { %v4685_v5 = vadd.f32 %v2993_v38, %v2992_v49 }
 0x147   : > { %2296 = vmatmul.mubr.bf16.gmra.mrb[140].mxu0 %v5029_v20  ;;  %v3101_v22 = vpop.f32.mrb[32].mxu1 }
 0x148   : > { %v3102_v9 = vpop.f32.mrb[33].mxu1 }
 0x149   : > { %v4689_v23 = vadd.f32 %v3102_v9, %v3101_v22  ;;  %v3104_v13 = vpop.f32.mrb[34].mxu1 }
 0x14a   : > { %v2995_v26 = vpop.f32.mrb[36].mxu0  ;;  %v3105_v44 = vpop.f32.mrb[35].mxu1 }
 0x14b   : > { %v2996_v27 = vpop.f32.mrb[37].mxu0  ;;  %v4691_v29 = vadd.f32 %v3105_v44, %v3104_v13 }
 0x14c   : > { %v2997_v12 = vadd.f32 %v2996_v27, %v2995_v26  ;;  %v2998_v6 = vpop.f32.mrb[38].mxu0  ;;  %3474 = vmatmul.mubr.bf16.gmra.mrb[12].mxu1 %v5029_v20 }
 0x14d   : > { %v2999_v36 = vpop.f32.mrb[39].mxu0 }
 0x14e   : > { %v4694_v60 = vadd.f32 %v2999_v36, %v2998_v6 }
 0x14f   : > { %v3107_v32 = vpop.f32.mrb[36].mxu1 }
 0x150   : > { %v3108_v42 = vpop.f32.mrb[37].mxu1 }
 0x151   : > { %v4696_v2 = vadd.f32 %v3108_v42, %v3107_v32  ;;  %v3110_v31 = vpop.f32.mrb[38].mxu1 }
 0x152   : > { %v3001_v41 = vpop.f32.mrb[40].mxu0  ;;  %v3111_v43 = vpop.f32.mrb[39].mxu1 }
 0x153   : > { %v3002_v1 = vpop.f32.mrb[41].mxu0  ;;  %v4698_v11 = vadd.f32 %v3111_v43, %v3110_v31 }
 0x154   : > { %v4700_v46 = vadd.f32 %v3002_v1, %v3001_v41  ;;  %v3004_v50 = vpop.f32.mrb[42].mxu0 }
 0x155   : > { %v3005_v57 = vpop.f32.mrb[43].mxu0 }
 0x156   : > { %v4702_v61 = vadd.f32 %v3005_v57, %v3004_v50 }
 0x157   : > { %v3113_v20 = vpop.f32.mrb[40].mxu1 }
 0x158   : > { %v3114_v10 = vpop.f32.mrb[41].mxu1 }
 0x159   : > { %v4704_v56 = vadd.f32 %v3114_v10, %v3113_v20  ;;  %v3116_v53 = vpop.f32.mrb[42].mxu1 }
 0x15a   : > { %v3007_v21 = vpop.f32.mrb[44].mxu0  ;;  %v3117_v17 = vpop.f32.mrb[43].mxu1 }
 0x15b   : > { %v3008_v30 = vpop.f32.mrb[45].mxu0  ;;  %v4706_v19 = vadd.f32 %v3117_v17, %v3116_v53 }
 0x15c   : > { %v4708_v16 = vadd.f32 %v3008_v30, %v3007_v21  ;;  %v3010_v39 = vpop.f32.mrb[46].mxu0 }
 0x15d   : > { %v3011_v8 = vpop.f32.mrb[47].mxu0 }
 0x15e   : > { %v4710_v52 = vadd.f32 %v3011_v8, %v3010_v39 }
 0x15f   : > { %v3119_v49 = vpop.f32.mrb[44].mxu1 }
 0x160   : > { %v3120_v38 = vpop.f32.mrb[45].mxu1 }
 0x161   : > { %v4712_v22 = vadd.f32 %v3120_v38, %v3119_v49  ;;  %v3122_v9 = vpop.f32.mrb[46].mxu1 }
 0x162   : > { %v3013_v13 = vpop.f32.mrb[48].mxu0  ;;  %v3123_v26 = vpop.f32.mrb[47].mxu1 }
 0x163   : > { %v3014_v44 = vpop.f32.mrb[49].mxu0  ;;  %v4714_v27 = vadd.f32 %v3123_v26, %v3122_v9 }
 0x164   : > { %v4716_v6 = vadd.f32 %v3014_v44, %v3013_v13  ;;  %v3016_v36 = vpop.f32.mrb[50].mxu0 }
 0x165   : > { %v3017_v32 = vpop.f32.mrb[51].mxu0 }
 0x166   : > { %v4718_v42 = vadd.f32 %v3017_v32, %v3016_v36 }
 0x167   : > { %v3125_v31 = vpop.f32.mrb[48].mxu1 }
 0x168   : > { %v3126_v41 = vpop.f32.mrb[49].mxu1 }
 0x169   : > { %v3127_v43 = vadd.f32 %v3126_v41, %v3125_v31  ;;  %v3128_v1 = vpop.f32.mrb[50].mxu1 }
 0x16a   : > { %v3019_v50 = vpop.f32.mrb[52].mxu0  ;;  %v3129_v57 = vpop.f32.mrb[51].mxu1 }
 0x16b   : > { %v3020_v20 = vpop.f32.mrb[53].mxu0  ;;  %v4721_v10 = vadd.f32 %v3127_v43, %v4682_v15  ;;  %v3130_v53 = vadd.f32 %v3129_v57, %v3128_v1 }
 0x16c   : > { %v4723_v21 = vadd.f32 %v3020_v20, %v3019_v50  ;;  %v3022_v17 = vpop.f32.mrb[54].mxu0 }
 0x16d   : > { %v3023_v30 = vpop.f32.mrb[55].mxu0  ;;  %v4726_v39 = vadd.f32 %v3130_v53, %v4685_v5 }
 0x16e   : > { %v4728_v8 = vadd.f32 %v3023_v30, %v3022_v17 }
 0x16f   : > { %v3131_v49 = vpop.f32.mrb[52].mxu1 }
 0x170   : > { %v3132_v38 = vpop.f32.mrb[53].mxu1 }
 0x171   : > { %v3133_v9 = vadd.f32 %v3132_v38, %v3131_v49  ;;  %v3134_v13 = vpop.f32.mrb[54].mxu1 }
 0x172   : > { %v3025_v26 = vpop.f32.mrb[56].mxu0  ;;  %v3135_v44 = vpop.f32.mrb[55].mxu1 }
 0x173   : > { %v3026_v36 = vpop.f32.mrb[57].mxu0  ;;  %v4730_v32 = vadd.f32 %v3133_v9, %v2997_v12  ;;  %v3136_v15 = vadd.f32 %v3135_v44, %v3134_v13 }
 0x174   : > { %v4732_v31 = vadd.f32 %v3026_v36, %v3025_v26  ;;  %v3028_v41 = vpop.f32.mrb[58].mxu0 }
 0x175   : > { %v3029_v43 = vpop.f32.mrb[59].mxu0  ;;  %v4735_v1 = vadd.f32 %v3136_v15, %v4694_v60 }
 0x176   : > { %v4737_v5 = vadd.f32 %v3029_v43, %v3028_v41 }
 0x177   : > { %5030 = vst [vmem:[#allocation3_spill] sm:$0xff] %v4735_v1  ;;  %v3137_v50 = vpop.f32.mrb[56].mxu1 }
 0x178   : > { %v3138_v57 = vpop.f32.mrb[57].mxu1 }
 0x179   : > { %v3139_v20 = vadd.f32 %v3138_v57, %v3137_v50  ;;  %v3140_v53 = vpop.f32.mrb[58].mxu1 }
 0x17a   : > { %v3031_v17 = vpop.f32.mrb[60].mxu0  ;;  %v3141_v30 = vpop.f32.mrb[59].mxu1 }
 0x17b   : > { %v3032_v49 = vpop.f32.mrb[61].mxu0  ;;  %v4740_v12 = vadd.f32 %v3139_v20, %v4700_v46  ;;  %v3142_v38 = vadd.f32 %v3141_v30, %v3140_v53 }
 0x17c   : > { %v4742_v9 = vadd.f32 %v3032_v49, %v3031_v17  ;;  %v3034_v13 = vpop.f32.mrb[62].mxu0 }
 0x17d   : > { %v3035_v26 = vpop.f32.mrb[63].mxu0  ;;  %v4745_v60 = vadd.f32 %v3142_v38, %v4702_v61 }
 0x17e   : > { %v4747_v44 = vadd.f32 %v3035_v26, %v3034_v13 }
 0x17f   : > { %v3143_v36 = vpop.f32.mrb[60].mxu1 }
 0x180   : > { %v3144_v15 = vpop.f32.mrb[61].mxu1 }
 0x181   : > { %v3145_v41 = vadd.f32 %v3144_v15, %v3143_v36  ;;  %v3146_v43 = vpop.f32.mrb[62].mxu1 }
 0x182   : > { %v3351_v50 = vpop.f32.mrb[64].mxu0  ;;  %v3147_v57 = vpop.f32.mrb[63].mxu1 }
 0x183   : > { %v1317_v1 = vadd.f32 %v3351_v50, %v4610_v62  ;;  %v1308_v46 = vpop.f32.mrb[65].mxu0  ;;  %v4751_v20 = vadd.f32 %v3145_v41, %v4708_v16  ;;  %v3148_v53 = vadd.f32 %v3147_v57, %v3146_v43 }
 0x184   : > { %v1309_v17 = vadd.f32 %v4602_v28, %v1308_v46  ;;  %v3352_v30 = vpop.f32.mrb[66].mxu0 }
 0x185   : > { %v4755_v61 = vadd.f32 %v4654_v37, %v1317_v1  ;;  %v1320_v49 = vadd.f32 %v3352_v30, %v4612_v7  ;;  %v1311_v38 = vpop.f32.mrb[67].mxu0  ;;  %v4759_v13 = vadd.f32 %v3148_v53, %v4710_v52 }
 0x186   : > { %v4762_v26 = vadd.f32 %v4642_v58, %v1309_v17  ;;  %v1312_v62 = vadd.f32 %v4604_v18, %v1311_v38 }
 0x187   : > { %v4766_v16 = vadd.f32 %v4656_v51, %v1320_v49  ;;  %v3149_v36 = vpop.f32.mrb[64].mxu1 }
 0x188   : > { %v4769_v28 = vadd.f32 %v4644_v33, %v1312_v62  ;;  %v3150_v37 = vpop.f32.mrb[65].mxu1 }
 0x189   : > { %v3151_v1 = vadd.f32 %v3150_v37, %v3149_v36  ;;  %v3152_v15 = vpop.f32.mrb[66].mxu1 }
 0x18a   : > { %v3355_v7 = vpop.f32.mrb[68].mxu0  ;;  %v3153_v41 = vpop.f32.mrb[67].mxu1 }
 0x18b   : > { %v1333_v52 = vadd.f32 %v3355_v7, %v4626_v4  ;;  %v1324_v43 = vpop.f32.mrb[69].mxu0  ;;  %v4773_v58 = vadd.f32 %v3151_v1, %v4716_v6  ;;  %v3154_v50 = vadd.f32 %v3153_v41, %v3152_v15 }
 0x18c   : > { %v1325_v18 = vadd.f32 %v4618_v48, %v1324_v43  ;;  %v3356_v51 = vpop.f32.mrb[70].mxu0 }
 0x18d   : > { %v4777_v57 = vadd.f32 %v4678_v59, %v1333_v52  ;;  %v1336_v33 = vadd.f32 %v3356_v51, %v4629_v24  ;;  %v1327_v46 = vpop.f32.mrb[71].mxu0  ;;  %v4781_v53 = vadd.f32 %v3154_v50, %v4718_v42 }
 0x18e   : > { %v4784_v17 = vadd.f32 %v4666_v45, %v1325_v18  ;;  %v1328_v4 = vadd.f32 %v4621_v0, %v1327_v46 }
 0x18f   : > { %v4788_v6 = vadd.f32 %v4680_v63, %v1336_v33  ;;  %v3155_v30 = vpop.f32.mrb[68].mxu1 }
 0x190   : > { %v4791_v48 = vadd.f32 %v4668_v3, %v1328_v4  ;;  %v3156_v59 = vpop.f32.mrb[69].mxu1 }
 0x191   : > { %v3157_v49 = vadd.f32 %v3156_v59, %v3155_v30  ;;  %v3158_v38 = vpop.f32.mrb[70].mxu1 }
 0x192   : > { %v3359_v24 = vpop.f32.mrb[72].mxu0  ;;  %v3159_v62 = vpop.f32.mrb[71].mxu1 }
 0x193   : > { %v1349_v42 = vadd.f32 %v3359_v24, %v4646_v47  ;;  %v1340_v36 = vpop.f32.mrb[73].mxu0  ;;  %v4795_v45 = vadd.f32 %v3157_v49, %v4723_v21  ;;  %v3160_v37 = vadd.f32 %v3159_v62, %v3158_v38 }
 0x194   : > { %v1341_v0 = vadd.f32 %v4634_v35, %v1340_v36  ;;  %v3360_v63 = vpop.f32.mrb[74].mxu0 }
 0x195   : > { %v4799_v1 = vadd.f32 %v4696_v2, %v1349_v42  ;;  %v1352_v3 = vadd.f32 %v3360_v63, %v4649_v14  ;;  %v1343_v15 = vpop.f32.mrb[75].mxu0  ;;  %v4803_v7 = vadd.f32 %v3160_v37, %v4728_v8 }
 0x196   : > { %v4806_v41 = vadd.f32 %v4689_v23, %v1341_v0  ;;  %v1344_v47 = vadd.f32 %v4637_v34, %v1343_v15 }
 0x197   : > { %v4810_v21 = vadd.f32 %v4698_v11, %v1352_v3  ;;  %v3161_v52 = vpop.f32.mrb[72].mxu1 }
 0x198   : > { %v4813_v35 = vadd.f32 %v4691_v29, %v1344_v47  ;;  %v3162_v2 = vpop.f32.mrb[73].mxu1 }
 0x199   : > { %v3163_v43 = vadd.f32 %v3162_v2, %v3161_v52  ;;  %v3164_v50 = vpop.f32.mrb[74].mxu1 }
 0x19a   : > { %v3363_v14 = vpop.f32.mrb[76].mxu0  ;;  %v3165_v18 = vpop.f32.mrb[75].mxu1 }
 0x19b   : > { %v1365_v8 = vadd.f32 %v3363_v14, %v4670_v55  ;;  %v1356_v51 = vpop.f32.mrb[77].mxu0  ;;  %v4817_v23 = vadd.f32 %v3163_v43, %v4732_v31  ;;  %v3166_v33 = vadd.f32 %v3165_v18, %v3164_v50 }
 0x19c   : > { %v1357_v34 = vadd.f32 %v4658_v40, %v1356_v51  ;;  %v3364_v11 = vpop.f32.mrb[78].mxu0 }
 0x19d   : > { %v4821_v46 = vadd.f32 %v4712_v22, %v1365_v8  ;;  %v1368_v29 = vadd.f32 %v3364_v11, %v4673_v25  ;;  %v1359_v4 = vpop.f32.mrb[79].mxu0  ;;  %v4825_v30 = vadd.f32 %v3166_v33, %v4737_v5 }
 0x19e   : > { %v4828_v59 = vadd.f32 %v4704_v56, %v1357_v34  ;;  %v1360_v55 = vadd.f32 %v4661_v54, %v1359_v4 }
 0x19f   : > { %v4832_v31 = vadd.f32 %v4714_v27, %v1368_v29  ;;  %v3167_v49 = vpop.f32.mrb[76].mxu1 }
 0x1a0   : > { %v4835_v40 = vadd.f32 %v4706_v19, %v1360_v55  ;;  %v3168_v22 = vpop.f32.mrb[77].mxu1 }
 0x1a1   : > { %v3169_v38 = vadd.f32 %v3168_v22, %v3167_v49  ;;  %v3170_v24 = vpop.f32.mrb[78].mxu1 }
 0x1a2   : > { %v3213_v25 = vpop.f32.mrb[80].mxu0  ;;  %v3171_v62 = vpop.f32.mrb[79].mxu1 }
 0x1a3   : > { %v3214_v42 = vpop.f32.mrb[81].mxu0  ;;  %v4838_v5 = vadd.f32 %v3169_v38, %v4742_v9  ;;  %v3172_v56 = vadd.f32 %v3171_v62, %v3170_v24 }
 0x1a4   : > { %v3215_v36 = vadd.f32 %v3214_v42, %v3213_v25  ;;  %v3216_v37 = vpop.f32.mrb[82].mxu0 }
 0x1a5   : > { %v3217_v54 = vpop.f32.mrb[83].mxu0  ;;  %v4841_v27 = vadd.f32 %v3172_v56, %v4747_v44 }
 0x1a6   : > { %v3218_v0 = vadd.f32 %v3217_v54, %v3216_v37  ;;  %v4844_v19 = vadd.f32 %v3215_v36, %v4762_v26 }
 0x1a8   : > { %v4847_v63 = vadd.f32 %v3218_v0, %v4769_v28 }
 0x1aa   : > { %v3219_v3 = vpop.f32.mrb[84].mxu0 }
 0x1ab   : > { %v3220_v15 = vpop.f32.mrb[85].mxu0 }
 0x1ac   : > { %v3221_v47 = vadd.f32 %v3220_v15, %v3219_v3  ;;  %v3222_v52 = vpop.f32.mrb[86].mxu0 }
 0x1ad   : > { %v3223_v9 = vpop.f32.mrb[87].mxu0 }
 0x1ae   : > { %v3224_v2 = vadd.f32 %v3223_v9, %v3222_v52  ;;  %v3495_v43 = vadd.f32 %v3221_v47, %v4755_v61 }
 0x1b0   : > { %v4851_v50 = vadd.f32 %v3224_v2, %v4766_v16 }
 0x1b2   : > { %v3225_v44 = vpop.f32.mrb[88].mxu0 }
 0x1b3   : > { %v3226_v14 = vpop.f32.mrb[89].mxu0 }
 0x1b4   : > { %v3227_v18 = vadd.f32 %v3226_v14, %v3225_v44  ;;  %v3228_v8 = vpop.f32.mrb[90].mxu0 }
 0x1b5   : > { %v3229_v26 = vpop.f32.mrb[91].mxu0 }
 0x1b6   : > { %v3230_v51 = vadd.f32 %v3229_v26, %v3228_v8  ;;  %v4854_v28 = vadd.f32 %v3227_v18, %v4784_v17 }
 0x1b8   : > { %v4857_v33 = vadd.f32 %v3230_v51, %v4791_v48 }
 0x1ba   : > { %v3231_v34 = vpop.f32.mrb[92].mxu0 }
 0x1bb   : > { %v3232_v11 = vpop.f32.mrb[93].mxu0 }
 0x1bc   : > { %v3233_v29 = vadd.f32 %v3232_v11, %v3231_v34  ;;  %v3234_v4 = vpop.f32.mrb[94].mxu0 }
 0x1bd   : > { %v3235_v61 = vpop.f32.mrb[95].mxu0 }
 0x1be   : > { %v3236_v55 = vadd.f32 %v3235_v61, %v3234_v4  ;;  %v4860_v16 = vadd.f32 %v3233_v29, %v4777_v57 }
 0x1c0   : > { %v4863_v49 = vadd.f32 %v3236_v55, %v4788_v6 }
 0x1c2   : > { %v3237_v22 = vpop.f32.mrb[96].mxu0 }
 0x1c3   : > { %v3238_v38 = vpop.f32.mrb[97].mxu0 }
 0x1c4   : > { %v3239_v24 = vadd.f32 %v3238_v38, %v3237_v22  ;;  %v3240_v17 = vpop.f32.mrb[98].mxu0 }
 0x1c5   : > { %v3241_v25 = vpop.f32.mrb[99].mxu0 }
 0x1c6   : > { %v3242_v62 = vadd.f32 %v3241_v25, %v3240_v17  ;;  %v4866_v48 = vadd.f32 %v3239_v24, %v4806_v41 }
 0x1c8   : > { %v4869_v42 = vadd.f32 %v3242_v62, %v4813_v35 }
 0x1ca   : > { %v3243_v56 = vpop.f32.mrb[100].mxu0 }
 0x1cb   : > { %v3244_v36 = vpop.f32.mrb[101].mxu0 }
 0x1cc   : > { %v3245_v37 = vadd.f32 %v3244_v36, %v3243_v56  ;;  %v3246_v57 = vpop.f32.mrb[102].mxu0 }
 0x1cd   : > { %v3247_v54 = vpop.f32.mrb[103].mxu0 }
 0x1ce   : > { %v3248_v0 = vadd.f32 %v3247_v54, %v3246_v57  ;;  %v4872_v6 = vadd.f32 %v3245_v37, %v4799_v1 }
 0x1d0   : > { %v4875_v3 = vadd.f32 %v3248_v0, %v4810_v21 }
 0x1d2   : > { %v3249_v15 = vpop.f32.mrb[104].mxu0 }
 0x1d3   : > { %v3250_v47 = vpop.f32.mrb[105].mxu0 }
 0x1d4   : > { %v3251_v52 = vadd.f32 %v3250_v47, %v3249_v15  ;;  %v3252_v41 = vpop.f32.mrb[106].mxu0 }
 0x1d5   : > { %v3253_v9 = vpop.f32.mrb[107].mxu0 }
 0x1d6   : > { %v3254_v2 = vadd.f32 %v3253_v9, %v3252_v41  ;;  %v4878_v35 = vadd.f32 %v3251_v52, %v4828_v59  ;;  %v5031_v9 = vld [vmem:[#allocation3_spill] sm:$0xff] }
 0x1d8   : > { %v4881_v44 = vadd.f32 %v3254_v2, %v4835_v40 }
 0x1da   : > { %v3255_v14 = vpop.f32.mrb[108].mxu0 }
 0x1db   : > { %v3256_v18 = vpop.f32.mrb[109].mxu0 }
 0x1dc   : > { %v3257_v1 = vadd.f32 %v3256_v18, %v3255_v14  ;;  %v3258_v8 = vpop.f32.mrb[110].mxu0 }
 0x1dd   : > { %v3259_v26 = vpop.f32.mrb[111].mxu0 }
 0x1de   : > { %v3260_v21 = vadd.f32 %v3259_v26, %v3258_v8  ;;  %v4884_v51 = vadd.f32 %v3257_v1, %v4821_v46 }
 0x1e0   : > { %v4887_v34 = vadd.f32 %v3260_v21, %v4832_v31 }
 0x1e2   : > { %v3261_v11 = vpop.f32.mrb[112].mxu0 }
 0x1e3   : > { %v3262_v29 = vpop.f32.mrb[113].mxu0 }
 0x1e4   : > { %v3263_v59 = vadd.f32 %v3262_v29, %v3261_v11  ;;  %v3264_v4 = vpop.f32.mrb[114].mxu0 }
 0x1e5   : > { %v3265_v61 = vpop.f32.mrb[115].mxu0 }
 0x1e6   : > { %v3266_v40 = vadd.f32 %v3265_v61, %v3264_v4  ;;  %v4890_v55 = vadd.f32 %v4721_v10, %v3263_v59 }
 0x1e7   : > { %v3447_v46 = vpop.f32.mrb[80].mxu1 }
 0x1e8   : > { %v4900_v31 = vadd.f32 %v4726_v39, %v3266_v40  ;;  %v3496_v22 = vadd.f32 %v3495_v43, %v3447_v46  ;;  %v2338_v38 = vpop.f32.mrb[81].mxu1 }
 0x1e9   : > { %v3500_v24 = vadd.f32 %v4844_v19, %v2338_v38  ;;  %v3448_v10 = vpop.f32.mrb[82].mxu1 }
 0x1ea   : > { %v3267_v17 = vpop.f32.mrb[116].mxu0  ;;  %2499 = vst [vmem:[%s4897_s29 + $0x10] sm:$0xff] %v3496_v22  ;;  %v3504_v25 = vadd.f32 %v4851_v50, %v3448_v10  ;;  %v2341_v62 = vpop.f32.mrb[83].mxu1  ;;  %v2569_v47 = vmul.f32 %v3496_v22, %v3496_v22 }
 0x1eb   : > { %v3268_v56 = vpop.f32.mrb[117].mxu0  ;;  %2497 = vst [vmem:[%s4897_s29] sm:$0xff] %v3500_v24  ;;  %v3508_v36 = vadd.f32 %v4847_v63, %v2341_v62  ;;  %v2567_v54 = vmul.f32 %v3500_v24, %v3500_v24 }
 0x1ec   : > { %v3269_v37 = vadd.f32 %v3268_v56, %v3267_v17  ;;  %v3270_v57 = vpop.f32.mrb[118].mxu0  ;;  %2500 = vst [vmem:[%s4897_s29 + $0x18] sm:$0xff] %v3504_v25  ;;  %v2570_v18 = vmul.f32 %v3504_v25, %v3504_v25 }
 0x1ed   : > { %v3271_v39 = vpop.f32.mrb[119].mxu0  ;;  %2498 = vst [vmem:[%s4897_s29 + $0x8] sm:$0xff] %v3508_v36  ;;  %v2529_v43 = vadd.f32 %v3508_v36, %v3500_v24  ;;  %v2568_v0 = vmul.f32 %v3508_v36, %v3508_v36 }
 0x1ee   : > { %v3272_v19 = vadd.f32 %v3271_v39, %v3270_v57  ;;  %v4910_v15 = vadd.f32 %v4730_v32, %v3269_v37 }
 0x1ef   : > { %v2530_v50 = vadd.f32 %v3496_v22, %v2529_v43  ;;  %v2599_v52 = vadd.f32 %v2568_v0, %v2567_v54  ;;  %v3451_v41 = vpop.f32.mrb[84].mxu1 }
 0x1f0   : > { %v4913_v63 = vadd.f32 %v5031_v9, %v3272_v19  ;;  %v3512_v2 = vadd.f32 %v4860_v16, %v3451_v41  ;;  %v2354_v14 = vpop.f32.mrb[85].mxu1 }
 0x1f1   : > { %v2600_v1 = vadd.f32 %v2599_v52, %v2569_v47  ;;  %v3516_v8 = vadd.f32 %v4854_v28, %v2354_v14  ;;  %v2531_v26 = vadd.f32 %v3504_v25, %v2530_v50  ;;  %v3452_v21 = vpop.f32.mrb[86].mxu1 }
 0x1f2   : > { %v3273_v32 = vpop.f32.mrb[120].mxu0  ;;  %2503 = vst [vmem:[%s4897_s29 + $0x30] sm:$0xff] %v3512_v2  ;;  %v3520_v11 = vadd.f32 %v4863_v49, %v3452_v21  ;;  %v2357_v29 = vpop.f32.mrb[87].mxu1  ;;  %v2573_v25 = vmul.f32 %v3512_v2, %v3512_v2 }
 0x1f3   : > { %v3274_v59 = vpop.f32.mrb[121].mxu0  ;;  %2501 = vst [vmem:[%s4897_s29 + $0x20] sm:$0xff] %v3516_v8  ;;  %v2532_v4 = vadd.f32 %v3516_v8, %v2531_v26  ;;  %v2571_v61 = vmul.f32 %v3516_v8, %v3516_v8  ;;  %v2601_v40 = vadd.f32 %v2600_v1, %v2570_v18  ;;  %v3524_v16 = vadd.f32 %v4857_v33, %v2357_v29 }
 0x1f4   : > { %v3276_v46 = vpop.f32.mrb[122].mxu0  ;;  %2504 = vst [vmem:[%s4897_s29 + $0x38] sm:$0xff] %v3520_v11  ;;  %v3275_v22 = vadd.f32 %v3274_v59, %v3273_v32  ;;  %v2574_v54 = vmul.f32 %v3520_v11, %v3520_v11 }
 0x1f5   : > { %v3277_v38 = vpop.f32.mrb[123].mxu0  ;;  %v2602_v28 = vadd.f32 %v2601_v40, %v2571_v61  ;;  %2502 = vst [vmem:[%s4897_s29 + $0x28] sm:$0xff] %v3524_v16  ;;  %v2533_v24 = vadd.f32 %v3524_v16, %v2532_v4  ;;  %v2572_v10 = vmul.f32 %v3524_v16, %v3524_v16 }
 0x1f6   : > { %v3278_v17 = vadd.f32 %v3277_v38, %v3276_v46  ;;  %v4924_v49 = vadd.f32 %v4740_v12, %v3275_v22 }
 0x1f7   : > { %v2534_v62 = vadd.f32 %v3512_v2, %v2533_v24  ;;  %v2603_v56 = vadd.f32 %v2602_v28, %v2572_v10  ;;  %v3455_v36 = vpop.f32.mrb[88].mxu1 }
 0x1f8   : > { %v4927_v33 = vadd.f32 %v4745_v60, %v3278_v17  ;;  %v3528_v37 = vadd.f32 %v4872_v6, %v3455_v36  ;;  %v2370_v57 = vpop.f32.mrb[89].mxu1 }
 0x1f9   : > { %v2604_v39 = vadd.f32 %v2603_v56, %v2573_v25  ;;  %v3532_v43 = vadd.f32 %v4866_v48, %v2370_v57  ;;  %v2535_v0 = vadd.f32 %v3520_v11, %v2534_v62  ;;  %v3456_v19 = vpop.f32.mrb[90].mxu1 }
 0x1fa   : > { %v3279_v12 = vpop.f32.mrb[124].mxu0  ;;  %2507 = vst [vmem:[%s4897_s29 + $0x50] sm:$0xff] %v3528_v37  ;;  %v3536_v47 = vadd.f32 %v4875_v3, %v3456_v19  ;;  %v2373_v50 = vpop.f32.mrb[91].mxu1  ;;  %v2577_v21 = vmul.f32 %v3528_v37, %v3528_v37 }
 0x1fb   : > { %v3280_v52 = vpop.f32.mrb[125].mxu0  ;;  %2505 = vst [vmem:[%s4897_s29 + $0x40] sm:$0xff] %v3532_v43  ;;  %v2536_v60 = vadd.f32 %v3532_v43, %v2535_v0  ;;  %v2575_v41 = vmul.f32 %v3532_v43, %v3532_v43  ;;  %v2605_v9 = vadd.f32 %v2604_v39, %v2574_v54  ;;  %v3540_v6 = vadd.f32 %v4869_v42, %v2373_v50 }
 0x1fc   : > { %v3282_v2 = vpop.f32.mrb[126].mxu0  ;;  %2508 = vst [vmem:[%s4897_s29 + $0x58] sm:$0xff] %v3536_v47  ;;  %v3281_v14 = vadd.f32 %v3280_v52, %v3279_v12  ;;  %v2578_v61 = vmul.f32 %v3536_v47, %v3536_v47 }
 0x1fd   : > { %v3283_v18 = vpop.f32.mrb[127].mxu0  ;;  %v2606_v48 = vadd.f32 %v2605_v9, %v2575_v41  ;;  %2506 = vst [vmem:[%s4897_s29 + $0x48] sm:$0xff] %v3540_v6  ;;  %v2537_v1 = vadd.f32 %v3540_v6, %v2536_v60  ;;  %v2576_v8 = vmul.f32 %v3540_v6, %v3540_v6 }
 0x1fe   : > { %v3284_v26 = vadd.f32 %v3283_v18, %v3282_v2  ;;  %v4938_v3 = vadd.f32 %v4751_v20, %v3281_v14 }
 0x1ff   : > { %v2538_v32 = vadd.f32 %v3528_v37, %v2537_v1  ;;  %v2607_v11 = vadd.f32 %v2606_v48, %v2576_v8  ;;  %v3459_v29 = vpop.f32.mrb[92].mxu1 }
 0x200   : > { %v4941_v42 = vadd.f32 %v4759_v13, %v3284_v26  ;;  %v3544_v59 = vadd.f32 %v4884_v51, %v3459_v29  ;;  %v2386_v4 = vpop.f32.mrb[93].mxu1 }
 0x201   : > { %v2608_v40 = vadd.f32 %v2607_v11, %v2577_v21  ;;  %v3548_v16 = vadd.f32 %v4878_v35, %v2386_v4  ;;  %v2539_v46 = vadd.f32 %v3536_v47, %v2538_v32  ;;  %v3460_v22 = vpop.f32.mrb[94].mxu1 }
 0x202   : > { %v3285_v20 = vpop.f32.mrb[128].mxu0  ;;  %2511 = vst [vmem:[%s4897_s29 + $0x70] sm:$0xff] %v3544_v59  ;;  %v3552_v38 = vadd.f32 %v4887_v34, %v3460_v22  ;;  %v2389_v28 = vpop.f32.mrb[95].mxu1  ;;  %v2581_v54 = vmul.f32 %v3544_v59, %v3544_v59 }
 0x203   : > { %v3286_v24 = vpop.f32.mrb[129].mxu0  ;;  %2509 = vst [vmem:[%s4897_s29 + $0x60] sm:$0xff] %v3548_v16  ;;  %v2540_v13 = vadd.f32 %v3548_v16, %v2539_v46  ;;  %v2579_v10 = vmul.f32 %v3548_v16, %v3548_v16  ;;  %v2609_v17 = vadd.f32 %v2608_v40, %v2578_v61  ;;  %v3556_v51 = vadd.f32 %v4881_v44, %v2389_v28 }
 0x204   : > { %v3288_v25 = vpop.f32.mrb[130].mxu0  ;;  %2512 = vst [vmem:[%s4897_s29 + $0x78] sm:$0xff] %v3552_v38  ;;  %v3287_v62 = vadd.f32 %v3286_v24, %v3285_v20  ;;  %v2582_v47 = vmul.f32 %v3552_v38, %v3552_v38 }
 0x205   : > { %v3289_v56 = vpop.f32.mrb[131].mxu0  ;;  %v2610_v35 = vadd.f32 %v2609_v17, %v2579_v10  ;;  %2510 = vst [vmem:[%s4897_s29 + $0x68] sm:$0xff] %v3556_v51  ;;  %v2541_v36 = vadd.f32 %v3556_v51, %v2540_v13  ;;  %v2580_v37 = vmul.f32 %v3556_v51, %v3556_v51 }
 0x206   : > { %v3290_v57 = vadd.f32 %v3289_v56, %v3288_v25  ;;  %v4952_v34 = vadd.f32 %v4773_v58, %v3287_v62 }
 0x207   : > { %v2542_v39 = vadd.f32 %v3544_v59, %v2541_v36  ;;  %v2611_v43 = vadd.f32 %v2610_v35, %v2580_v37  ;;  %v3463_v0 = vpop.f32.mrb[0].mxu1 }
 0x208   : > { %v4955_v44 = vadd.f32 %v4781_v53, %v3290_v57  ;;  %v3559_v19 = vadd.f32 %v4910_v15, %v3463_v0  ;;  %v2402_v12 = vpop.f32.mrb[1].mxu1 }
 0x209   : > { %v2612_v50 = vadd.f32 %v2611_v43, %v2581_v54  ;;  %v3562_v52 = vadd.f32 %v4890_v55, %v2402_v12  ;;  %v2543_v60 = vadd.f32 %v3552_v38, %v2542_v39  ;;  %v3464_v41 = vpop.f32.mrb[2].mxu1 }
 0x20a   : > { %v3291_v58 = vpop.f32.mrb[132].mxu0  ;;  %2515 = vst [vmem:[%s4897_s29 + $0x90] sm:$0xff] %v3559_v19  ;;  %v3565_v9 = vadd.f32 %v4913_v63, %v3464_v41  ;;  %v2405_v6 = vpop.f32.mrb[3].mxu1  ;;  %v2585_v11 = vmul.f32 %v3559_v19, %v3559_v19 }
 0x20b   : > { %v3292_v2 = vpop.f32.mrb[133].mxu0  ;;  %2513 = vst [vmem:[%s4897_s29 + $0x80] sm:$0xff] %v3562_v52  ;;  %v2544_v53 = vadd.f32 %v3562_v52, %v2543_v60  ;;  %v2583_v14 = vmul.f32 %v3562_v52, %v3562_v52  ;;  %v2613_v18 = vadd.f32 %v2612_v50, %v2582_v47  ;;  %v3568_v15 = vadd.f32 %v4900_v31, %v2405_v6 }
 0x20c   : > { %v3294_v48 = vpop.f32.mrb[134].mxu0  ;;  %2516 = vst [vmem:[%s4897_s29 + $0x98] sm:$0xff] %v3565_v9  ;;  %v3293_v1 = vadd.f32 %v3292_v2, %v3291_v58  ;;  %v2586_v16 = vmul.f32 %v3565_v9, %v3565_v9 }
 0x20d   : > { %v3295_v8 = vpop.f32.mrb[135].mxu0  ;;  %v2614_v55 = vadd.f32 %v2613_v18, %v2583_v14  ;;  %2514 = vst [vmem:[%s4897_s29 + $0x88] sm:$0xff] %v3568_v15  ;;  %v2545_v26 = vadd.f32 %v3568_v15, %v2544_v53  ;;  %v2584_v21 = vmul.f32 %v3568_v15, %v3568_v15 }
 0x20e   : > { %v3296_v32 = vadd.f32 %v3295_v8, %v3294_v48  ;;  %v3582_v63 = vadd.f32 %v4795_v45, %v3293_v1 }
 0x20f   : > { %v2546_v29 = vadd.f32 %v3559_v19, %v2545_v26  ;;  %v2615_v59 = vadd.f32 %v2614_v55, %v2584_v21  ;;  %v3467_v4 = vpop.f32.mrb[4].mxu1 }
 0x210   : > { %v3588_v61 = vadd.f32 %v4803_v7, %v3296_v32  ;;  %v3571_v31 = vadd.f32 %v4938_v3, %v3467_v4  ;;  %v2418_v40 = vpop.f32.mrb[5].mxu1 }
 0x211   : > { %v2616_v46 = vadd.f32 %v2615_v59, %v2585_v11  ;;  %v3574_v22 = vadd.f32 %v4924_v49, %v2418_v40  ;;  %v2547_v20 = vadd.f32 %v3565_v9, %v2546_v29  ;;  %v3468_v38 = vpop.f32.mrb[6].mxu1 }
 0x212   : > { %v3297_v28 = vpop.f32.mrb[136].mxu0  ;;  %2519 = vst [vmem:[%s4897_s29 + $0xb0] sm:$0xff] %v3571_v31  ;;  %v3577_v45 = vadd.f32 %v4941_v42, %v3468_v38  ;;  %v2421_v24 = vpop.f32.mrb[7].mxu1  ;;  %v2589_v37 = vmul.f32 %v3571_v31, %v3571_v31 }
 0x213   : > { %v3298_v13 = vpop.f32.mrb[137].mxu0  ;;  %2517 = vst [vmem:[%s4897_s29 + $0xa0] sm:$0xff] %v3574_v22  ;;  %v2548_v10 = vadd.f32 %v3574_v22, %v2547_v20  ;;  %v2587_v7 = vmul.f32 %v3574_v22, %v3574_v22  ;;  %v2617_v17 = vadd.f32 %v2616_v46, %v2586_v16  ;;  %v3580_v3 = vadd.f32 %v4927_v33, %v2421_v24 }
 0x214   : > { %v3300_v51 = vpop.f32.mrb[138].mxu0  ;;  %2520 = vst [vmem:[%s4897_s29 + $0xb8] sm:$0xff] %v3577_v45  ;;  %v3299_v25 = vadd.f32 %v3298_v13, %v3297_v28  ;;  %v2590_v19 = vmul.f32 %v3577_v45, %v3577_v45 }
 0x215   : > { %v3301_v62 = vpop.f32.mrb[139].mxu0  ;;  %v2618_v49 = vadd.f32 %v2617_v17, %v2587_v7  ;;  %2518 = vst [vmem:[%s4897_s29 + $0xa8] sm:$0xff] %v3580_v3  ;;  %v2549_v56 = vadd.f32 %v3580_v3, %v2548_v10  ;;  %v2588_v35 = vmul.f32 %v3580_v3, %v3580_v3 }
 0x216   : > { %v3302_v36 = vadd.f32 %v3301_v62, %v3300_v51  ;;  %v3597_v42 = vadd.f32 %v4817_v23, %v3299_v25 }
 0x217   : > { %v2550_v57 = vadd.f32 %v3571_v31, %v2549_v56  ;;  %v2619_v54 = vadd.f32 %v2618_v49, %v2588_v35  ;;  %v3471_v39 = vpop.f32.mrb[8].mxu1 }
 0x218   : > { %v3603_v43 = vadd.f32 %v4825_v30, %v3302_v36  ;;  %v3583_v33 = vadd.f32 %v3582_v63, %v3471_v39  ;;  %v2434_v0 = vpop.f32.mrb[9].mxu1 }
 0x219   : > { %v2620_v12 = vadd.f32 %v2619_v54, %v2589_v37  ;;  %v3586_v47 = vadd.f32 %v4952_v34, %v2434_v0  ;;  %v2551_v50 = vadd.f32 %v3577_v45, %v2550_v57  ;;  %v3472_v52 = vpop.f32.mrb[10].mxu1 }
 0x21a   : > { %v3303_v60 = vpop.f32.mrb[140].mxu0  ;;  %2523 = vst [vmem:[%s4897_s29 + $0xd0] sm:$0xff] %v3583_v33  ;;  %v3589_v23 = vadd.f32 %v3588_v61, %v3472_v52  ;;  %v2437_v41 = vpop.f32.mrb[11].mxu1  ;;  %v2593_v55 = vmul.f32 %v3583_v33, %v3583_v33 }
 0x21b   : > { %v3304_v58 = vpop.f32.mrb[141].mxu0  ;;  %2521 = vst [vmem:[%s4897_s29 + $0xc0] sm:$0xff] %v3586_v47  ;;  %v2552_v9 = vadd.f32 %v3586_v47, %v2551_v50  ;;  %v2591_v6 = vmul.f32 %v3586_v47, %v3586_v47  ;;  %v2621_v2 = vadd.f32 %v2620_v12, %v2590_v19  ;;  %v3592_v30 = vadd.f32 %v4955_v44, %v2437_v41 }
 0x21c   : > { %v3306_v53 = vpop.f32.mrb[142].mxu0  ;;  %2524 = vst [vmem:[%s4897_s29 + $0xd8] sm:$0xff] %v3589_v23  ;;  %v3305_v14 = vadd.f32 %v3304_v58, %v3303_v60  ;;  %v2594_v29 = vmul.f32 %v3589_v23, %v3589_v23 }
 0x21d   : > { %v3307_v18 = vpop.f32.mrb[143].mxu0  ;;  %v2622_v15 = vadd.f32 %v2621_v2, %v2591_v6  ;;  %2522 = vst [vmem:[%s4897_s29 + $0xc8] sm:$0xff] %v3592_v30  ;;  %v2553_v34 = vadd.f32 %v3592_v30, %v2552_v9  ;;  %v2592_v48 = vmul.f32 %v3592_v30, %v3592_v30 }
 0x21e   : > { %v3308_v1 = vadd.f32 %v3307_v18, %v3306_v53  ;;  %v3594_v8 = vadd.f32 %v4838_v5, %v3305_v14 }
 0x21f   : > { %v2554_v26 = vadd.f32 %v3583_v33, %v2553_v34  ;;  %v2623_v21 = vadd.f32 %v2622_v15, %v2592_v48  ;;  %v3475_v32 = vpop.f32.mrb[12].mxu1 }
 0x220   : > { %v3600_v63 = vadd.f32 %v4841_v27, %v3308_v1  ;;  %v3595_v44 = vadd.f32 %v3594_v8, %v3475_v32  ;;  %v2450_v11 = vpop.f32.mrb[13].mxu1 }
 0x221   : > { %v2624_v59 = vadd.f32 %v2623_v21, %v2593_v55  ;;  %v3598_v4 = vadd.f32 %v3597_v42, %v2450_v11  ;;  %v2555_v61 = vadd.f32 %v3589_v23, %v2554_v26  ;;  %v3476_v31 = vpop.f32.mrb[14].mxu1 }
 0x222   : > { %2527 = vst [vmem:[%s4897_s29 + $0xf0] sm:$0xff] %v3595_v44  ;;  %v3601_v40 = vadd.f32 %v3600_v63, %v3476_v31  ;;  %v2453_v16 = vpop.f32.mrb[15].mxu1  ;;  %v2597_v38 = vmul.f32 %v3595_v44, %v3595_v44 }
 0x223   : > { %2525 = vst [vmem:[%s4897_s29 + $0xe0] sm:$0xff] %v3598_v4  ;;  %v2556_v5 = vadd.f32 %v3598_v4, %v2555_v61  ;;  %v2595_v46 = vmul.f32 %v3598_v4, %v3598_v4  ;;  %v2625_v22 = vadd.f32 %v2624_v59, %v2594_v29  ;;  %v3604_v20 = vadd.f32 %v3603_v43, %v2453_v16 }
 0x224   : > { %2528 = vst [vmem:[%s4897_s29 + $0xf8] sm:$0xff] %v3601_v40  ;;  %v2598_v24 = vmul.f32 %v3601_v40, %v3601_v40 }
 0x225   : > { %v2626_v27 = vadd.f32 %v2625_v22, %v2595_v46  ;;  %2526 = vst [vmem:[%s4897_s29 + $0xe8] sm:$0xff] %v3604_v20  ;;  %v2557_v28 = vadd.f32 %v3604_v20, %v2556_v5  ;;  %v2596_v45 = vmul.f32 %v3604_v20, %v3604_v20 }
 0x227   : > { %v2558_v13 = vadd.f32 %v3595_v44, %v2557_v28  ;;  %v2627_v10 = vadd.f32 %v2626_v27, %v2596_v45 }
 0x229   : > { %v2559_v7 = vadd.f32 %v3601_v40, %v2558_v13  ;;  %v2628_v17 = vadd.f32 %v2627_v10, %v2597_v38 }
 0x22b   : > { %v2560_v3 = vrot.slane %v2559_v7, 4  ;;  %v2629_v51 = vadd.f32 %v2628_v17, %v2598_v24 }
 0x22d   : > { %v2561_v25 = vadd.f32 %v2560_v3, %v2559_v7  ;;  %v2630_v62 = vrot.slane %v2629_v51, 4 }
 0x22f   : > { %v2562_v49 = vrot.slane %v2561_v25, 2  ;;  %v2631_v56 = vadd.f32 %v2630_v62, %v2629_v51 }
 0x231   : > { %v2563_v35 = vadd.f32 %v2562_v49, %v2561_v25  ;;  %v2632_v36 = vrot.slane %v2631_v56, 2 }
 0x233   : > { %v2564_v42 = vrot.slane %v2563_v35, 1  ;;  %v2633_v37 = vadd.f32 %v2632_v36, %v2631_v56 }
 0x235   : > { %v2565_v57 = vadd.f32 %v2564_v42, %v2563_v35  ;;  %v2634_v54 = vrot.slane %v2633_v37, 1 }
 0x237   : > { %2566 = vst [vmem:[%s265_s7] sm:$0x1] %v2565_v57  ;;  %v2635_v39 = vadd.f32 %v2634_v54, %v2633_v37 }
 0x239   : > { %2636 = vst [vmem:[%s268_s10] sm:$0x1] %v2635_v39 }
 0x23a PF: > { %s17_s21 = sadd.s32 1, %s3740_s21  }
 0x23b   : > { %p14_p4 = scmp.ge.s32.totalorder %s17_s21, 4  }
 0x23d   :  { %16 = sbr.rel (!%p14_p4) target bundleno = 1 (0x1), region = 94 }

</bundles_post_ra>
